<compile_context>
chip_gen: v7x
topology: tpu7x:2x2x1
jax: 0.10.0
libtpu: 0.0.40
codegen_flags: <defaults>
</compile_context>

<pallas_src>
import jax
import jax.numpy as jnp
from jax.experimental import pallas as pl
from jax.experimental.pallas import tpu as pltpu

LN_EPS = 1e-12       # espnet LayerNorm eps
HALO = 8             # sublane-aligned halo rows fetched from each neighbouring tile
MAX_TILE_T = 1024    # cap on the time tile (raised from 256 per perf review)


def _csgu_kernel(x_r_ref, x_g_ref, halo_lo_ref, halo_hi_ref,
                 gamma_ref, beta_ref, conv_w_ref, lin_w_ref, lin_b_ref,
                 *rest):
    """One (batch, time-tile) block of the CSGU forward."""
    if len(rest) == 2:
        gate_add_ref, out_ref = rest             # variant with gate_add
    else:
        gate_add_ref = None
        (out_ref,) = rest                        # variant without gate_add

    tt, C = x_g_ref.shape[1], x_g_ref.shape[2]
    K = conv_w_ref.shape[0]
    pad = (K - 1) // 2

    gamma = gamma_ref[...]                       # (1, C) f32
    beta = beta_ref[...]                         # (1, C) f32
    conv_w = conv_w_ref[...]                     # (K, C) f32
    lin_w = lin_w_ref[...]                       # (C, C) bf16
    lin_b = lin_b_ref[...]                       # (1, C) f32 (conv bias folded in)

    def layer_norm(v):
        # Single pass: mean and mean-of-squares from one read of v (one fewer full-tile
        # VPU pass than the centered two-pass form; matters on v5e's VALU).
        v = v.astype(jnp.float32)
        mean = jnp.mean(v, axis=-1, keepdims=True)
        mean_sq = jnp.mean(v * v, axis=-1, keepdims=True)
        var = jnp.maximum(mean_sq - mean * mean, 0.0)
        return (v - mean) * jax.lax.rsqrt(var + LN_EPS) * gamma + beta

    def depthwise_conv(src):
        # Depthwise conv along rows as K XLU rolls; rows whose receptive field wraps
        # around the array edge are garbage -- callers overwrite / ignore those rows.
        L = src.shape[0]
        acc = None
        for k in range(K):                       # K is small & static
            d = k - pad
            rolled = src if d == 0 else pltpu.roll(src, shift=(-d) % L, axis=0)
            term = rolled * conv_w[k:k + 1, :]
            acc = term if acc is None else acc + term
        # conv bias is folded into lin_b in the wrapper -> no bias add here.
        return acc

    def linear(a):
        # bf16 operands on the MXU, f32 accumulation.
        return jnp.dot(a.astype(jnp.bfloat16), lin_w,
                       preferred_element_type=jnp.float32) + lin_b

    def gated(lo, length, y):
        if gate_add_ref is not None:
            y = y + gate_add_ref[0, pl.ds(lo, length), :].astype(jnp.float32)
        return y                                 # gate_activation == 'identity'

    x_g_ln = layer_norm(x_g_ref[0])              # (tt, C) f32

    # ---- main path: conv rolls directly on the tile (no halo-extended copy) ------------
    y = gated(0, tt, linear(depthwise_conv(x_g_ln)))
    out_ref[0] = (x_r_ref[0].astype(jnp.float32) * y).astype(out_ref.dtype)

    if pad == 0:
        return                                   # K == 1: no cross-row taps, nothing to fix up.

    # ---- boundary fix-up: first / last HALO output rows recomputed with halo data ------
    # Halos are the 8 neighbouring x_g rows (LayerNorm is per-row, so re-normalizing them is
    # cheap); they are zeroed at the sequence edges, matching torch's zero padding.
    t_idx = pl.program_id(1)
    halo_lo = jnp.where(t_idx == 0, 0.0, layer_norm(halo_lo_ref[0]))                  # (8, C)
    halo_hi = jnp.where(t_idx == pl.num_programs(1) - 1, 0.0,
                        layer_norm(halo_hi_ref[0]))                                   # (8, C)

    # Rows [0, 8): receptive field lives in halo_lo ++ x_g_ln[:16]   (pad <= 8 <= tt/2).
    top_src = jnp.concatenate([halo_lo, x_g_ln[:2 * HALO, :]], axis=0)                # (24, C)
    top_y = gated(0, HALO, linear(depthwise_conv(top_src)[HALO:2 * HALO, :]))
    out_ref[0, pl.ds(0, HALO), :] = (
        x_r_ref[0, pl.ds(0, HALO), :].astype(jnp.float32) * top_y).astype(out_ref.dtype)

    # Rows [tt-8, tt): receptive field lives in x_g_ln[tt-16:] ++ halo_hi.
    bot_src = jnp.concatenate([x_g_ln[tt - 2 * HALO:, :], halo_hi], axis=0)           # (24, C)
    bot_y = gated(tt - HALO, HALO, linear(depthwise_conv(bot_src)[HALO:2 * HALO, :]))
    out_ref[0, pl.ds(tt - HALO, HALO), :] = (
        x_r_ref[0, pl.ds(tt - HALO, HALO), :].astype(jnp.float32) * bot_y).astype(out_ref.dtype)

    # TODO(synk): training-mode dropout (dropout_rate > 0) not implemented; identity at inference.


def _physical_vmem_bytes():
    """Physical VMEM of the local TPU generation (64 MiB v7x, 128 MiB v5e/v6e)."""
    try:
        info = pltpu.get_tpu_info()
        for attr in ("vmem_capacity_bytes", "vmem_bytes", "vmem_size_bytes"):
            v = getattr(info, attr, None)
            if v:
                return int(v)
    except Exception:
        pass
    return 64 * 1024 * 1024   # conservative default (v7x)


def _vmem_estimate(tile_t, C, K, act_bytes, n_stream):
    """Per-step VMEM footprint of the kernel (no artificial floor)."""
    blk_act = tile_t * C * act_bytes
    streams = n_stream * 2 * blk_act               # double-buffered x_r, x_g, out (, gate_add)
    halos = 2 * 2 * HALO * C * act_bytes            # double-buffered 8-row halo blocks
    weights = C * C * 2 + (K + 3) * C * 4           # single-buffered lin_w(bf16), conv_w, gamma/beta/bias
    live = 6 * tile_t * C * 4                       # f32 live set: LN'd x_g, roll, acc, y, x_r, product
    boundary = 12 * 3 * HALO * C * 4                # small boundary fix-up temporaries
    return streams + halos + weights + live + boundary


def _supports_single_buffer():
    try:
        pl.BlockSpec((1, 128), lambda n, t: (0, 0), pipeline_mode=pl.Buffered(1))
        return True
    except Exception:
        return False


def csgu_forward(x, params, gate_add=None, *, tile_t=None, interpret=False):
    """CSGU forward.  x: (N, T, D) float32 or bfloat16.  Returns (N, T, D // 2) in x.dtype.

    Passing bf16 x / gate_add halves HBM traffic on this memory-bound kernel; LayerNorm and
    the conv run in f32 and the MXU matmul accumulates in f32 regardless of streaming dtype.
    """
    N, T, D = x.shape
    C = D // 2
    gamma, beta, conv_w_kc, conv_b, lin_w_t, lin_b = params
    K = conv_w_kc.shape[0]
    pad = (K - 1) // 2

    if D != 2 * C:
        raise NotImplementedError("size must be even")
    if K % 2 == 0:
        # TODO(synk): even kernel_size changes the output length in torch Conv1d; unsupported.
        raise NotImplementedError("even kernel_size not supported")
    if C % 128 != 0:
        raise NotImplementedError("lane-aligned channel split requires (size // 2) % 128 == 0")
    if pad > HALO:
        # TODO(synk): kernel_size > 17 needs a wider (multiple-of-8) halo block.
        raise NotImplementedError(f"kernel_size > {2 * HALO + 1} needs a wider halo")
    if T % HALO != 0:
        raise NotImplementedError("T must be a multiple of 8")
    if gate_add is not None and tuple(gate_add.shape) != (N, T, C):
        raise ValueError("gate_add must have shape (N, T, D // 2)")

    act_bytes = jnp.dtype(x.dtype).itemsize
    n_stream = 3 + (1 if gate_add is not None else 0)      # x_r, x_g, out (, gate_add)
    phys_vmem = _physical_vmem_bytes()
    vmem_budget = int(0.70 * phys_vmem)                    # ~45 MiB on v7x, ~90 MiB on v5e/v6e

    if tile_t is None:
        # Largest multiple of 8 dividing T (<= MAX_TILE_T) whose footprint fits the budget.
        tile_t = HALO
        for cand in range(HALO, min(T, MAX_TILE_T) + 1, HALO):
            if T % cand == 0 and _vmem_estimate(cand, C, K, act_bytes, n_stream) <= vmem_budget:
                tile_t = cand
    if T % tile_t != 0 or tile_t % HALO != 0:
        raise ValueError("tile_t must be a multiple of 8 that divides T")
    if pad > 0 and tile_t < 2 * HALO:
        raise NotImplementedError("need a time tile of at least 16 rows for the halo fix-up")
    n_t = T // tile_t
    r = tile_t // HALO                                     # 8-row halo blocks per tile

    # Fold the conv bias into the linear bias: (conv + b_c) @ W + b_l = conv @ W + (b_c @ W + b_l).
    lin_w_f32 = lin_w_t.astype(jnp.float32)
    lin_b_eff = (conv_b.reshape(1, C).astype(jnp.float32) @ lin_w_f32
                 + lin_b.reshape(1, C).astype(jnp.float32))
    lin_w_bf16 = lin_w_t.astype(jnp.bfloat16)
    gamma2 = gamma.reshape(1, C).astype(jnp.float32)
    beta2 = beta.reshape(1, C).astype(jnp.float32)
    conv_w = conv_w_kc.astype(jnp.float32)

    vmem_est = _vmem_estimate(tile_t, C, K, act_bytes, n_stream)
    vmem_limit = int(min(int(vmem_est * 1.25) + 4 * 1024 * 1024, phys_vmem))

    # Advisory cost estimate so XLA can schedule neighbouring ops / DMA around the call.
    flops = 2 * N * T * C * C + (10 + 2 * K) * N * T * C
    bytes_accessed = N * T * C * n_stream * act_bytes + C * C * 2 + (K + 3) * C * 4
    cost = pl.CostEstimate(flops=int(flops), transcendentals=int(N * T),
                           bytes_accessed=int(bytes_accessed))

    def build(single_buffer_weights):
        if single_buffer_weights and _supports_single_buffer():
            def wspec(shape):    # grid-invariant operands: no second pipeline buffer
                return pl.BlockSpec(shape, lambda n, t: (0,) * len(shape),
                                    pipeline_mode=pl.Buffered(1))
        else:
            def wspec(shape):
                return pl.BlockSpec(shape, lambda n, t: (0,) * len(shape))

        in_specs = [
            pl.BlockSpec((1, tile_t, C), lambda n, t: (n, t, 0)),    # x_r half of x
            pl.BlockSpec((1, tile_t, C), lambda n, t: (n, t, 1)),    # x_g half of x
            pl.BlockSpec((1, HALO, C),                               # prev-tile halo of x_g
                         lambda n, t: (n, jnp.maximum(t * r - 1, 0), 1)),
            pl.BlockSpec((1, HALO, C),                               # next-tile halo of x_g
                         lambda n, t: (n, jnp.minimum((t + 1) * r, T // HALO - 1), 1)),
            wspec((1, C)),                                           # LN gamma
            wspec((1, C)),                                           # LN beta
            wspec((K, C)),                                           # depthwise conv weight
            wspec((C, C)),                                           # linear weight^T (bf16)
            wspec((1, C)),                                           # folded (conv+linear) bias
        ]
        args = [x, x, x, x, gamma2, beta2, conv_w, lin_w_bf16, lin_b_eff]
        if gate_add is not None:
            in_specs.append(pl.BlockSpec((1, tile_t, C), lambda n, t: (n, t, 0)))
            args.append(gate_add)
        out_spec = pl.BlockSpec((1, tile_t, C), lambda n, t: (n, t, 0))

        grid_spec = pltpu.PrefetchScalarGridSpec(
            num_scalar_prefetch=0,
            grid=(N, n_t),
            in_specs=in_specs,
            out_specs=out_spec,
        )
        # TODO(synk): when T is short and N is large, also block the batch axis and flatten to
        # (b_blk*tile_t, C) for a larger MXU M; for N == 1 on v7x, shard the time axis explicitly.
        return pl.pallas_call(
            _csgu_kernel,
            out_shape=jax.ShapeDtypeStruct((N, T, C), x.dtype),
            grid_spec=grid_spec,
            compiler_params=pltpu.CompilerParams(
                dimension_semantics=("parallel", "parallel"),
                vmem_limit_bytes=vmem_limit),
            cost_estimate=cost,
            interpret=interpret,
        )(*args)

    try:
        return build(True)
    except Exception:
        # pipeline_mode=pl.Buffered(1) not supported by this jax/libtpu -> plain double buffering.
        return build(False)


def csgu_reference(x, params, gate_add=None):
    """Pure-JAX reference of the PyTorch forward (same precision choices as the kernel:
    f32 LN/conv, bf16 matmul operands with f32 accumulation, folded conv bias)."""
    gamma, beta, conv_w_kc, conv_b, lin_w_t, lin_b = params
    N, T, D = x.shape
    C = D // 2
    K = conv_w_kc.shape[0]
    pad = (K - 1) // 2
    xf = x.astype(jnp.float32)
    x_r, x_g = xf[..., :C], xf[..., C:]
    mean = jnp.mean(x_g, axis=-1, keepdims=True)
    var = jnp.mean(jnp.square(x_g - mean), axis=-1, keepdims=True)
    x_g = (x_g - mean) * jax.lax.rsqrt(var + LN_EPS) * gamma[0] + beta[0]
    xp = jnp.pad(x_g, ((0, 0), (pad, pad), (0, 0)))
    conv = sum(xp[:, k:k + T, :] * conv_w_kc[k][None, None, :] for k in range(K))
    lin_b_eff = conv_b @ lin_w_t + lin_b
    y = jnp.einsum("ntc,cd->ntd", conv.astype(jnp.bfloat16),
                   lin_w_t.astype(jnp.bfloat16),
                   preferred_element_type=jnp.float32) + lin_b_eff[0]
    if gate_add is not None:
        y = y + gate_add.astype(jnp.float32)
    return x_r * y


def make_params(key, size, kernel_size):
    """Deterministic synthetic parameters (shapes consistent with the torch module)."""
    C = size // 2
    k1, k2, k3, k4 = jax.random.split(key, 4)
    gamma = (jnp.ones((1, C), jnp.float32) + 0.1 * jax.random.normal(k1, (1, C))).astype(jnp.float32)
    beta = (0.1 * jax.random.normal(k2, (1, C))).astype(jnp.float32)
    # torch conv.weight has shape (C, 1, K); stored here as (K, C) with conv_w_kc[k, c] = w[c, 0, k]
    conv_w_kc = (0.3 * jax.random.normal(k3, (kernel_size, C))).astype(jnp.float32)
    conv_b = jnp.ones((1, C), jnp.float32)
    # torch linear.weight has shape (C, C); we pass W.T so the kernel computes x @ W^T + b
    lin_w = (0.1 * jax.random.normal(k4, (C, C))).astype(jnp.float32)
    lin_w_t = jnp.asarray(lin_w.T, jnp.float32)
    lin_b = jnp.ones((1, C), jnp.float32)
    return gamma, beta, conv_w_kc, conv_b, lin_w_t, lin_b


if __name__ == "__main__":
    # Module config: size=256 -> n_channels=128 (lane-aligned), kernel_size=3,
    # dropout_rate=0.0, use_linear_after_conv=True, gate_activation='identity'.
    N, T, SIZE, K = 2, 128, 256, 3
    key = jax.random.PRNGKey(0)
    kx, kg, kp = jax.random.split(key, 3)
    x = jax.random.normal(kx, (N, T, SIZE), dtype=jnp.float32)
    gate_add = 0.5 * jax.random.normal(kg, (N, T, SIZE // 2), dtype=jnp.float32)
    params = make_params(kp, SIZE, K)

    # 1) f32, no gate_add, default (VMEM-aware) tile -> single time tile, sequence-edge padding.
    out = jax.block_until_ready(csgu_forward(x, params))
    ref = csgu_reference(x, params)
    assert out.shape == (N, T, SIZE // 2)
    assert jnp.allclose(out, ref, atol=2e-3, rtol=2e-3), "mismatch vs reference (f32, no gate_add)"

    # 2) f32, with gate_add, explicit small tile so the grid has several time tiles:
    #    exercises the inter-tile halo fix-up path (correctness check, not a perf setting).
    out_g = jax.block_until_ready(csgu_forward(x, params, gate_add=gate_add, tile_t=32))
    ref_g = csgu_reference(x, params, gate_add=gate_add)
    assert jnp.allclose(out_g, ref_g, atol=2e-3, rtol=2e-3), "mismatch vs reference (f32, halo path)"

    # 3) bf16 activation streaming (halves HBM bytes on this memory-bound kernel), default tile.
    x_bf = x.astype(jnp.bfloat16)
    gate_bf = gate_add.astype(jnp.bfloat16)
    out_bf = jax.block_until_ready(csgu_forward(x_bf, params, gate_add=gate_bf))
    ref_bf = csgu_reference(x_bf, params, gate_add=gate_bf)
    assert out_bf.dtype == jnp.bfloat16
    assert jnp.allclose(out_bf.astype(jnp.float32), ref_bf, atol=1e-1, rtol=5e-2), \
        "mismatch vs reference (bf16 streaming)"

    print("KERNEL_OK")
</pallas_src>

<mosaic_0001>
module attributes {stable_mosaic.version = 11 : i64} {
  func.func @_csgu_kernel(%arg0: i32, %arg1: i32, %arg2: memref<1x128x128xf32, #tpu.memory_space<vmem>>, %arg3: memref<1x128x128xf32, #tpu.memory_space<vmem>>, %arg4: memref<1x8x128xf32, #tpu.memory_space<vmem>>, %arg5: memref<1x8x128xf32, #tpu.memory_space<vmem>>, %arg6: memref<1x128xf32, #tpu.memory_space<vmem>>, %arg7: memref<1x128xf32, #tpu.memory_space<vmem>>, %arg8: memref<3x128xf32, #tpu.memory_space<vmem>>, %arg9: memref<128x128xbf16, #tpu.memory_space<vmem>>, %arg10: memref<1x128xf32, #tpu.memory_space<vmem>>, %arg11: memref<1x128x128xf32, #tpu.memory_space<vmem>>) attributes {dimension_semantics = [#tpu.dimension_semantics<parallel>, #tpu.dimension_semantics<parallel>], iteration_bounds = array<i64: 2, 1>, scalar_prefetch = 0 : i64, scratch_operands = 0 : i64, tpu.core_type = #tpu.core_type<tc>, window_params = [{transform_indices = @transform_0, window_bounds = array<i64: 1, 128, 128>}, {transform_indices = @transform_1, window_bounds = array<i64: 1, 128, 128>}, {transform_indices = @transform_2, window_bounds = array<i64: 1, 8, 128>}, {transform_indices = @transform_3, window_bounds = array<i64: 1, 8, 128>}, {pipeline_mode = #tpu.pipeline_mode<synchronous>, transform_indices = @transform_4, window_bounds = array<i64: 1, 128>}, {pipeline_mode = #tpu.pipeline_mode<synchronous>, transform_indices = @transform_5, window_bounds = array<i64: 1, 128>}, {pipeline_mode = #tpu.pipeline_mode<synchronous>, transform_indices = @transform_6, window_bounds = array<i64: 3, 128>}, {pipeline_mode = #tpu.pipeline_mode<synchronous>, transform_indices = @transform_7, window_bounds = array<i64: 128, 128>}, {pipeline_mode = #tpu.pipeline_mode<synchronous>, transform_indices = @transform_8, window_bounds = array<i64: 1, 128>}, {transform_indices = @transform_9, window_bounds = array<i64: 1, 128, 128>}]} {
    %c0 = arith.constant 0 : index
    %c0_0 = arith.constant 0 : index
    %0 = vector.load %arg6[%c0, %c0_0] : memref<1x128xf32, #tpu.memory_space<vmem>>, vector<1x128xf32>
    %c0_1 = arith.constant 0 : index
    %c0_2 = arith.constant 0 : index
    %1 = vector.load %arg7[%c0_1, %c0_2] : memref<1x128xf32, #tpu.memory_space<vmem>>, vector<1x128xf32>
    %c0_3 = arith.constant 0 : index
    %c0_4 = arith.constant 0 : index
    %2 = vector.load %arg8[%c0_3, %c0_4] : memref<3x128xf32, #tpu.memory_space<vmem>>, vector<3x128xf32>
    %c0_5 = arith.constant 0 : index
    %c0_6 = arith.constant 0 : index
    %3 = vector.load %arg9[%c0_5, %c0_6] : memref<128x128xbf16, #tpu.memory_space<vmem>>, vector<128x128xbf16>
    %c0_7 = arith.constant 0 : index
    %c0_8 = arith.constant 0 : index
    %4 = vector.load %arg10[%c0_7, %c0_8] : memref<1x128xf32, #tpu.memory_space<vmem>>, vector<1x128xf32>
    %c0_9 = arith.constant 0 : index
    %c0_10 = arith.constant 0 : index
    %c0_11 = arith.constant 0 : index
    %5 = vector.load %arg3[%c0_9, %c0_10, %c0_11] : memref<1x128x128xf32, #tpu.memory_space<vmem>>, vector<1x128x128xf32>
    %6 = vector.shape_cast %5 : vector<1x128x128xf32> to vector<128x128xf32>
    %cst = arith.constant dense<0.000000e+00> : vector<128xf32>
    %7 = vector.multi_reduction <add>, %6, %cst [1] : vector<128x128xf32> to vector<128xf32>
    %8 = vector.shape_cast %7 : vector<128xf32> to vector<128x1xf32>
    %cst_12 = arith.constant 1.280000e+02 : f32
    %9 = vector.broadcast %cst_12 : f32 to vector<128x1xf32>
    %10 = arith.divf %8, %9 : vector<128x1xf32>
    %11 = arith.mulf %6, %6 : vector<128x128xf32>
    %cst_13 = arith.constant dense<0.000000e+00> : vector<128xf32>
    %12 = vector.multi_reduction <add>, %11, %cst_13 [1] : vector<128x128xf32> to vector<128xf32>
    %13 = vector.shape_cast %12 : vector<128xf32> to vector<128x1xf32>
    %cst_14 = arith.constant 1.280000e+02 : f32
    %14 = vector.broadcast %cst_14 : f32 to vector<128x1xf32>
    %15 = arith.divf %13, %14 : vector<128x1xf32>
    %16 = arith.mulf %10, %10 : vector<128x1xf32>
    %17 = arith.subf %15, %16 : vector<128x1xf32>
    %cst_15 = arith.constant 0.000000e+00 : f32
    %18 = vector.broadcast %cst_15 : f32 to vector<128x1xf32>
    %19 = arith.maximumf %17, %18 : vector<128x1xf32>
    %20 = vector.broadcast %10 : vector<128x1xf32> to vector<128x128xf32>
    %21 = arith.subf %6, %20 : vector<128x128xf32>
    %cst_16 = arith.constant 9.99999996E-13 : f32
    %22 = vector.broadcast %cst_16 : f32 to vector<128x1xf32>
    %23 = arith.addf %19, %22 : vector<128x1xf32>
    %24 = math.rsqrt %23 : vector<128x1xf32>
    %25 = vector.broadcast %24 : vector<128x1xf32> to vector<128x128xf32>
    %26 = arith.mulf %21, %25 : vector<128x128xf32>
    %27 = vector.broadcast %0 : vector<1x128xf32> to vector<128x128xf32>
    %28 = arith.mulf %26, %27 : vector<128x128xf32>
    %29 = vector.broadcast %1 : vector<1x128xf32> to vector<128x128xf32>
    %30 = arith.addf %28, %29 : vector<128x128xf32>
    %c1_i32 = arith.constant 1 : i32
    %31 = tpu.dynamic_rotate %30 by %c1_i32 dim 0 : vector<128x128xf32>, i32 -> vector<128x128xf32>
    %32 = vector.extract_strided_slice %2 {offsets = [0, 0], sizes = [1, 128], strides = [1, 1]} : vector<3x128xf32> to vector<1x128xf32>
    %33 = vector.broadcast %32 : vector<1x128xf32> to vector<128x128xf32>
    %34 = arith.mulf %31, %33 : vector<128x128xf32>
    %35 = vector.extract_strided_slice %2 {offsets = [1, 0], sizes = [1, 128], strides = [1, 1]} : vector<3x128xf32> to vector<1x128xf32>
    %36 = vector.broadcast %35 : vector<1x128xf32> to vector<128x128xf32>
    %37 = arith.mulf %30, %36 : vector<128x128xf32>
    %38 = arith.addf %34, %37 : vector<128x128xf32>
    %c127_i32 = arith.constant 127 : i32
    %39 = tpu.dynamic_rotate %30 by %c127_i32 dim 0 : vector<128x128xf32>, i32 -> vector<128x128xf32>
    %40 = vector.extract_strided_slice %2 {offsets = [2, 0], sizes = [1, 128], strides = [1, 1]} : vector<3x128xf32> to vector<1x128xf32>
    %41 = vector.broadcast %40 : vector<1x128xf32> to vector<128x128xf32>
    %42 = arith.mulf %39, %41 : vector<128x128xf32>
    %43 = arith.addf %38, %42 : vector<128x128xf32>
    %44 = arith.truncf %43 : vector<128x128xf32> to vector<128x128xbf16>
    %cst_17 = arith.constant dense<0.000000e+00> : vector<128x128xf32>
    %45 = tpu.matmul %44, %3, %cst_17 {dimension_numbers = #tpu.dot_dimension_numbers<[1], [0], [0], [1], [0, 0, 1, 1], [], []>} : vector<128x128xbf16>, vector<128x128xbf16>, vector<128x128xf32> -> vector<128x128xf32>
    %46 = vector.broadcast %4 : vector<1x128xf32> to vector<128x128xf32>
    %47 = arith.addf %45, %46 : vector<128x128xf32>
    %c0_18 = arith.constant 0 : index
    %c0_19 = arith.constant 0 : index
    %c0_20 = arith.constant 0 : index
    %48 = vector.load %arg2[%c0_18, %c0_19, %c0_20] : memref<1x128x128xf32, #tpu.memory_space<vmem>>, vector<1x128x128xf32>
    %49 = vector.shape_cast %48 : vector<1x128x128xf32> to vector<128x128xf32>
    %50 = arith.mulf %49, %47 : vector<128x128xf32>
    %c0_21 = arith.constant 0 : index
    %c0_22 = arith.constant 0 : index
    %c0_23 = arith.constant 0 : index
    %51 = vector.load %arg11[%c0_21, %c0_22, %c0_23] : memref<1x128x128xf32, #tpu.memory_space<vmem>>, vector<1x128x128xf32>
    %52 = vector.shape_cast %51 : vector<1x128x128xf32> to vector<128x128xf32>
    %53 = vector.shape_cast %50 : vector<128x128xf32> to vector<1x128x128xf32>
    tpu.vector_store %arg11[%c0_21, %c0_22, %c0_23], %53 {strides = array<i32>} : memref<1x128x128xf32, #tpu.memory_space<vmem>>, vector<1x128x128xf32>,
    %c0_i32 = arith.constant 0 : i32
    %54 = arith.cmpi eq, %arg1, %c0_i32 : i32
    %c0_24 = arith.constant 0 : index
    %c0_25 = arith.constant 0 : index
    %c0_26 = arith.constant 0 : index
    %55 = vector.load %arg4[%c0_24, %c0_25, %c0_26] : memref<1x8x128xf32, #tpu.memory_space<vmem>>, vector<1x8x128xf32>
    %56 = vector.shape_cast %55 : vector<1x8x128xf32> to vector<8x128xf32>
    %cst_27 = arith.constant dense<0.000000e+00> : vector<8xf32>
    %57 = vector.multi_reduction <add>, %56, %cst_27 [1] : vector<8x128xf32> to vector<8xf32>
    %58 = vector.shape_cast %57 : vector<8xf32> to vector<8x1xf32>
    %cst_28 = arith.constant 1.280000e+02 : f32
    %59 = vector.broadcast %cst_28 : f32 to vector<8x1xf32>
    %60 = arith.divf %58, %59 : vector<8x1xf32>
    %61 = arith.mulf %56, %56 : vector<8x128xf32>
    %cst_29 = arith.constant dense<0.000000e+00> : vector<8xf32>
    %62 = vector.multi_reduction <add>, %61, %cst_29 [1] : vector<8x128xf32> to vector<8xf32>
    %63 = vector.shape_cast %62 : vector<8xf32> to vector<8x1xf32>
    %cst_30 = arith.constant 1.280000e+02 : f32
    %64 = vector.broadcast %cst_30 : f32 to vector<8x1xf32>
    %65 = arith.divf %63, %64 : vector<8x1xf32>
    %66 = arith.mulf %60, %60 : vector<8x1xf32>
    %67 = arith.subf %65, %66 : vector<8x1xf32>
    %cst_31 = arith.constant 0.000000e+00 : f32
    %68 = vector.broadcast %cst_31 : f32 to vector<8x1xf32>
    %69 = arith.maximumf %67, %68 : vector<8x1xf32>
    %70 = vector.broadcast %60 : vector<8x1xf32> to vector<8x128xf32>
    %71 = arith.subf %56, %70 : vector<8x128xf32>
    %cst_32 = arith.constant 9.99999996E-13 : f32
    %72 = vector.broadcast %cst_32 : f32 to vector<8x1xf32>
    %73 = arith.addf %69, %72 : vector<8x1xf32>
    %74 = math.rsqrt %73 : vector<8x1xf32>
    %75 = vector.broadcast %74 : vector<8x1xf32> to vector<8x128xf32>
    %76 = arith.mulf %71, %75 : vector<8x128xf32>
    %77 = vector.broadcast %0 : vector<1x128xf32> to vector<8x128xf32>
    %78 = arith.mulf %76, %77 : vector<8x128xf32>
    %79 = vector.broadcast %1 : vector<1x128xf32> to vector<8x128xf32>
    %80 = arith.addf %78, %79 : vector<8x128xf32>
    %cst_33 = arith.constant 0.000000e+00 : f32
    %81 = vector.broadcast %cst_33 : f32 to vector<8x128xf32>
    %82 = arith.select %54, %81, %80 : vector<8x128xf32>
    %c0_i32_34 = arith.constant 0 : i32
    %83 = arith.cmpi eq, %arg1, %c0_i32_34 : i32
    %c0_35 = arith.constant 0 : index
    %c0_36 = arith.constant 0 : index
    %c0_37 = arith.constant 0 : index
    %84 = vector.load %arg5[%c0_35, %c0_36, %c0_37] : memref<1x8x128xf32, #tpu.memory_space<vmem>>, vector<1x8x128xf32>
    %85 = vector.shape_cast %84 : vector<1x8x128xf32> to vector<8x128xf32>
    %cst_38 = arith.constant dense<0.000000e+00> : vector<8xf32>
    %86 = vector.multi_reduction <add>, %85, %cst_38 [1] : vector<8x128xf32> to vector<8xf32>
    %87 = vector.shape_cast %86 : vector<8xf32> to vector<8x1xf32>
    %cst_39 = arith.constant 1.280000e+02 : f32
    %88 = vector.broadcast %cst_39 : f32 to vector<8x1xf32>
    %89 = arith.divf %87, %88 : vector<8x1xf32>
    %90 = arith.mulf %85, %85 : vector<8x128xf32>
    %cst_40 = arith.constant dense<0.000000e+00> : vector<8xf32>
    %91 = vector.multi_reduction <add>, %90, %cst_40 [1] : vector<8x128xf32> to vector<8xf32>
    %92 = vector.shape_cast %91 : vector<8xf32> to vector<8x1xf32>
    %cst_41 = arith.constant 1.280000e+02 : f32
    %93 = vector.broadcast %cst_41 : f32 to vector<8x1xf32>
    %94 = arith.divf %92, %93 : vector<8x1xf32>
    %95 = arith.mulf %89, %89 : vector<8x1xf32>
    %96 = arith.subf %94, %95 : vector<8x1xf32>
    %cst_42 = arith.constant 0.000000e+00 : f32
    %97 = vector.broadcast %cst_42 : f32 to vector<8x1xf32>
    %98 = arith.maximumf %96, %97 : vector<8x1xf32>
    %99 = vector.broadcast %89 : vector<8x1xf32> to vector<8x128xf32>
    %100 = arith.subf %85, %99 : vector<8x128xf32>
    %cst_43 = arith.constant 9.99999996E-13 : f32
    %101 = vector.broadcast %cst_43 : f32 to vector<8x1xf32>
    %102 = arith.addf %98, %101 : vector<8x1xf32>
    %103 = math.rsqrt %102 : vector<8x1xf32>
    %104 = vector.broadcast %103 : vector<8x1xf32> to vector<8x128xf32>
    %105 = arith.mulf %100, %104 : vector<8x128xf32>
    %106 = vector.broadcast %0 : vector<1x128xf32> to vector<8x128xf32>
    %107 = arith.mulf %105, %106 : vector<8x128xf32>
    %108 = vector.broadcast %1 : vector<1x128xf32> to vector<8x128xf32>
    %109 = arith.addf %107, %108 : vector<8x128xf32>
    %cst_44 = arith.constant 0.000000e+00 : f32
    %110 = vector.broadcast %cst_44 : f32 to vector<8x128xf32>
    %111 = arith.select %83, %110, %109 : vector<8x128xf32>
    %112 = vector.extract_strided_slice %30 {offsets = [0, 0], sizes = [16, 128], strides = [1, 1]} : vector<128x128xf32> to vector<16x128xf32>
    %113 = tpu.concatenate %82, %112 in 0 : vector<8x128xf32>, vector<16x128xf32> -> vector<24x128xf32>
    %c1_i32_45 = arith.constant 1 : i32
    %114 = tpu.dynamic_rotate %113 by %c1_i32_45 dim 0 : vector<24x128xf32>, i32 -> vector<24x128xf32>
    %115 = vector.extract_strided_slice %2 {offsets = [0, 0], sizes = [1, 128], strides = [1, 1]} : vector<3x128xf32> to vector<1x128xf32>
    %116 = vector.broadcast %115 : vector<1x128xf32> to vector<24x128xf32>
    %117 = arith.mulf %114, %116 : vector<24x128xf32>
    %118 = vector.extract_strided_slice %2 {offsets = [1, 0], sizes = [1, 128], strides = [1, 1]} : vector<3x128xf32> to vector<1x128xf32>
    %119 = vector.broadcast %118 : vector<1x128xf32> to vector<24x128xf32>
    %120 = arith.mulf %113, %119 : vector<24x128xf32>
    %121 = arith.addf %117, %120 : vector<24x128xf32>
    %c23_i32 = arith.constant 23 : i32
    %122 = tpu.dynamic_rotate %113 by %c23_i32 dim 0 : vector<24x128xf32>, i32 -> vector<24x128xf32>
    %123 = vector.extract_strided_slice %2 {offsets = [2, 0], sizes = [1, 128], strides = [1, 1]} : vector<3x128xf32> to vector<1x128xf32>
    %124 = vector.broadcast %123 : vector<1x128xf32> to vector<24x128xf32>
    %125 = arith.mulf %122, %124 : vector<24x128xf32>
    %126 = arith.addf %121, %125 : vector<24x128xf32>
    %127 = vector.extract_strided_slice %126 {offsets = [8, 0], sizes = [8, 128], strides = [1, 1]} : vector<24x128xf32> to vector<8x128xf32>
    %128 = arith.truncf %127 : vector<8x128xf32> to vector<8x128xbf16>
    %cst_46 = arith.constant dense<0.000000e+00> : vector<8x128xf32>
    %129 = tpu.matmul %128, %3, %cst_46 {dimension_numbers = #tpu.dot_dimension_numbers<[1], [0], [0], [1], [0, 0, 1, 1], [], []>} : vector<8x128xbf16>, vector<128x128xbf16>, vector<8x128xf32> -> vector<8x128xf32>
    %130 = vector.broadcast %4 : vector<1x128xf32> to vector<8x128xf32>
    %131 = arith.addf %129, %130 : vector<8x128xf32>
    %c0_47 = arith.constant 0 : index
    %c0_48 = arith.constant 0 : index
    %c0_49 = arith.constant 0 : index
    %132 = vector.load %arg2[%c0_47, %c0_48, %c0_49] : memref<1x128x128xf32, #tpu.memory_space<vmem>>, vector<1x8x128xf32>
    %133 = vector.shape_cast %132 : vector<1x8x128xf32> to vector<8x128xf32>
    %134 = arith.mulf %133, %131 : vector<8x128xf32>
    %c0_50 = arith.constant 0 : index
    %c0_51 = arith.constant 0 : index
    %c0_52 = arith.constant 0 : index
    %135 = vector.load %arg11[%c0_50, %c0_51, %c0_52] : memref<1x128x128xf32, #tpu.memory_space<vmem>>, vector<1x8x128xf32>
    %136 = vector.shape_cast %135 : vector<1x8x128xf32> to vector<8x128xf32>
    %137 = vector.shape_cast %134 : vector<8x128xf32> to vector<1x8x128xf32>
    tpu.vector_store %arg11[%c0_50, %c0_51, %c0_52], %137 {strides = array<i32>} : memref<1x128x128xf32, #tpu.memory_space<vmem>>, vector<1x8x128xf32>,
    %138 = vector.extract_strided_slice %30 {offsets = [112, 0], sizes = [16, 128], strides = [1, 1]} : vector<128x128xf32> to vector<16x128xf32>
    %139 = tpu.concatenate %138, %111 in 0 : vector<16x128xf32>, vector<8x128xf32> -> vector<24x128xf32>
    %c1_i32_53 = arith.constant 1 : i32
    %140 = tpu.dynamic_rotate %139 by %c1_i32_53 dim 0 : vector<24x128xf32>, i32 -> vector<24x128xf32>
    %141 = vector.extract_strided_slice %2 {offsets = [0, 0], sizes = [1, 128], strides = [1, 1]} : vector<3x128xf32> to vector<1x128xf32>
    %142 = vector.broadcast %141 : vector<1x128xf32> to vector<24x128xf32>
    %143 = arith.mulf %140, %142 : vector<24x128xf32>
    %144 = vector.extract_strided_slice %2 {offsets = [1, 0], sizes = [1, 128], strides = [1, 1]} : vector<3x128xf32> to vector<1x128xf32>
    %145 = vector.broadcast %144 : vector<1x128xf32> to vector<24x128xf32>
    %146 = arith.mulf %139, %145 : vector<24x128xf32>
    %147 = arith.addf %143, %146 : vector<24x128xf32>
    %c23_i32_54 = arith.constant 23 : i32
    %148 = tpu.dynamic_rotate %139 by %c23_i32_54 dim 0 : vector<24x128xf32>, i32 -> vector<24x128xf32>
    %149 = vector.extract_strided_slice %2 {offsets = [2, 0], sizes = [1, 128], strides = [1, 1]} : vector<3x128xf32> to vector<1x128xf32>
    %150 = vector.broadcast %149 : vector<1x128xf32> to vector<24x128xf32>
    %151 = arith.mulf %148, %150 : vector<24x128xf32>
    %152 = arith.addf %147, %151 : vector<24x128xf32>
    %153 = vector.extract_strided_slice %152 {offsets = [8, 0], sizes = [8, 128], strides = [1, 1]} : vector<24x128xf32> to vector<8x128xf32>
    %154 = arith.truncf %153 : vector<8x128xf32> to vector<8x128xbf16>
    %cst_55 = arith.constant dense<0.000000e+00> : vector<8x128xf32>
    %155 = tpu.matmul %154, %3, %cst_55 {dimension_numbers = #tpu.dot_dimension_numbers<[1], [0], [0], [1], [0, 0, 1, 1], [], []>} : vector<8x128xbf16>, vector<128x128xbf16>, vector<8x128xf32> -> vector<8x128xf32>
    %156 = vector.broadcast %4 : vector<1x128xf32> to vector<8x128xf32>
    %157 = arith.addf %155, %156 : vector<8x128xf32>
    %c0_56 = arith.constant 0 : index
    %c120 = arith.constant 120 : index
    %c0_57 = arith.constant 0 : index
    %158 = vector.load %arg2[%c0_56, %c120, %c0_57] : memref<1x128x128xf32, #tpu.memory_space<vmem>>, vector<1x8x128xf32>
    %159 = vector.shape_cast %158 : vector<1x8x128xf32> to vector<8x128xf32>
    %160 = arith.mulf %159, %157 : vector<8x128xf32>
    %c0_58 = arith.constant 0 : index
    %c120_59 = arith.constant 120 : index
    %c0_60 = arith.constant 0 : index
    %161 = vector.load %arg11[%c0_58, %c120_59, %c0_60] : memref<1x128x128xf32, #tpu.memory_space<vmem>>, vector<1x8x128xf32>
    %162 = vector.shape_cast %161 : vector<1x8x128xf32> to vector<8x128xf32>
    %163 = vector.shape_cast %160 : vector<8x128xf32> to vector<1x8x128xf32>
    tpu.vector_store %arg11[%c0_58, %c120_59, %c0_60], %163 {strides = array<i32>} : memref<1x128x128xf32, #tpu.memory_space<vmem>>, vector<1x8x128xf32>,
    return
  }
  func.func @transform_0(%arg0: i32, %arg1: i32) -> (i32, i32, i32) {
    %c0_i32 = arith.constant 0 : i32
    %c0_i32_0 = arith.constant 0 : i32
    return %arg0, %arg1, %c0_i32 : i32, i32, i32
  }
  func.func @transform_1(%arg0: i32, %arg1: i32) -> (i32, i32, i32) {
    %c1_i32 = arith.constant 1 : i32
    %c0_i32 = arith.constant 0 : i32
    return %arg0, %arg1, %c1_i32 : i32, i32, i32
  }
  func.func @transform_2(%arg0: i32, %arg1: i32) -> (i32, i32, i32) {
    %c16_i32 = arith.constant 16 : i32
    %0 = arith.muli %arg1, %c16_i32 : i32
    %c1_i32 = arith.constant 1 : i32
    %1 = arith.subi %0, %c1_i32 : i32
    %c0_i32 = arith.constant 0 : i32
    %2 = arith.maxsi %1, %c0_i32 : i32
    %c1_i32_0 = arith.constant 1 : i32
    %c0_i32_1 = arith.constant 0 : i32
    return %arg0, %2, %c1_i32_0 : i32, i32, i32
  }
  func.func @transform_3(%arg0: i32, %arg1: i32) -> (i32, i32, i32) {
    %c1_i32 = arith.constant 1 : i32
    %0 = arith.addi %arg1, %c1_i32 : i32
    %c16_i32 = arith.constant 16 : i32
    %1 = arith.muli %0, %c16_i32 : i32
    %c15_i32 = arith.constant 15 : i32
    %2 = arith.minsi %1, %c15_i32 : i32
    %c1_i32_0 = arith.constant 1 : i32
    %c0_i32 = arith.constant 0 : i32
    return %arg0, %2, %c1_i32_0 : i32, i32, i32
  }
  func.func @transform_4(%arg0: i32, %arg1: i32) -> (i32, i32) {
    %c0_i32 = arith.constant 0 : i32
    %c0_i32_0 = arith.constant 0 : i32
    %c0_i32_1 = arith.constant 0 : i32
    return %c0_i32, %c0_i32_0 : i32, i32
  }
  func.func @transform_5(%arg0: i32, %arg1: i32) -> (i32, i32) {
    %c0_i32 = arith.constant 0 : i32
    %c0_i32_0 = arith.constant 0 : i32
    %c0_i32_1 = arith.constant 0 : i32
    return %c0_i32, %c0_i32_0 : i32, i32
  }
  func.func @transform_6(%arg0: i32, %arg1: i32) -> (i32, i32) {
    %c0_i32 = arith.constant 0 : i32
    %c0_i32_0 = arith.constant 0 : i32
    %c0_i32_1 = arith.constant 0 : i32
    return %c0_i32, %c0_i32_0 : i32, i32
  }
  func.func @transform_7(%arg0: i32, %arg1: i32) -> (i32, i32) {
    %c0_i32 = arith.constant 0 : i32
    %c0_i32_0 = arith.constant 0 : i32
    %c0_i32_1 = arith.constant 0 : i32
    return %c0_i32, %c0_i32_0 : i32, i32
  }
  func.func @transform_8(%arg0: i32, %arg1: i32) -> (i32, i32) {
    %c0_i32 = arith.constant 0 : i32
    %c0_i32_0 = arith.constant 0 : i32
    %c0_i32_1 = arith.constant 0 : i32
    return %c0_i32, %c0_i32_0 : i32, i32
  }
  func.func @transform_9(%arg0: i32, %arg1: i32) -> (i32, i32, i32) {
    %c0_i32 = arith.constant 0 : i32
    %c0_i32_0 = arith.constant 0 : i32
    return %arg0, %arg1, %c0_i32 : i32, i32, i32
  }
}

module attributes {stable_mosaic.version = 11 : i64} {
  func.func @_csgu_kernel(%arg0: i32, %arg1: i32, %arg2: memref<1x128x128xf32, #tpu.memory_space<vmem>>, %arg3: memref<1x128x128xf32, #tpu.memory_space<vmem>>, %arg4: memref<1x8x128xf32, #tpu.memory_space<vmem>>, %arg5: memref<1x8x128xf32, #tpu.memory_space<vmem>>, %arg6: memref<1x128xf32, #tpu.memory_space<vmem>>, %arg7: memref<1x128xf32, #tpu.memory_space<vmem>>, %arg8: memref<3x128xf32, #tpu.memory_space<vmem>>, %arg9: memref<128x128xbf16, #tpu.memory_space<vmem>>, %arg10: memref<1x128xf32, #tpu.memory_space<vmem>>, %arg11: memref<1x128x128xf32, #tpu.memory_space<vmem>>) attributes {dimension_semantics = [#tpu.dimension_semantics<parallel>, #tpu.dimension_semantics<parallel>], iteration_bounds = array<i64: 2, 1>, scalar_prefetch = 0 : i64, scratch_operands = 0 : i64, tpu.core_type = #tpu.core_type<tc>, window_params = [{transform_indices = @transform_0, window_bounds = array<i64: 1, 128, 128>}, {transform_indices = @transform_1, window_bounds = array<i64: 1, 128, 128>}, {transform_indices = @transform_2, window_bounds = array<i64: 1, 8, 128>}, {transform_indices = @transform_3, window_bounds = array<i64: 1, 8, 128>}, {pipeline_mode = #tpu.pipeline_mode<synchronous>, transform_indices = @transform_4, window_bounds = array<i64: 1, 128>}, {pipeline_mode = #tpu.pipeline_mode<synchronous>, transform_indices = @transform_5, window_bounds = array<i64: 1, 128>}, {pipeline_mode = #tpu.pipeline_mode<synchronous>, transform_indices = @transform_6, window_bounds = array<i64: 3, 128>}, {pipeline_mode = #tpu.pipeline_mode<synchronous>, transform_indices = @transform_7, window_bounds = array<i64: 128, 128>}, {pipeline_mode = #tpu.pipeline_mode<synchronous>, transform_indices = @transform_8, window_bounds = array<i64: 1, 128>}, {transform_indices = @transform_9, window_bounds = array<i64: 1, 128, 128>}]} {
    %c0 = arith.constant 0 : index
    %c0_0 = arith.constant 0 : index
    %0 = vector.load %arg6[%c0, %c0_0] : memref<1x128xf32, #tpu.memory_space<vmem>>, vector<1x128xf32>
    %c0_1 = arith.constant 0 : index
    %c0_2 = arith.constant 0 : index
    %1 = vector.load %arg7[%c0_1, %c0_2] : memref<1x128xf32, #tpu.memory_space<vmem>>, vector<1x128xf32>
    %c0_3 = arith.constant 0 : index
    %c0_4 = arith.constant 0 : index
    %2 = vector.load %arg8[%c0_3, %c0_4] : memref<3x128xf32, #tpu.memory_space<vmem>>, vector<3x128xf32>
    %c0_5 = arith.constant 0 : index
    %c0_6 = arith.constant 0 : index
    %3 = vector.load %arg9[%c0_5, %c0_6] : memref<128x128xbf16, #tpu.memory_space<vmem>>, vector<128x128xbf16>
    %c0_7 = arith.constant 0 : index
    %c0_8 = arith.constant 0 : index
    %4 = vector.load %arg10[%c0_7, %c0_8] : memref<1x128xf32, #tpu.memory_space<vmem>>, vector<1x128xf32>
    %c0_9 = arith.constant 0 : index
    %c0_10 = arith.constant 0 : index
    %c0_11 = arith.constant 0 : index
    %5 = vector.load %arg3[%c0_9, %c0_10, %c0_11] : memref<1x128x128xf32, #tpu.memory_space<vmem>>, vector<1x128x128xf32>
    %6 = vector.shape_cast %5 : vector<1x128x128xf32> to vector<128x128xf32>
    %cst = arith.constant dense<0.000000e+00> : vector<128xf32>
    %7 = vector.multi_reduction <add>, %6, %cst [1] : vector<128x128xf32> to vector<128xf32>
    %8 = vector.shape_cast %7 : vector<128xf32> to vector<128x1xf32>
    %cst_12 = arith.constant 1.280000e+02 : f32
    %9 = vector.broadcast %cst_12 : f32 to vector<128x1xf32>
    %10 = arith.divf %8, %9 : vector<128x1xf32>
    %11 = arith.mulf %6, %6 : vector<128x128xf32>
    %cst_13 = arith.constant dense<0.000000e+00> : vector<128xf32>
    %12 = vector.multi_reduction <add>, %11, %cst_13 [1] : vector<128x128xf32> to vector<128xf32>
    %13 = vector.shape_cast %12 : vector<128xf32> to vector<128x1xf32>
    %cst_14 = arith.constant 1.280000e+02 : f32
    %14 = vector.broadcast %cst_14 : f32 to vector<128x1xf32>
    %15 = arith.divf %13, %14 : vector<128x1xf32>
    %16 = arith.mulf %10, %10 : vector<128x1xf32>
    %17 = arith.subf %15, %16 : vector<128x1xf32>
    %cst_15 = arith.constant 0.000000e+00 : f32
    %18 = vector.broadcast %cst_15 : f32 to vector<128x1xf32>
    %19 = arith.maximumf %17, %18 : vector<128x1xf32>
    %20 = vector.broadcast %10 : vector<128x1xf32> to vector<128x128xf32>
    %21 = arith.subf %6, %20 : vector<128x128xf32>
    %cst_16 = arith.constant 9.99999996E-13 : f32
    %22 = vector.broadcast %cst_16 : f32 to vector<128x1xf32>
    %23 = arith.addf %19, %22 : vector<128x1xf32>
    %24 = math.rsqrt %23 : vector<128x1xf32>
    %25 = vector.broadcast %24 : vector<128x1xf32> to vector<128x128xf32>
    %26 = arith.mulf %21, %25 : vector<128x128xf32>
    %27 = vector.broadcast %0 : vector<1x128xf32> to vector<128x128xf32>
    %28 = arith.mulf %26, %27 : vector<128x128xf32>
    %29 = vector.broadcast %1 : vector<1x128xf32> to vector<128x128xf32>
    %30 = arith.addf %28, %29 : vector<128x128xf32>
    %c1_i32 = arith.constant 1 : i32
    %31 = tpu.dynamic_rotate %30 by %c1_i32 dim 0 : vector<128x128xf32>, i32 -> vector<128x128xf32>
    %32 = vector.extract_strided_slice %2 {offsets = [0, 0], sizes = [1, 128], strides = [1, 1]} : vector<3x128xf32> to vector<1x128xf32>
    %33 = vector.broadcast %32 : vector<1x128xf32> to vector<128x128xf32>
    %34 = arith.mulf %31, %33 : vector<128x128xf32>
    %35 = vector.extract_strided_slice %2 {offsets = [1, 0], sizes = [1, 128], strides = [1, 1]} : vector<3x128xf32> to vector<1x128xf32>
    %36 = vector.broadcast %35 : vector<1x128xf32> to vector<128x128xf32>
    %37 = arith.mulf %30, %36 : vector<128x128xf32>
    %38 = arith.addf %34, %37 : vector<128x128xf32>
    %c127_i32 = arith.constant 127 : i32
    %39 = tpu.dynamic_rotate %30 by %c127_i32 dim 0 : vector<128x128xf32>, i32 -> vector<128x128xf32>
    %40 = vector.extract_strided_slice %2 {offsets = [2, 0], sizes = [1, 128], strides = [1, 1]} : vector<3x128xf32> to vector<1x128xf32>
    %41 = vector.broadcast %40 : vector<1x128xf32> to vector<128x128xf32>
    %42 = arith.mulf %39, %41 : vector<128x128xf32>
    %43 = arith.addf %38, %42 : vector<128x128xf32>
    %44 = arith.truncf %43 : vector<128x128xf32> to vector<128x128xbf16>
    %cst_17 = arith.constant dense<0.000000e+00> : vector<128x128xf32>
    %45 = tpu.matmul %44, %3, %cst_17 {dimension_numbers = #tpu.dot_dimension_numbers<[1], [0], [0], [1], [0, 0, 1, 1], [], []>} : vector<128x128xbf16>, vector<128x128xbf16>, vector<128x128xf32> -> vector<128x128xf32>
    %46 = vector.broadcast %4 : vector<1x128xf32> to vector<128x128xf32>
    %47 = arith.addf %45, %46 : vector<128x128xf32>
    %c0_18 = arith.constant 0 : index
    %c0_19 = arith.constant 0 : index
    %c0_20 = arith.constant 0 : index
    %48 = vector.load %arg2[%c0_18, %c0_19, %c0_20] : memref<1x128x128xf32, #tpu.memory_space<vmem>>, vector<1x128x128xf32>
    %49 = vector.shape_cast %48 : vector<1x128x128xf32> to vector<128x128xf32>
    %50 = arith.mulf %49, %47 : vector<128x128xf32>
    %c0_21 = arith.constant 0 : index
    %c0_22 = arith.constant 0 : index
    %c0_23 = arith.constant 0 : index
    %51 = vector.load %arg11[%c0_21, %c0_22, %c0_23] : memref<1x128x128xf32, #tpu.memory_space<vmem>>, vector<1x128x128xf32>
    %52 = vector.shape_cast %51 : vector<1x128x128xf32> to vector<128x128xf32>
    %53 = vector.shape_cast %50 : vector<128x128xf32> to vector<1x128x128xf32>
    tpu.vector_store %arg11[%c0_21, %c0_22, %c0_23], %53 {strides = array<i32>} : memref<1x128x128xf32, #tpu.memory_space<vmem>>, vector<1x128x128xf32>,
    %c0_i32 = arith.constant 0 : i32
    %54 = arith.cmpi eq, %arg1, %c0_i32 : i32
    %c0_24 = arith.constant 0 : index
    %c0_25 = arith.constant 0 : index
    %c0_26 = arith.constant 0 : index
    %55 = vector.load %arg4[%c0_24, %c0_25, %c0_26] : memref<1x8x128xf32, #tpu.memory_space<vmem>>, vector<1x8x128xf32>
    %56 = vector.shape_cast %55 : vector<1x8x128xf32> to vector<8x128xf32>
    %cst_27 = arith.constant dense<0.000000e+00> : vector<8xf32>
    %57 = vector.multi_reduction <add>, %56, %cst_27 [1] : vector<8x128xf32> to vector<8xf32>
    %58 = vector.shape_cast %57 : vector<8xf32> to vector<8x1xf32>
    %cst_28 = arith.constant 1.280000e+02 : f32
    %59 = vector.broadcast %cst_28 : f32 to vector<8x1xf32>
    %60 = arith.divf %58, %59 : vector<8x1xf32>
    %61 = arith.mulf %56, %56 : vector<8x128xf32>
    %cst_29 = arith.constant dense<0.000000e+00> : vector<8xf32>
    %62 = vector.multi_reduction <add>, %61, %cst_29 [1] : vector<8x128xf32> to vector<8xf32>
    %63 = vector.shape_cast %62 : vector<8xf32> to vector<8x1xf32>
    %cst_30 = arith.constant 1.280000e+02 : f32
    %64 = vector.broadcast %cst_30 : f32 to vector<8x1xf32>
    %65 = arith.divf %63, %64 : vector<8x1xf32>
    %66 = arith.mulf %60, %60 : vector<8x1xf32>
    %67 = arith.subf %65, %66 : vector<8x1xf32>
    %cst_31 = arith.constant 0.000000e+00 : f32
    %68 = vector.broadcast %cst_31 : f32 to vector<8x1xf32>
    %69 = arith.maximumf %67, %68 : vector<8x1xf32>
    %70 = vector.broadcast %60 : vector<8x1xf32> to vector<8x128xf32>
    %71 = arith.subf %56, %70 : vector<8x128xf32>
    %cst_32 = arith.constant 9.99999996E-13 : f32
    %72 = vector.broadcast %cst_32 : f32 to vector<8x1xf32>
    %73 = arith.addf %69, %72 : vector<8x1xf32>
    %74 = math.rsqrt %73 : vector<8x1xf32>
    %75 = vector.broadcast %74 : vector<8x1xf32> to vector<8x128xf32>
    %76 = arith.mulf %71, %75 : vector<8x128xf32>
    %77 = vector.broadcast %0 : vector<1x128xf32> to vector<8x128xf32>
    %78 = arith.mulf %76, %77 : vector<8x128xf32>
    %79 = vector.broadcast %1 : vector<1x128xf32> to vector<8x128xf32>
    %80 = arith.addf %78, %79 : vector<8x128xf32>
    %cst_33 = arith.constant 0.000000e+00 : f32
    %81 = vector.broadcast %cst_33 : f32 to vector<8x128xf32>
    %82 = arith.select %54, %81, %80 : vector<8x128xf32>
    %c0_i32_34 = arith.constant 0 : i32
    %83 = arith.cmpi eq, %arg1, %c0_i32_34 : i32
    %c0_35 = arith.constant 0 : index
    %c0_36 = arith.constant 0 : index
    %c0_37 = arith.constant 0 : index
    %84 = vector.load %arg5[%c0_35, %c0_36, %c0_37] : memref<1x8x128xf32, #tpu.memory_space<vmem>>, vector<1x8x128xf32>
    %85 = vector.shape_cast %84 : vector<1x8x128xf32> to vector<8x128xf32>
    %cst_38 = arith.constant dense<0.000000e+00> : vector<8xf32>
    %86 = vector.multi_reduction <add>, %85, %cst_38 [1] : vector<8x128xf32> to vector<8xf32>
    %87 = vector.shape_cast %86 : vector<8xf32> to vector<8x1xf32>
    %cst_39 = arith.constant 1.280000e+02 : f32
    %88 = vector.broadcast %cst_39 : f32 to vector<8x1xf32>
    %89 = arith.divf %87, %88 : vector<8x1xf32>
    %90 = arith.mulf %85, %85 : vector<8x128xf32>
    %cst_40 = arith.constant dense<0.000000e+00> : vector<8xf32>
    %91 = vector.multi_reduction <add>, %90, %cst_40 [1] : vector<8x128xf32> to vector<8xf32>
    %92 = vector.shape_cast %91 : vector<8xf32> to vector<8x1xf32>
    %cst_41 = arith.constant 1.280000e+02 : f32
    %93 = vector.broadcast %cst_41 : f32 to vector<8x1xf32>
    %94 = arith.divf %92, %93 : vector<8x1xf32>
    %95 = arith.mulf %89, %89 : vector<8x1xf32>
    %96 = arith.subf %94, %95 : vector<8x1xf32>
    %cst_42 = arith.constant 0.000000e+00 : f32
    %97 = vector.broadcast %cst_42 : f32 to vector<8x1xf32>
    %98 = arith.maximumf %96, %97 : vector<8x1xf32>
    %99 = vector.broadcast %89 : vector<8x1xf32> to vector<8x128xf32>
    %100 = arith.subf %85, %99 : vector<8x128xf32>
    %cst_43 = arith.constant 9.99999996E-13 : f32
    %101 = vector.broadcast %cst_43 : f32 to vector<8x1xf32>
    %102 = arith.addf %98, %101 : vector<8x1xf32>
    %103 = math.rsqrt %102 : vector<8x1xf32>
    %104 = vector.broadcast %103 : vector<8x1xf32> to vector<8x128xf32>
    %105 = arith.mulf %100, %104 : vector<8x128xf32>
    %106 = vector.broadcast %0 : vector<1x128xf32> to vector<8x128xf32>
    %107 = arith.mulf %105, %106 : vector<8x128xf32>
    %108 = vector.broadcast %1 : vector<1x128xf32> to vector<8x128xf32>
    %109 = arith.addf %107, %108 : vector<8x128xf32>
    %cst_44 = arith.constant 0.000000e+00 : f32
    %110 = vector.broadcast %cst_44 : f32 to vector<8x128xf32>
    %111 = arith.select %83, %110, %109 : vector<8x128xf32>
    %112 = vector.extract_strided_slice %30 {offsets = [0, 0], sizes = [16, 128], strides = [1, 1]} : vector<128x128xf32> to vector<16x128xf32>
    %113 = tpu.concatenate %82, %112 in 0 : vector<8x128xf32>, vector<16x128xf32> -> vector<24x128xf32>
    %c1_i32_45 = arith.constant 1 : i32
    %114 = tpu.dynamic_rotate %113 by %c1_i32_45 dim 0 : vector<24x128xf32>, i32 -> vector<24x128xf32>
    %115 = vector.extract_strided_slice %2 {offsets = [0, 0], sizes = [1, 128], strides = [1, 1]} : vector<3x128xf32> to vector<1x128xf32>
    %116 = vector.broadcast %115 : vector<1x128xf32> to vector<24x128xf32>
    %117 = arith.mulf %114, %116 : vector<24x128xf32>
    %118 = vector.extract_strided_slice %2 {offsets = [1, 0], sizes = [1, 128], strides = [1, 1]} : vector<3x128xf32> to vector<1x128xf32>
    %119 = vector.broadcast %118 : vector<1x128xf32> to vector<24x128xf32>
    %120 = arith.mulf %113, %119 : vector<24x128xf32>
    %121 = arith.addf %117, %120 : vector<24x128xf32>
    %c23_i32 = arith.constant 23 : i32
    %122 = tpu.dynamic_rotate %113 by %c23_i32 dim 0 : vector<24x128xf32>, i32 -> vector<24x128xf32>
    %123 = vector.extract_strided_slice %2 {offsets = [2, 0], sizes = [1, 128], strides = [1, 1]} : vector<3x128xf32> to vector<1x128xf32>
    %124 = vector.broadcast %123 : vector<1x128xf32> to vector<24x128xf32>
    %125 = arith.mulf %122, %124 : vector<24x128xf32>
    %126 = arith.addf %121, %125 : vector<24x128xf32>
    %127 = vector.extract_strided_slice %126 {offsets = [8, 0], sizes = [8, 128], strides = [1, 1]} : vector<24x128xf32> to vector<8x128xf32>
    %128 = arith.truncf %127 : vector<8x128xf32> to vector<8x128xbf16>
    %cst_46 = arith.constant dense<0.000000e+00> : vector<8x128xf32>
    %129 = tpu.matmul %128, %3, %cst_46 {dimension_numbers = #tpu.dot_dimension_numbers<[1], [0], [0], [1], [0, 0, 1, 1], [], []>} : vector<8x128xbf16>, vector<128x128xbf16>, vector<8x128xf32> -> vector<8x128xf32>
    %130 = vector.broadcast %4 : vector<1x128xf32> to vector<8x128xf32>
    %131 = arith.addf %129, %130 : vector<8x128xf32>
    %c0_47 = arith.constant 0 : index
    %c0_48 = arith.constant 0 : index
    %c0_49 = arith.constant 0 : index
    %132 = vector.load %arg2[%c0_47, %c0_48, %c0_49] : memref<1x128x128xf32, #tpu.memory_space<vmem>>, vector<1x8x128xf32>
    %133 = vector.shape_cast %132 : vector<1x8x128xf32> to vector<8x128xf32>
    %134 = arith.mulf %133, %131 : vector<8x128xf32>
    %c0_50 = arith.constant 0 : index
    %c0_51 = arith.constant 0 : index
    %c0_52 = arith.constant 0 : index
    %135 = vector.load %arg11[%c0_50, %c0_51, %c0_52] : memref<1x128x128xf32, #tpu.memory_space<vmem>>, vector<1x8x128xf32>
    %136 = vector.shape_cast %135 : vector<1x8x128xf32> to vector<8x128xf32>
    %137 = vector.shape_cast %134 : vector<8x128xf32> to vector<1x8x128xf32>
    tpu.vector_store %arg11[%c0_50, %c0_51, %c0_52], %137 {strides = array<i32>} : memref<1x128x128xf32, #tpu.memory_space<vmem>>, vector<1x8x128xf32>,
    %138 = vector.extract_strided_slice %30 {offsets = [112, 0], sizes = [16, 128], strides = [1, 1]} : vector<128x128xf32> to vector<16x128xf32>
    %139 = tpu.concatenate %138, %111 in 0 : vector<16x128xf32>, vector<8x128xf32> -> vector<24x128xf32>
    %c1_i32_53 = arith.constant 1 : i32
    %140 = tpu.dynamic_rotate %139 by %c1_i32_53 dim 0 : vector<24x128xf32>, i32 -> vector<24x128xf32>
    %141 = vector.extract_strided_slice %2 {offsets = [0, 0], sizes = [1, 128], strides = [1, 1]} : vector<3x128xf32> to vector<1x128xf32>
    %142 = vector.broadcast %141 : vector<1x128xf32> to vector<24x128xf32>
    %143 = arith.mulf %140, %142 : vector<24x128xf32>
    %144 = vector.extract_strided_slice %2 {offsets = [1, 0], sizes = [1, 128], strides = [1, 1]} : vector<3x128xf32> to vector<1x128xf32>
    %145 = vector.broadcast %144 : vector<1x128xf32> to vector<24x128xf32>
    %146 = arith.mulf %139, %145 : vector<24x128xf32>
    %147 = arith.addf %143, %146 : vector<24x128xf32>
    %c23_i32_54 = arith.constant 23 : i32
    %148 = tpu.dynamic_rotate %139 by %c23_i32_54 dim 0 : vector<24x128xf32>, i32 -> vector<24x128xf32>
    %149 = vector.extract_strided_slice %2 {offsets = [2, 0], sizes = [1, 128], strides = [1, 1]} : vector<3x128xf32> to vector<1x128xf32>
    %150 = vector.broadcast %149 : vector<1x128xf32> to vector<24x128xf32>
    %151 = arith.mulf %148, %150 : vector<24x128xf32>
    %152 = arith.addf %147, %151 : vector<24x128xf32>
    %153 = vector.extract_strided_slice %152 {offsets = [8, 0], sizes = [8, 128], strides = [1, 1]} : vector<24x128xf32> to vector<8x128xf32>
    %154 = arith.truncf %153 : vector<8x128xf32> to vector<8x128xbf16>
    %cst_55 = arith.constant dense<0.000000e+00> : vector<8x128xf32>
    %155 = tpu.matmul %154, %3, %cst_55 {dimension_numbers = #tpu.dot_dimension_numbers<[1], [0], [0], [1], [0, 0, 1, 1], [], []>} : vector<8x128xbf16>, vector<128x128xbf16>, vector<8x128xf32> -> vector<8x128xf32>
    %156 = vector.broadcast %4 : vector<1x128xf32> to vector<8x128xf32>
    %157 = arith.addf %155, %156 : vector<8x128xf32>
    %c0_56 = arith.constant 0 : index
    %c120 = arith.constant 120 : index
    %c0_57 = arith.constant 0 : index
    %158 = vector.load %arg2[%c0_56, %c120, %c0_57] : memref<1x128x128xf32, #tpu.memory_space<vmem>>, vector<1x8x128xf32>
    %159 = vector.shape_cast %158 : vector<1x8x128xf32> to vector<8x128xf32>
    %160 = arith.mulf %159, %157 : vector<8x128xf32>
    %c0_58 = arith.constant 0 : index
    %c120_59 = arith.constant 120 : index
    %c0_60 = arith.constant 0 : index
    %161 = vector.load %arg11[%c0_58, %c120_59, %c0_60] : memref<1x128x128xf32, #tpu.memory_space<vmem>>, vector<1x8x128xf32>
    %162 = vector.shape_cast %161 : vector<1x8x128xf32> to vector<8x128xf32>
    %163 = vector.shape_cast %160 : vector<8x128xf32> to vector<1x8x128xf32>
    tpu.vector_store %arg11[%c0_58, %c120_59, %c0_60], %163 {strides = array<i32>} : memref<1x128x128xf32, #tpu.memory_space<vmem>>, vector<1x8x128xf32>,
    return
  }
  func.func @transform_0(%arg0: i32, %arg1: i32) -> (i32, i32, i32) {
    %c0_i32 = arith.constant 0 : i32
    %c0_i32_0 = arith.constant 0 : i32
    return %arg0, %arg1, %c0_i32 : i32, i32, i32
  }
  func.func @transform_1(%arg0: i32, %arg1: i32) -> (i32, i32, i32) {
    %c1_i32 = arith.constant 1 : i32
    %c0_i32 = arith.constant 0 : i32
    return %arg0, %arg1, %c1_i32 : i32, i32, i32
  }
  func.func @transform_2(%arg0: i32, %arg1: i32) -> (i32, i32, i32) {
    %c16_i32 = arith.constant 16 : i32
    %0 = arith.muli %arg1, %c16_i32 : i32
    %c1_i32 = arith.constant 1 : i32
    %1 = arith.subi %0, %c1_i32 : i32
    %c0_i32 = arith.constant 0 : i32
    %2 = arith.maxsi %1, %c0_i32 : i32
    %c1_i32_0 = arith.constant 1 : i32
    %c0_i32_1 = arith.constant 0 : i32
    return %arg0, %2, %c1_i32_0 : i32, i32, i32
  }
  func.func @transform_3(%arg0: i32, %arg1: i32) -> (i32, i32, i32) {
    %c1_i32 = arith.constant 1 : i32
    %0 = arith.addi %arg1, %c1_i32 : i32
    %c16_i32 = arith.constant 16 : i32
    %1 = arith.muli %0, %c16_i32 : i32
    %c15_i32 = arith.constant 15 : i32
    %2 = arith.minsi %1, %c15_i32 : i32
    %c1_i32_0 = arith.constant 1 : i32
    %c0_i32 = arith.constant 0 : i32
    return %arg0, %2, %c1_i32_0 : i32, i32, i32
  }
  func.func @transform_4(%arg0: i32, %arg1: i32) -> (i32, i32) {
    %c0_i32 = arith.constant 0 : i32
    %c0_i32_0 = arith.constant 0 : i32
    %c0_i32_1 = arith.constant 0 : i32
    return %c0_i32, %c0_i32_0 : i32, i32
  }
  func.func @transform_5(%arg0: i32, %arg1: i32) -> (i32, i32) {
    %c0_i32 = arith.constant 0 : i32
    %c0_i32_0 = arith.constant 0 : i32
    %c0_i32_1 = arith.constant 0 : i32
    return %c0_i32, %c0_i32_0 : i32, i32
  }
  func.func @transform_6(%arg0: i32, %arg1: i32) -> (i32, i32) {
    %c0_i32 = arith.constant 0 : i32
    %c0_i32_0 = arith.constant 0 : i32
    %c0_i32_1 = arith.constant 0 : i32
    return %c0_i32, %c0_i32_0 : i32, i32
  }
  func.func @transform_7(%arg0: i32, %arg1: i32) -> (i32, i32) {
    %c0_i32 = arith.constant 0 : i32
    %c0_i32_0 = arith.constant 0 : i32
    %c0_i32_1 = arith.constant 0 : i32
    return %c0_i32, %c0_i32_0 : i32, i32
  }
  func.func @transform_8(%arg0: i32, %arg1: i32) -> (i32, i32) {
    %c0_i32 = arith.constant 0 : i32
    %c0_i32_0 = arith.constant 0 : i32
    %c0_i32_1 = arith.constant 0 : i32
    return %c0_i32, %c0_i32_0 : i32, i32
  }
  func.func @transform_9(%arg0: i32, %arg1: i32) -> (i32, i32, i32) {
    %c0_i32 = arith.constant 0 : i32
    %c0_i32_0 = arith.constant 0 : i32
    return %arg0, %arg1, %c0_i32 : i32, i32, i32
  }
}

</mosaic_0001>

<bundles_post_ra>
// kernel: tpu_custom_call.1
= control target key start
LH: loop header
LB: loop body
LE: loop exit
PB: predicated region body
PF: predicated region fallthrough
CT: control target
= control target key end

     0   :  { %s3093_s0 = inlined_call_operand.hbm [shape: f32[2,128,256], index: 0, kind: input, shape index: {}]   ;;  %s3094_s1 = inlined_call_operand.hbm [shape: f32[2,128,256], index: 1, kind: input, shape index: {}]   ;;  %s3095_s2 = inlined_call_operand.hbm [shape: f32[2,128,256], index: 2, kind: input, shape index: {}]   ;;  %s3096_s3 = inlined_call_operand.hbm [shape: f32[2,128,256], index: 3, kind: input, shape index: {}]   ;;  %s3097_s4 = inlined_call_operand.vmem [shape: f32[1,128], index: 4, kind: input, shape index: {}]   ;;  %s3098_s5 = inlined_call_operand.vmem [shape: f32[1,128], index: 5, kind: input, shape index: {}]   ;;  %s3099_s6 = inlined_call_operand.vmem [shape: f32[3,128], index: 6, kind: input, shape index: {}]   ;;  %s3100_s7 = inlined_call_operand.hbm [shape: bf16[128,128], index: 7, kind: input, shape index: {}]   ;;  %s3101_s8 = inlined_call_operand.vmem [shape: f32[1,128], index: 8, kind: input, shape index: {}]   ;;  %s3102_s9 = inlined_call_operand.hbm [shape: f32[2,128,128], index: 9, kind: output, shape index: {}]  }
   0x1   :  { %3124 = sst [smem:[#allocation25_spill]] %s3093_s0 }
   0x2   :  { %3125 = sst [smem:[#allocation26_spill]] %s3094_s1 }
   0x3   :  { %3126 = sst [smem:[#allocation27_spill]] %s3100_s7 }
   0x4   :  { %3127 = sst [smem:[#allocation28_spill]] %s3102_s9 }
   0x5   :  { %14 = vsyncpa [#allocation3], 0 }
   0x6   :  { %16 = vsyncpa [#allocation3 + $0x1], 0 }
   0x7   :  { %17 = vsyncpa [#allocation6], 0 }
   0x8   :  { %19 = vsyncpa [#allocation6 + $0x1], 0 }
   0x9   :  { %20 = vsyncpa [#allocation9], 0 }
   0xa   :  { %22 = vsyncpa [#allocation9 + $0x1], 0 }
   0xb   :  { %23 = vsyncpa [#allocation4], 0 }
   0xc   :  { %25 = vsyncpa [#allocation4 + $0x1], 0  ;;  %s2150_s30 = smov 0   ;;  %s2152_s10 = smov 0  }
   0xd   :  { %s2154_s11 = smov 0   ;;  %s2156_s12 = smov 0  }
   0xe   :  { %s2158_s13 = smov 0   ;;  %s2160_s14 = smov 0  }
   0xf LB: > { %3128 = sst [smem:[#allocation17_spill]] %s2063_s30  ;;  %s2181_s15 = sadd.s32 4294967295, %s2083_s14   ;;  %s2083_s14 = sphi %s2160_s14, %s31_s14   ;;  %s2079_s13 = sphi %s2158_s13, %s3179_s13   ;;  %s2075_s12 = sphi %s2156_s12, %s3178_s12   ;;  %s2071_s11 = sphi %s2154_s11, %s3177_s11   ;;  %s2067_s10 = sphi %s2152_s10, %s3181_s10   ;;  %s2063_s30 = sphi %s2150_s30, %s3180_s30  }
  0x10   : > { %3129 = sst [smem:[#allocation18_spill]] %s2071_s11  ;;  %s1549_s16 = sadd.s32 4294967294, %s2083_s14  }
  0x11   : > { %3130 = sst [smem:[#allocation19_spill]] %s2075_s12  ;;  %p59_p0 = scmp.ne.s32.totalorder %s2071_s11, %s2067_s10 }
  0x12   : > { %3131 = sst [smem:[#allocation20_spill]] %s2079_s13  ;;  %p60_p1 = scmp.eq.s32.totalorder %s2083_s14, 0 }
  0x13   : > { %p65_p2 = scmp.ne.s32.totalorder %s2067_s10, %s2063_s30  ;;  %p3106_p3 = scmp.eq.s32.totalorder %s2181_s15, 0 }
  0x14   : > { %p296_p4 = scmp.eq.s32.totalorder %s2181_s15, 1  ;;  %p2192_p5 = por %p60_p1, %p59_p0 }
  0x15   : > { %p302_p6 = scmp.eq.s32.totalorder %s1549_s16, 1  ;;  %p2198_p7 = por %p3106_p3, %p65_p2 }
  0x16   : > { %p2202_p8 = por %p296_p4, %p59_p0  ;;  %p1550_p10 = scmp.ge.s32.totalorder %s2083_s14, 1 }
  0x17   : > { %s3133_s19 = scalar_select %p2198_p7, 1, 0 }
  0x18   : > { %s3134_s20 = scalar_select %p2202_p8, 1, 0 }
  0x19   : > { %p2206_p9 = por %p302_p6, %p65_p2  ;;  %p309_p11 = scmp.lt.s32.totalorder %s2083_s14, 3 }
  0x1a   : > { %3135 = sst [smem:[#allocation21_spill]] %s3134_s20  ;;  %s2085_s23 = smov [#allocation10]  }
  0x1b   : > { %s3136_s21 = scalar_select %p2206_p9, 1, 0 }
  0x1c   : > { %p2212_p12 = pnand %p1550_p10, %p309_p11  ;;  %s330_s24 = sshll.u32 %s2085_s23, 4  ;;  %s2216_s24 = int_to_ptr.vmem [resolvable:$true] %s330_s24 }
  0x1d   : > { %3137 = sst [smem:[#allocation22_spill]] %s3136_s21  ;;  %p1737_p1 = scmp.lt.s32.totalorder %s2083_s14, 2 }
  0x1e   : > { %s3138_s22 = scalar_select %p2212_p12, 1, 0 }
  0x1f   : > { %p1715_p13 = pneg %p2212_p12  ;;  %p2230_p4 = pnand %p1737_p1, %p2192_p5 }
  0x20   : > { %s43_s27 = sadd.s32 1, %s2079_s13  ;;  %s3142_s7 = sld [smem:[#allocation27_spill]] }
  0x21   : > { %p2224_p2 = pnand %p1715_p13, %p3106_p3  ;;  %p2235_p6 = scmp.ge.s32.totalorder %s43_s27, 2 }
  0x22   : > { %s3140_s26 = scalar_select %p2230_p4, 1, 0 }
  0x23   : > { %s3141_s28 = scalar_select %p2235_p6, 1, 0 }
  0x24   : > { %p1840_p11 = pneg %p2224_p2 }
  0x26   : > { %s1838_s23 = scalar_lea.hbm %s3142_s7, 1024 }
  0x27   : > { %p1839_p10 = scmp.ne.s32.totalorder %s3142_s7, %s1838_s23  ;;  %p1845_p1 = scmp.lt.u32.totalorder %s1838_s23, %s3142_s7 }
  0x29   : > { %p1841_p13 = pnand %p1840_p11, %p1839_p10 }
  0x2b   : > { %p1842_p5 = pneg %p1841_p13 }
  0x2d   : > { %p1847_p0 = pnand %p1845_p1, %p1842_p5 }
  0x2f   : > { %1850 = shalt.err (!%p1847_p0)
}
  0x30   : > { %s1851_s9 = scalar_lea.vmem %s2216_s24, 1024  ;;  %p1859_p7 = scmp.lt.s32.totalorder %s2216_s24, %s2216_s24 }
  0x31   : > { %p1852_p3 = scmp.ne.s32.totalorder %s2216_s24, %s1851_s9  ;;  %p1860_p12 = scmp.lt.s32.totalorder %s1851_s9, %s1851_s9 }
  0x33   : > { %p1854_p9 = pnand %p1852_p3, %p1840_p11  ;;  %p1861_p4 = por %p1860_p12, %p1859_p7 }
  0x35   : > { %p1855_p8 = pneg %p1854_p9 }
  0x37   : > { %p1862_p6 = pnand %p1861_p4, %p1855_p8 }
  0x39   : > { %1865 = shalt.err (!%p1862_p6)
}
  0x3a   : > { %s2086_s17 = smov 64   ;;  %s2087_s30 = smov 4  }
  0x3b   : > { %1718 = dma.hbm_to_vmem [thread:$0]  (!%p2224_p2), %s3142_s7, 1024, %s2216_s24, [#allocation9], %s2086_s17, %s2086_s17, %s2087_s30  }
  0x3c   : > { %s2261_s9 = sand.u32 1, %s2071_s11   ;;  %p3143_p3 = scmp.ne.s32.totalorder %s3141_s28, 0 }
  0x3d   : > { %s3113_s16 = sshll.u32 %s2261_s9, 7  ;;  %s2269_s23 = sshll.u32 %s2079_s13, 12 }
  0x3e   : > { %s3183_s27 = smov (%p3143_p3, %s43_s27), 0  ;;  %s3115_s25 = sand.u32 1, %s2083_s14  }
  0x3f   : > { %3144 = sst [smem:[#allocation23_spill]] %s3183_s27  ;;  %s47_s18 = ssub.s32 %s2079_s13, %s3183_s27 }
  0x40   : > { %p50_p7 = scmp.eq.s32.totalorder %s47_s18, 0  ;;  %s3145_s20 = sadd.s32 1, %s2071_s11 }
  0x41   : > { %s3147_s1 = sld [smem:[#allocation26_spill]]  ;;  %s375_s30 = scalar_lea.vmem [#allocation5], %s3113_s16 }
  0x42   : > { %s2277_s12 = scalar_select %p50_p7, %s2071_s11, %s3145_s20  }
  0x43   : > { %s386_s21 = sshll.u32 %s375_s30, 4  ;;  %s2291_s18 = scalar_lea.sflag [#allocation6], %s3115_s25  ;;  %s2287_s21 = int_to_ptr.vmem [resolvable:$true] %s386_s21 }
  0x44   : > { %3146 = sst [smem:[#allocation24_spill]] %s2277_s12  ;;  %p3148_p9 = scmp.ne.s32.totalorder %s3140_s26, 0 }
  0x46   : > { %p2296_p12 = pneg %p3148_p9 }
  0x47   : > { %s1422_s28 = scalar_lea.hbm %s3147_s1, %s2269_s23  ;;  %s1871_s30 = scalar_lea.hbm %s3147_s1, 8192 }
  0x48   : > { %s2285_s29 = scalar_lea.hbm %s1422_s28, 128  ;;  %s1896_s7 = scalar_lea.hbm %s1422_s28, 2176 }
  0x49   : > { %p1867_p8 = scmp.ne.s32.totalorder %s2285_s29, %s1896_s7  ;;  %p1872_p4 = scmp.lt.u32.totalorder %s2285_s29, %s3147_s1 }
  0x4a   : > { %p1873_p6 = scmp.lt.u32.totalorder %s1871_s30, %s1896_s7  ;;  %p1875_p11 = scmp.lt.u32.totalorder %s1896_s7, %s2285_s29 }
  0x4b   : > { %p1869_p0 = pnand %p2296_p12, %p1867_p8 }
  0x4c   : > { %p1874_p10 = por %p1873_p6, %p1872_p4 }
  0x4d   : > { %p1870_p2 = pneg %p1869_p0 }
  0x4e   : > { %p1876_p13 = por %p1875_p11, %p1874_p10 }
  0x50   : > { %p1877_p5 = pnand %p1876_p13, %p1870_p2 }
  0x52   : > { %1880 = shalt.err (!%p1877_p5)
}
  0x53   : > { %s1881_s28 = scalar_lea.vmem %s2287_s21, 2048  ;;  %s2088_s24 = smov [#allocation5]  }
  0x54   : > { %p1882_p1 = scmp.ne.s32.totalorder %s2287_s21, %s1881_s28  ;;  %s1886_s17 = sshll.u32 %s2088_s24, 4  ;;  %s1887_s17 = int_to_ptr.vmem [resolvable:$false] %s1886_s17 }
  0x55   : > { %s1888_s27 = scalar_lea.vmem %s1887_s17, 4096  ;;  %p1889_p8 = scmp.lt.s32.totalorder %s2287_s21, %s1887_s17 }
  0x56   : > { %p1884_p3 = pnand %p1882_p1, %p2296_p12  ;;  %p1890_p0 = scmp.lt.s32.totalorder %s1888_s27, %s1881_s28 }
  0x58   : > { %p1885_p7 = pneg %p1884_p3  ;;  %p1891_p4 = por %p1890_p0, %p1889_p8 }
  0x5a   : > { %p1892_p6 = pnand %p1891_p4, %p1885_p7 }
  0x5c   : > { %1895 = shalt.err (!%p1892_p6)
}
  0x5d   : > { %s3118_s7 = smov 256   ;;  %s2090_s16 = smov 128  }
  0x5e   : > { %s2091_s30 = smov 8   ;;  %s3150_s0 = sld [smem:[#allocation25_spill]] }
  0x5f   : > { %1725 = dma.hbm_to_vmem [thread:$0]  (!%p3148_p9), %s2285_s29, 2048, %s2287_s21, %s2291_s18, %s3118_s7, %s2090_s16, %s2091_s30  }
  0x60   : > { %s3151_s27 = sshll.u32 %s2261_s9, 7  ;;  %s1559_s13 = sshll.u32 %s2261_s9, 3 }
  0x61   : > { %s351_s25 = scalar_lea.vmem [#allocation2], %s3151_s27  ;;  %s348_s12 = scalar_lea.sflag [#allocation3], %s2261_s9 }
  0x62   : > { %s361_s1 = sshll.u32 %s351_s25, 4  ;;  %s2331_s1 = int_to_ptr.vmem [resolvable:$true] %s361_s1 }
  0x64   : > { %s2327_s17 = scalar_lea.hbm %s3150_s0, %s2269_s23  ;;  %s1902_s28 = scalar_lea.hbm %s3150_s0, 8192 }
  0x65   : > { %s1897_s11 = scalar_lea.hbm %s2327_s17, 2048  ;;  %p1903_p13 = scmp.lt.u32.totalorder %s2327_s17, %s3150_s0 }
  0x66   : > { %p1898_p2 = scmp.ne.s32.totalorder %s2327_s17, %s1897_s11  ;;  %p1904_p5 = scmp.lt.u32.totalorder %s1902_s28, %s1897_s11 }
  0x67   : > { %p1906_p3 = scmp.lt.u32.totalorder %s1897_s11, %s2327_s17 }
  0x68   : > { %p1900_p10 = pnand %p1898_p2, %p2296_p12  ;;  %p1905_p1 = por %p1904_p5, %p1903_p13 }
  0x6a   : > { %p1901_p11 = pneg %p1900_p10  ;;  %p1907_p7 = por %p1906_p3, %p1905_p1 }
  0x6c   : > { %p1908_p8 = pnand %p1907_p7, %p1901_p11 }
  0x6e   : > { %1911 = shalt.err (!%p1908_p8)
}
  0x6f   : > { %s1912_s25 = scalar_lea.vmem %s2331_s1, 2048  ;;  %s2092_s27 = smov [#allocation2]  }
  0x70   : > { %p1913_p0 = scmp.ne.s32.totalorder %s2331_s1, %s1912_s25  ;;  %s1917_s21 = sshll.u32 %s2092_s27, 4  ;;  %s1918_s21 = int_to_ptr.vmem [resolvable:$false] %s1917_s21 }
  0x71   : > { %s1919_s7 = scalar_lea.vmem %s1918_s21, 4096  ;;  %p1920_p2 = scmp.lt.s32.totalorder %s2331_s1, %s1918_s21 }
  0x72   : > { %p1915_p4 = pnand %p1913_p0, %p2296_p12  ;;  %p1921_p10 = scmp.lt.s32.totalorder %s1919_s7, %s1912_s25 }
  0x74   : > { %p1916_p6 = pneg %p1915_p4  ;;  %p1922_p13 = por %p1921_p10, %p1920_p2 }
  0x76   : > { %p1923_p5 = pnand %p1922_p13, %p1916_p6 }
  0x78   : > { %1926 = shalt.err (!%p1923_p5)
}
  0x79   : > { %s3152_s11 = smov 256   ;;  %s1431_s24 = scalar_lea.hbm %s3095_s2, %s2269_s23 }
  0x7a   : > { %1722 = dma.hbm_to_vmem [thread:$0]  (!%p3148_p9), %s2327_s17, 2048, %s2331_s1, %s348_s12, %s3152_s11, %s2090_s16, %s2091_s30  }
  0x7b   : > { %s2365_s25 = scalar_lea.hbm %s1431_s24, 128  ;;  %s400_s27 = scalar_lea.vmem [#allocation7], %s1559_s13 }
  0x7c   : > { %s415_s21 = sshll.u32 %s400_s27, 4  ;;  %s1957_s7 = scalar_lea.hbm %s1431_s24, 256  ;;  %s416_s21 = int_to_ptr.vmem [resolvable:$true] %s415_s21 }
  0x7d   : > { %p1928_p11 = scmp.ne.s32.totalorder %s2365_s25, %s1957_s7  ;;  %s1932_s12 = scalar_lea.hbm %s3095_s2, 8192 }
  0x7e   : > { %p1933_p7 = scmp.lt.u32.totalorder %s2365_s25, %s3095_s2  ;;  %p1934_p8 = scmp.lt.u32.totalorder %s1932_s12, %s1957_s7 }
  0x7f   : > { %p1930_p1 = pnand %p1928_p11, %p2296_p12  ;;  %p1936_p4 = scmp.lt.u32.totalorder %s1957_s7, %s2365_s25 }
  0x80   : > { %p1935_p0 = por %p1934_p8, %p1933_p7 }
  0x81   : > { %p1931_p3 = pneg %p1930_p1 }
  0x82   : > { %p1937_p6 = por %p1936_p4, %p1935_p0 }
  0x84   : > { %p1938_p2 = pnand %p1937_p6, %p1931_p3 }
  0x86   : > { %1941 = shalt.err (!%p1938_p2)
}
  0x87   : > { %s1942_s17 = scalar_lea.vmem %s416_s21, 128  ;;  %s2093_s11 = smov [#allocation7]  }
  0x88   : > { %p1943_p10 = scmp.ne.s32.totalorder %s416_s21, %s1942_s17  ;;  %s1947_s29 = sshll.u32 %s2093_s11, 4  ;;  %s1948_s29 = int_to_ptr.vmem [resolvable:$false] %s1947_s29 }
  0x89   : > { %s1949_s0 = scalar_lea.vmem %s1948_s29, 256  ;;  %p1950_p11 = scmp.lt.s32.totalorder %s416_s21, %s1948_s29 }
  0x8a   : > { %p1945_p13 = pnand %p1943_p10, %p2296_p12  ;;  %p1951_p1 = scmp.lt.s32.totalorder %s1949_s0, %s1942_s17 }
  0x8c   : > { %p1946_p5 = pneg %p1945_p13  ;;  %p1952_p9 = por %p1951_p1, %p1950_p11 }
  0x8e   : > { %p1953_p7 = pnand %p1952_p9, %p1946_p5 }
  0x90   : > { %1956 = shalt.err (!%p1953_p7)
}
  0x91   : > { %p3153_p8 = scmp.ne.s32.totalorder %s3140_s26, 0  ;;  %s1592_s28 = sadd.s32 3840, %s2269_s23 }
  0x92   : > { %s1440_s7 = scalar_lea.hbm %s3096_s3, %s1592_s28  ;;  %s426_s1 = scalar_lea.vmem [#allocation8], %s1559_s13 }
  0x93   : > { %1728 = dma.hbm_to_vmem [thread:$0]  (!%p3153_p8), %s2365_s25, 128, %s416_s21, %s2291_s18  }
  0x94   : > { %s441_s12 = sshll.u32 %s426_s1, 4  ;;  %s2392_s16 = scalar_lea.hbm %s1440_s7, 128  ;;  %s442_s12 = int_to_ptr.vmem [resolvable:$true] %s441_s12 }
  0x95   : > { %s3154_s30 = sand.u32 1, %s2083_s14   ;;  %s1988_s11 = scalar_lea.hbm %s1440_s7, 256 }
  0x96   : > { %s423_s17 = scalar_lea.sflag [#allocation9], %s3154_s30  ;;  %p1959_p9 = scmp.ne.s32.totalorder %s2392_s16, %s1988_s11 }
  0x97   : > { %s1963_s25 = scalar_lea.hbm %s3096_s3, 8192  ;;  %p1964_p4 = scmp.lt.u32.totalorder %s2392_s16, %s3096_s3 }
  0x98   : > { %p1961_p3 = pnand %p1959_p9, %p2296_p12  ;;  %p1965_p6 = scmp.lt.u32.totalorder %s1963_s25, %s1988_s11 }
  0x99   : > { %p1967_p10 = scmp.lt.u32.totalorder %s1988_s11, %s2392_s16 }
  0x9a   : > { %p1962_p0 = pneg %p1961_p3  ;;  %p1966_p2 = por %p1965_p6, %p1964_p4 }
  0x9c   : > { %p1968_p13 = por %p1967_p10, %p1966_p2 }
  0x9e   : > { %p1969_p5 = pnand %p1968_p13, %p1962_p0 }
  0xa0   : > { %1972 = shalt.err (!%p1969_p5)
}
  0xa1   : > { %s1973_s21 = scalar_lea.vmem %s442_s12, 128  ;;  %s2094_s29 = smov [#allocation8]  }
  0xa2   : > { %p1974_p11 = scmp.ne.s32.totalorder %s442_s12, %s1973_s21  ;;  %s1978_s0 = sshll.u32 %s2094_s29, 4  ;;  %s1979_s0 = int_to_ptr.vmem [resolvable:$false] %s1978_s0 }
  0xa3   : > { %s1980_s28 = scalar_lea.vmem %s1979_s0, 256  ;;  %p1981_p9 = scmp.lt.s32.totalorder %s442_s12, %s1979_s0 }
  0xa4   : > { %p1976_p1 = pnand %p1974_p11, %p2296_p12  ;;  %p1982_p3 = scmp.lt.s32.totalorder %s1980_s28, %s1973_s21 }
  0xa6   : > { %p1977_p7 = pneg %p1976_p1  ;;  %p1983_p8 = por %p1982_p3, %p1981_p9 }
  0xa8   : > { %p1984_p4 = pnand %p1983_p8, %p1977_p7 }
  0xaa   : > { %1987 = shalt.err (!%p1984_p4)
}
  0xab   : > { %p3155_p6 = scmp.ne.s32.totalorder %s3140_s26, 0  ;;  %p3156_p0 = scmp.ne.s32.totalorder %s3138_s22, 0 }
  0xac   : > { %s2415_s20 = sand.u32 (!%p3156_p0), 1, %s2067_s10   ;;  %p3157_p12 = scmp.ne.s32.totalorder (!%p3156_p0), %s3133_s19, 0 }
  0xad   : > { %1731 = dma.hbm_to_vmem [thread:$0]  (!%p3155_p6), %s2392_s16, 128, %s442_s12, %s423_s17  }
  0xae   : > { %450 = sbr.rel (%p3156_p0) target bundleno = 678 (0x2a6), region = 56  ;;  %s2418_s24 = sshll.u32 (!%p3156_p0), %s2415_s20, 7 }
  0xaf   : > { %s453_s27 = scalar_lea.sflag (!%p3156_p0), [#allocation3], %s2415_s20  ;;  %s2422_s7 = scalar_lea.vmem (!%p3156_p0), [#allocation2], %s2418_s24 }
  0xb5   : > { %2042 = dma.done.wait (%p3157_p12), %s453_s27, 2048  }
  0xb6   : > { %2044 = vsyncadd (%p3157_p12), %s453_s27, 4294965248  ;;  %s461_s22 = sand.u32 1, %s2181_s15   ;;  %s2430_s1 = scalar_lea.vmem [#allocation5], %s2418_s24 }
  0xb7   : > { %s462_s26 = scalar_lea.sflag [#allocation6], %s461_s22 }
  0xb8   : > { %2046 = dma.done.wait (%p3157_p12), %s462_s26, 2176  }
  0xb9   : > { %2048 = vsyncadd (%p3157_p12), %s462_s26, 4294965120  ;;  %s480_s12 = scalar_lea.sflag [#allocation9], %s461_s22 }
  0xba   : > { %2050 = dma.done.wait (%p3157_p12), %s480_s12, 128  }
  0xbb   : > { %2052 = vsyncadd (%p3157_p12), %s480_s12, 4294967168  ;;  %p3158_p8 = scmp.eq.s32.totalorder %s2181_s15, 0 }
  0xbd   : > { %2054 = dma.done.wait (%p3158_p8), [#allocation9], 1024   ;;  %p3159_p2 = pmov %p3158_p8 }
  0xbe   : > { %v2445_v0 = vld [vmem:[%s2430_s1 + $0x78] sm:$0xff]  ;;  %v2448_v1 = vld [vmem:[%s2430_s1] sm:$0xff]  ;;  %v2453_v2 = vld [vmem:[%s2430_s1 + $0x10] sm:$0xff]  ;;  %v3121_v19 = vmov 0.0   ;;  %vm2096_vm0 = vmmov 0   ;;  %v870_v56 = vlaneseq  ;;  %s2989_s25 = scalar_lea.vmem [#allocation11], %s2418_s24 }
  0xbf   : > { %2056 = vsyncadd (%p3159_p2), [#allocation9], 4294966272  ;;  %615 = vadd.xlane.f32.xlu1 %v2445_v0  ;;  %585 = vadd.xlane.f32.xlu0 %v2448_v1  ;;  %v2456_v3 = vld [vmem:[%s2430_s1 + $0x8] sm:$0xff]  ;;  %v2461_v4 = vld [vmem:[%s2430_s1 + $0x18] sm:$0xff]  ;;  %v634_v5 = vmul.f32 %v2448_v1, %v2448_v1  ;;  %v649_v7 = vmul.f32 %v2445_v0, %v2445_v0  ;;  %v636_v8 = vmul.f32 %v2453_v2, %v2453_v2  ;;  %s3168_s9 = sld [smem:[#allocation19_spill]]  ;;  %s3169_s21 = sld [smem:[#allocation21_spill]] }
  0xc0   : > { %v635_v6 = vmul.f32 %v2456_v3, %v2456_v3  ;;  %v2473_v9 = vld [vmem:[%s2430_s1 + $0x20] sm:$0xff]  ;;  %v637_v10 = vmul.f32 %v2461_v4, %v2461_v4  ;;  %v2481_v12 = vld [vmem:[%s2430_s1 + $0x28] sm:$0xff]  ;;  %v2484_v13 = vld [vmem:[%s2430_s1 + $0x30] sm:$0xff]  ;;  %1661 = vmatprep.subr.bf16.mxu1 %v3121_v19  ;;  %1677 = vmatprep.mubr.msk.bf16.mxu1 %vm2096_vm0, %v3121_v19  ;;  %s1374_s29 = sshll.u32 %s2989_s25, 4  ;;  %s3170_s24 = sld [smem:[#allocation28_spill]]  ;;  %s3043_s29 = int_to_ptr.vmem [resolvable:$true] %s1374_s29 }
  0xc1   : > { %v638_v11 = vmul.f32 %v2473_v9, %v2473_v9  ;;  %v639_v14 = vmul.f32 %v2481_v12, %v2481_v12  ;;  %v2491_v15 = vld [vmem:[%s2430_s1 + $0x38] sm:$0xff]  ;;  %v640_v16 = vmul.f32 %v2484_v13, %v2484_v13  ;;  %v2496_v17 = vld [vmem:[#allocation10] sm:$0xff]   ;;  %v2511_v22 = vld [vmem:[#allocation10 + $0x8] sm:$0xff]   ;;  %s1989_s22 = scalar_lea.vmem %s3043_s29, 2048  ;;  %s2097_s26 = smov [#allocation11]  }
  0xc2   : > { %v2499_v18 = vld [vmem:[%s2430_s1 + $0x40] sm:$0xff]  ;;  %1662 = vmatpush3.bf16.msra.mxu1 %v2496_v17  ;;  %1629 = vmatprep.subr.bf16.mxu0 %v2496_v17  ;;  %v641_v20 = vmul.f32 %v2491_v15, %v2491_v15  ;;  %v2517_v23 = vld [vmem:[#allocation10 + $0x10] sm:$0xff]   ;;  %v2520_v24 = vld [vmem:[%s2430_s1 + $0x48] sm:$0xff]  ;;  %p1990_p10 = scmp.ne.s32.totalorder %s3043_s29, %s1989_s22 }
  0xc3   : > { %589 = vadd.xlane.f32.xlu1 %v2453_v2  ;;  %587 = vadd.xlane.f32.xlu0 %v2456_v3  ;;  %v642_v21 = vmul.f32 %v2499_v18, %v2499_v18  ;;  %v2523_v25 = vld [vmem:[%s2430_s1 + $0x50] sm:$0xff]  ;;  %v643_v26 = vmul.f32 %v2520_v24, %v2520_v24  ;;  %v2533_v27 = vld [vmem:[#allocation10 + $0x18] sm:$0xff]   ;;  %v2545_v30 = vld [vmem:[#allocation10 + $0x20] sm:$0xff]  }
  0xc4   : > { %1663 = vmatprep.subr.bf16.mxu1 %v3121_v19  ;;  %1630 = vmatpush3.bf16.msra.mxu0 %v2496_v17  ;;  %v2536_v28 = vld [vmem:[%s2430_s1 + $0x58] sm:$0xff]  ;;  %v644_v29 = vmul.f32 %v2523_v25, %v2523_v25  ;;  %v2548_v31 = vld [vmem:[%s2430_s1 + $0x60] sm:$0xff]  ;;  %v2559_v34 = vld [vmem:[#allocation10 + $0x28] sm:$0xff]  }
  0xc5   : > { %1631 = vmatprep.subr.bf16.mxu0 %v2511_v22  ;;  %v645_v32 = vmul.f32 %v2536_v28, %v2536_v28  ;;  %v646_v33 = vmul.f32 %v2548_v31, %v2548_v31  ;;  %v2565_v35 = vld [vmem:[#allocation10 + $0x30] sm:$0xff]   ;;  %v2568_v36 = vld [vmem:[%s2430_s1 + $0x68] sm:$0xff]  ;;  %v2583_v40 = vld [vmem:[#allocation10 + $0x38] sm:$0xff]   ;;  %s1593_s13 = sshll.u32 %s3168_s9, 11  ;;  %p3171_p13 = scmp.ne.s32.totalorder %s3169_s21, 0 }
  0xc6   : > { %1664 = vmatpush3.bf16.msra.mxu1 %v2511_v22  ;;  %v2571_v37 = vld [vmem:[%s2430_s1 + $0x70] sm:$0xff]  ;;  %v647_v38 = vmul.f32 %v2568_v36, %v2568_v36  ;;  %s3041_s27 = scalar_lea.hbm %s3170_s24, %s1593_s13  ;;  %s1993_s1 = sshll.u32 %s2097_s26, 4  ;;  %s1994_s1 = int_to_ptr.vmem [resolvable:$false] %s1993_s1 }
  0xc7   : > { %591 = vadd.xlane.f32.xlu0 %v2461_v4  ;;  %650 = vadd.xlane.f32.xlu1 %v634_v5  ;;  %v648_v39 = vmul.f32 %v2571_v37, %v2571_v37  ;;  %p1991_p5 = pnand %p1990_p10, %p3171_p13  ;;  %s1995_s12 = scalar_lea.vmem %s1994_s1, 4096 }
  0xc8   : > { %1665 = vmatprep.subr.bf16.mxu1 %v3121_v19  ;;  %1632 = vmatpush3.bf16.msra.mxu0 %v2511_v22  ;;  %p1996_p1 = scmp.lt.s32.totalorder %s3043_s29, %s1994_s1  ;;  %p1997_p7 = scmp.lt.s32.totalorder %s1995_s12, %s1989_s22 }
  0xc9   : > { %1633 = vmatprep.subr.bf16.mxu0 %v2517_v23  ;;  %p1992_p11 = pneg %p1991_p5 }
  0xca   : > { %1666 = vmatpush3.bf16.msra.mxu1 %v2517_v23  ;;  %p1998_p9 = por %p1997_p7, %p1996_p1 }
  0xcb   : > { %652 = vadd.xlane.f32.xlu0 %v635_v6  ;;  %680 = vadd.xlane.f32.xlu1 %v649_v7 }
  0xcc   : > { %1667 = vmatprep.subr.bf16.mxu1 %v3121_v19  ;;  %1634 = vmatpush3.bf16.msra.mxu0 %v2517_v23  ;;  %p1999_p3 = pnand %p1998_p9, %p1992_p11 }
  0xcd   : > { %1635 = vmatprep.subr.bf16.mxu0 %v2533_v27 }
  0xce   : > { %1668 = vmatpush3.bf16.msra.mxu1 %v2533_v27 }
  0xcf   : > { %593 = vadd.xlane.f32.xlu0 %v2473_v9  ;;  %654 = vadd.xlane.f32.xlu1 %v636_v8 }
  0xd0   : > { %1669 = vmatprep.subr.bf16.mxu1 %v3121_v19  ;;  %1636 = vmatpush3.bf16.msra.mxu0 %v2533_v27 }
  0xd1   : > { %1637 = vmatprep.subr.bf16.mxu0 %v2545_v30 }
  0xd2   : > { %1670 = vmatpush3.bf16.msra.mxu1 %v2545_v30 }
  0xd3   : > { %656 = vadd.xlane.f32.xlu0 %v637_v10  ;;  %658 = vadd.xlane.f32.xlu1 %v638_v11  ;;  %v2607_v10 = vshrl.u32 %v870_v56, 7 }
  0xd4   : > { %1671 = vmatprep.subr.bf16.mxu1 %v3121_v19  ;;  %1638 = vmatpush3.bf16.msra.mxu0 %v2545_v30 }
  0xd5   : > { %1639 = vmatprep.subr.bf16.mxu0 %v2559_v34  ;;  %vm872_vm1 = vcmp.lt.s32.totalorder %v2607_v10, 1  ;;  %vm961_vm2 = vcmp.lt.s32.totalorder %v2607_v10, 7 }
  0xd6   : > { %1672 = vmatpush3.bf16.msra.mxu1 %v2559_v34 }
  0xd7   : > { %595 = vadd.xlane.f32.xlu0 %v2481_v12  ;;  %597 = vadd.xlane.f32.xlu1 %v2484_v13 }
  0xd8   : > { %1673 = vmatprep.subr.bf16.mxu1 %v3121_v19  ;;  %1640 = vmatpush3.bf16.msra.mxu0 %v2559_v34 }
  0xd9   : > { %1641 = vmatprep.subr.bf16.mxu0 %v2565_v35 }
  0xda   : > { %1674 = vmatpush3.bf16.msra.mxu1 %v2565_v35 }
  0xdb   : > { %599 = vadd.xlane.f32.xlu0 %v2491_v15  ;;  %660 = vadd.xlane.f32.xlu1 %v639_v14 }
  0xdc   : > { %1675 = vmatprep.subr.bf16.mxu1 %v3121_v19  ;;  %1642 = vmatpush3.bf16.msra.mxu0 %v2565_v35 }
  0xdd   : > { %1643 = vmatprep.subr.bf16.mxu0 %v2583_v40 }
  0xde   : > { %1676 = vmatpush3.bf16.msra.mxu1 %v2583_v40 }
  0xdf   : > { %601 = vadd.xlane.f32.xlu0 %v2499_v18  ;;  %662 = vadd.xlane.f32.xlu1 %v640_v16 }
  0xe0   : > { %1644 = vmatpush3.bf16.msra.mxu0 %v2583_v40 }
  0xe1   : > { %1681 = vmatprep.subr.bf16.mxu0 %v3121_v19 }
  0xe3   : > { %664 = vadd.xlane.f32.xlu0 %v641_v20  ;;  %666 = vadd.xlane.f32.xlu1 %v642_v21 }
  0xe7   : > { %603 = vadd.xlane.f32.xlu0 %v2520_v24  ;;  %605 = vadd.xlane.f32.xlu1 %v2523_v25 }
  0xeb   : > { %607 = vadd.xlane.f32.xlu0 %v2536_v28  ;;  %668 = vadd.xlane.f32.xlu1 %v643_v26 }
  0xef   : > { %609 = vadd.xlane.f32.xlu0 %v2548_v31  ;;  %670 = vadd.xlane.f32.xlu1 %v644_v29 }
  0xf3   : > { %672 = vadd.xlane.f32.xlu0 %v645_v32  ;;  %674 = vadd.xlane.f32.xlu1 %v646_v33 }
  0xf7   : > { %611 = vadd.xlane.f32.xlu0 %v2568_v36  ;;  %613 = vadd.xlane.f32.xlu1 %v2571_v37 }
  0xfb   : > { %676 = vadd.xlane.f32.xlu0 %v647_v38  ;;  %678 = vadd.xlane.f32.xlu1 %v648_v39 }
 0x14c   : > { %v616_v41 = vpop.xlane.xlu1 %615  ;;  %v586_v42 = vpop.xlane.xlu0 %585 }
 0x14d   : > { %v2591_v45 = vmul.f32 0.0078125, %v586_v42  ;;  %v2593_v46 = vmul.f32 0.0078125, %v616_v41  ;;  %v911_v41 = vsub.s32 1, %v2607_v10 }
 0x14f   : > { %v698_v49 = vmul.f32 %v2591_v45, %v2591_v45  ;;  %v713_v53 = vmul.f32 %v2593_v46, %v2593_v46 }
 0x150   : > { %v590_v43 = vpop.xlane.xlu1 %589  ;;  %v588_v44 = vpop.xlane.xlu0 %587 }
 0x151   : > { %v2597_v50 = vmul.f32 0.0078125, %v588_v44  ;;  %v2603_v61 = vmul.f32 0.0078125, %v590_v43 }
 0x153   : > { %v699_v57 = vmul.f32 %v2597_v50, %v2597_v50  ;;  %v700_v20 = vmul.f32 %v2603_v61, %v2603_v61 }
 0x154   : > { %v592_v47 = vpop.xlane.xlu0 %591  ;;  %v651_v48 = vpop.xlane.xlu1 %650 }
 0x155   : > { %v682_v51 = vmul.f32 0.0078125, %v651_v48  ;;  %v2605_v6 = vmul.f32 0.0078125, %v592_v47  ;;  %v551_v47 = vld [vmem:[%s3099_s6] sm:$0x7] }
 0x157   : > { %v714_v52 = vsub.f32 %v682_v51, %v698_v49  ;;  %v701_v32 = vmul.f32 %v2605_v6, %v2605_v6  ;;  %v891_v49 = vsub.s32 0, %v2607_v10 }
 0x158   : > { %v653_v54 = vpop.xlane.xlu0 %652  ;;  %v681_v55 = vpop.xlane.xlu1 %680 }
 0x159   : > { %v730_v58 = vmax.f32 %v714_v52, 0.0  ;;  %v683_v59 = vmul.f32 0.0078125, %v653_v54  ;;  %v697_v60 = vmul.f32 0.0078125, %v681_v55 }
 0x15b   : > { %v762_v62 = vadd.f32 1e-12, %v730_v58  ;;  %v715_v63 = vsub.f32 %v683_v59, %v699_v57  ;;  %v729_v5 = vsub.f32 %v697_v60, %v713_v53  ;;  %v980_v53 = vsub.s32 2, %v2607_v10 }
 0x15c   : > { %v594_v7 = vpop.xlane.xlu0 %593  ;;  %v655_v8 = vpop.xlane.xlu1 %654  ;;  %v2623_v57 = vrot.slane %v551_v47, %v911_v41 }
 0x15d   : > { %1806 = vrsqrt.f32 %v762_v62  ;;  %v731_v11 = vmax.f32 %v715_v63, 0.0  ;;  %v745_v14 = vmax.f32 %v729_v5, 0.0  ;;  %v2609_v16 = vmul.f32 0.0078125, %v594_v7  ;;  %v2633_v5 = vld [vmem:[%s3097_s4] ss:$0 sm:$0xff] }
 0x15e   : > { %v684_v21 = vmul.f32 0.0078125, %v655_v8  ;;  %v1261_v62 = vrot.slane %v3121_v19, 7  ;;  %v746_v63 = vsub.f32 %v2448_v1, %v2591_v45  ;;  %v2636_v7 = vrot.slane %v551_v47, %v891_v49 }
 0x15f   : > { %v763_v26 = vadd.f32 1e-12, %v731_v11  ;;  %v777_v29 = vadd.f32 1e-12, %v745_v14  ;;  %v702_v42 = vmul.f32 %v2609_v16, %v2609_v16  ;;  %v761_v1 = vsub.f32 %v2445_v0, %v2593_v46  ;;  %v2656_v0 = vld [vmem:[%s3098_s5] ss:$0 sm:$0xff] }
 0x160   : > { %v716_v33 = vsub.f32 %v684_v21, %v700_v20  ;;  %v657_v38 = vpop.xlane.xlu0 %656  ;;  %v659_v39 = vpop.xlane.xlu1 %658  ;;  %v2640_v21 = vrot.slane %v551_v47, %v980_v53  ;;  %v748_v45 = vsub.f32 %v2453_v2, %v2603_v61  ;;  %v747_v2 = vsub.f32 %v2456_v3, %v2597_v50 }
 0x161   : > { %1808 = vrsqrt.f32 %v763_v26  ;;  %v685_v43 = vmul.f32 0.0078125, %v657_v38  ;;  %v686_v44 = vmul.f32 0.0078125, %v659_v39  ;;  %v749_v46 = vsub.f32 %v2461_v4, %v2605_v6 }
 0x162   : > { %1810 = vrsqrt.f32 %v777_v29  ;;  %v732_v48 = vmax.f32 %v716_v33, 0.0  ;;  %v2647_v33 = vrot.slane %v3121_v19, 1 }
 0x163   : > { %v717_v51 = vsub.f32 %v685_v43, %v701_v32  ;;  %v718_v52 = vsub.f32 %v686_v44, %v702_v42  ;;  %v750_v43 = vsub.f32 %v2473_v9, %v2609_v16 }
 0x164   : > { %v764_v54 = vadd.f32 1e-12, %v732_v48  ;;  %v596_v55 = vpop.xlane.xlu0 %595  ;;  %v598_v56 = vpop.xlane.xlu1 %597 }
 0x165   : > { %v733_v58 = vmax.f32 %v717_v51, 0.0  ;;  %v734_v59 = vmax.f32 %v718_v52, 0.0  ;;  %v2625_v60 = vmul.f32 0.0078125, %v596_v55  ;;  %v2638_v20 = vmul.f32 0.0078125, %v598_v56 }
 0x166   : > { %1812 = vrsqrt.f32 %v764_v54 }
 0x167   : > { %v1807_v8 = vpop.eup %1806  ;;  %v765_v11 = vadd.f32 1e-12, %v733_v58  ;;  %v766_v14 = vadd.f32 1e-12, %v734_v59  ;;  %v703_v38 = vmul.f32 %v2625_v60, %v2625_v60  ;;  %v751_v44 = vsub.f32 %v2481_v12, %v2625_v60 }
 0x168   : > { %v794_v26 = vmul.f32 %v1807_v8, %v746_v63  ;;  %v600_v29 = vpop.xlane.xlu0 %599  ;;  %v661_v32 = vpop.xlane.xlu1 %660  ;;  %v704_v47 = vmul.f32 %v2638_v20, %v2638_v20  ;;  %v752_v3 = vsub.f32 %v2484_v13, %v2638_v20 }
 0x169   : > { %1814 = vrsqrt.f32 %v765_v11  ;;  %v2651_v39 = vmul.f32 0.0078125, %v600_v29  ;;  %v687_v41 = vmul.f32 0.0078125, %v661_v32 }
 0x16a   : > { %1816 = vrsqrt.f32 %v766_v14  ;;  %v816_v61 = vmul.f32 %v2633_v5, %v794_v26 }
 0x16b   : > { %v1809_v42 = vpop.eup %1808  ;;  %v719_v48 = vsub.f32 %v687_v41, %v703_v38  ;;  %v705_v4 = vmul.f32 %v2651_v39, %v2651_v39  ;;  %v753_v56 = vsub.f32 %v2491_v15, %v2651_v39 }
 0x16c   : > { %v1811_v49 = vpop.eup %1810  ;;  %v795_v51 = vmul.f32 %v1809_v42, %v747_v2  ;;  %v602_v50 = vpop.xlane.xlu0 %601  ;;  %v2675_v52 = vadd.f32 %v2656_v0, %v816_v61 }
 0x16d   : > { %v663_v6 = vpop.xlane.xlu1 %662  ;;  %v809_v9 = vmul.f32 %v1811_v49, %v761_v1  ;;  %v735_v16 = vmax.f32 %v719_v48, 0.0  ;;  %v2677_v53 = vmul.f32 0.0078125, %v602_v50 }
 0x16e   : > { %v688_v54 = vmul.f32 0.0078125, %v663_v6  ;;  %v817_v55 = vmul.f32 %v2633_v5, %v795_v51  ;;  %v2683_v58 = vrot.slane %v2675_v52, 7  ;;  %v2687_v59 = vmul.f32 %v2623_v57, %v2675_v52 }
 0x16f   : > { %v831_v63 = vmul.f32 %v2633_v5, %v809_v9  ;;  %v767_v8 = vadd.f32 1e-12, %v735_v16  ;;  %v706_v11 = vmul.f32 %v2677_v53, %v2677_v53  ;;  %v3120_v14 = vrot.slane %v2675_v52, 1 }
 0x170   : > { %v1813_v1 = vpop.eup %1812  ;;  %v720_v29 = vsub.f32 %v688_v54, %v704_v47  ;;  %v665_v32 = vpop.xlane.xlu0 %664  ;;  %v2696_v41 = vadd.f32 %v2656_v0, %v817_v55  ;;  %v1262_v2 = vsel %vm872_vm1, %v1261_v62, %v2683_v58 }
 0x171   : > { %v667_v38 = vpop.xlane.xlu1 %666  ;;  %v796_v61 = vmul.f32 %v1813_v1, %v748_v45  ;;  %1818 = vrsqrt.f32 %v767_v8  ;;  %v689_v42 = vmul.f32 0.0078125, %v665_v32  ;;  %v1263_v50 = vmul.f32 %v1262_v2, %v2636_v7 }
 0x172   : > { %v690_v48 = vmul.f32 0.0078125, %v667_v38  ;;  %v736_v49 = vmax.f32 %v720_v29, 0.0  ;;  %v946_v51 = vrot.slane %v2696_v41, 1  ;;  %v2704_v47 = vadd.f32 %v2656_v0, %v831_v63 }
 0x173   : > { %v1815_v6 = vpop.eup %1814  ;;  %v721_v9 = vsub.f32 %v689_v42, %v705_v4  ;;  %v818_v54 = vmul.f32 %v2633_v5, %v796_v61  ;;  %v855_v55 = vrot.slane %v2696_v41, 7  ;;  %v1264_v63 = vadd.f32 %v1263_v50, %v2687_v59 }
 0x174   : > { %v722_v16 = vsub.f32 %v690_v48, %v706_v11  ;;  %v1817_v62 = vpop.eup %1816  ;;  %v797_v45 = vmul.f32 %v1815_v6, %v749_v46  ;;  %v768_v8 = vadd.f32 1e-12, %v736_v49  ;;  %v604_v1 = vpop.xlane.xlu0 %603  ;;  %v976_v29 = vsel %vm961_vm2, %v3120_v14, %v946_v51 }
 0x175   : > { %v606_v32 = vpop.xlane.xlu1 %605  ;;  %v798_v38 = vmul.f32 %v1817_v62, %v750_v43  ;;  %v737_v2 = vmax.f32 %v721_v9, 0.0  ;;  %v2713_v11 = vmul.f32 0.0078125, %v604_v1  ;;  %v982_v46 = vmul.f32 %v2640_v21, %v976_v29 }
 0x176   : > { %v738_v4 = vmax.f32 %v722_v16, 0.0  ;;  %1820 = vrsqrt.f32 %v768_v8  ;;  %v2715_v61 = vmul.f32 0.0078125, %v606_v32  ;;  %v2719_v42 = vadd.f32 %v2656_v0, %v818_v54 }
 0x177   : > { %v820_v48 = vmul.f32 %v2633_v5, %v798_v38  ;;  %v769_v49 = vadd.f32 1e-12, %v737_v2  ;;  %v707_v50 = vmul.f32 %v2713_v11, %v2713_v11  ;;  %v1265_v54 = vadd.f32 %v1264_v63, %v982_v46 }
 0x178   : > { %v770_v6 = vadd.f32 1e-12, %v738_v4  ;;  %v708_v9 = vmul.f32 %v2715_v61, %v2715_v61  ;;  %v608_v62 = vpop.xlane.xlu0 %607  ;;  %v3123_v29 = vrot.slane %v2704_v47, 7  ;;  %v887_v2 = vsel %vm872_vm1, %v2683_v58, %v855_v55 }
 0x179   : > { %v669_v8 = vpop.xlane.xlu1 %668  ;;  %1822 = vrsqrt.f32 %v769_v49  ;;  %v2730_v1 = vmul.f32 0.0078125, %v608_v62  ;;  %v1266_v38 = vpack.c.bf16 %v1265_v54, %v1265_v54  ;;  %v914_v4 = vmul.f32 %v2623_v57, %v2696_v41 }
 0x17a   : > { %v691_v32 = vmul.f32 0.0078125, %v669_v8  ;;  %1824 = vrsqrt.f32 %v770_v6  ;;  %v888_v6 = vsel %vm872_vm1, %v3123_v29, %v2683_v58  ;;  %v894_v43 = vmul.f32 %v2636_v7, %v887_v2 }
 0x17b   : > { %v1819_v14 = vpop.eup %1818  ;;  %v709_v63 = vmul.f32 %v2730_v1, %v2730_v1  ;;  %1678 = vmatmul.mubr.bf16.vlgmr.msra.gmra.mrb[0].mxu1 %v1266_v38  ;;  %v893_v16 = vmul.f32 %v2636_v7, %v888_v6  ;;  %v819_v58 = vmul.f32 %v2633_v5, %v797_v45  ;;  %v915_v39 = vmul.f32 %v2623_v57, %v2719_v42 }
 0x17c   : > { %v723_v62 = vsub.f32 %v691_v32, %v707_v50  ;;  %v2752_v8 = vmul.f32 %v1819_v14, %v751_v44  ;;  %v610_v54 = vpop.xlane.xlu0 %609  ;;  %v947_v50 = vrot.slane %v2719_v42, 1  ;;  %v930_v12 = vadd.f32 %v914_v4, %v894_v43 }
 0x17d   : > { %v671_v19 = vpop.xlane.xlu1 %670  ;;  %v2757_v49 = vmul.f32 0.0078125, %v610_v54  ;;  %v929_v29 = vadd.f32 %v2687_v59, %v893_v16  ;;  %v2766_v44 = vadd.f32 %v2656_v0, %v820_v48 }
 0x17e   : > { %v739_v32 = vmax.f32 %v723_v62, 0.0  ;;  %v692_v26 = vmul.f32 0.0078125, %v671_v19  ;;  %v975_v60 = vsel %vm961_vm2, %v946_v51, %v947_v50  ;;  %v2774_v62 = vadd.f32 %v2656_v0, %v819_v58 }
 0x17f   : > { %v710_v38 = vmul.f32 %v2757_v49, %v2757_v49  ;;  %v983_v59 = vmul.f32 %v2640_v21, %v975_v60  ;;  %v998_v43 = vadd.f32 %v982_v46, %v929_v29  ;;  %v856_v51 = vrot.slane %v2719_v42, 7 }
 0x180   : > { %v771_v14 = vadd.f32 1e-12, %v739_v32  ;;  %v724_v2 = vsub.f32 %v692_v26, %v708_v9  ;;  %v1821_v45 = vpop.eup %1820  ;;  %v673_v16 = vpop.xlane.xlu0 %672  ;;  %v857_v9 = vrot.slane %v2774_v62, 7 }
 0x181   : > { %v675_v4 = vpop.xlane.xlu1 %674  ;;  %v800_v48 = vmul.f32 %v1821_v45, %v752_v3  ;;  %v693_v54 = vmul.f32 0.0078125, %v673_v16  ;;  %v999_v32 = vadd.f32 %v983_v59, %v930_v12  ;;  %v886_v46 = vsel %vm872_vm1, %v855_v55, %v856_v51 }
 0x182   : > { %1826 = vrsqrt.f32 %v771_v14  ;;  %v740_v6 = vmax.f32 %v724_v2, 0.0  ;;  %v694_v26 = vmul.f32 0.0078125, %v675_v4  ;;  %v895_v13 = vmul.f32 %v2636_v7, %v886_v46 }
 0x183   : > { %v1823_v29 = vpop.eup %1822  ;;  %v822_v58 = vmul.f32 %v2633_v5, %v800_v48  ;;  %v725_v19 = vsub.f32 %v693_v54, %v709_v63  ;;  %v1014_v12 = vpack.c.bf16 %v999_v32, %v998_v43  ;;  %v885_v41 = vsel %vm872_vm1, %v856_v51, %v857_v9 }
 0x184   : > { %v772_v60 = vadd.f32 1e-12, %v740_v6  ;;  %v1825_v20 = vpop.eup %1824  ;;  %v801_v3 = vmul.f32 %v1823_v29, %v753_v56  ;;  %v726_v14 = vsub.f32 %v694_v26, %v710_v38  ;;  %v612_v2 = vpop.xlane.xlu0 %611  ;;  %v3160_v55 = vsub.f32 %v2499_v18, %v2677_v53 }
 0x185   : > { %v614_v45 = vpop.xlane.xlu1 %613  ;;  %v741_v63 = vmax.f32 %v725_v19, 0.0  ;;  %v2795_v16 = vmul.f32 0.0078125, %v612_v2  ;;  %1645 = vmatprep.mubr.bf16.mxu0 %v1014_v12  ;;  %v896_v15 = vmul.f32 %v2636_v7, %v885_v41  ;;  %v916_v6 = vmul.f32 %v2623_v57, %v2774_v62 }
 0x186   : > { %v802_v59 = vmul.f32 %v1825_v20, %v3160_v55  ;;  %1828 = vrsqrt.f32 %v772_v60  ;;  %v742_v4 = vmax.f32 %v726_v14, 0.0  ;;  %v2797_v48 = vmul.f32 0.0078125, %v614_v45 }
 0x187   : > { %v773_v38 = vadd.f32 1e-12, %v741_v63  ;;  %v711_v18 = vmul.f32 %v2795_v16, %v2795_v16  ;;  %v759_v53 = vsub.f32 %v2568_v36, %v2795_v16  ;;  %v931_v26 = vadd.f32 %v915_v39, %v895_v13 }
 0x188   : > { %v2803_v56 = vmul.f32 %v2633_v5, %v802_v59  ;;  %v774_v19 = vadd.f32 1e-12, %v742_v4  ;;  %v712_v43 = vmul.f32 %v2797_v48, %v2797_v48  ;;  %v760_v51 = vsub.f32 %v2571_v37, %v2797_v48  ;;  %v677_v54 = vpop.xlane.xlu0 %676 }
 0x189   : > { %v679_v32 = vpop.xlane.xlu1 %678  ;;  %1830 = vrsqrt.f32 %v773_v38  ;;  %v948_v46 = vrot.slane %v2774_v62, 1  ;;  %v949_v29 = vrot.slane %v2766_v44, 1  ;;  %v932_v60 = vadd.f32 %v916_v6, %v896_v15 }
 0x18a   : > { %1832 = vrsqrt.f32 %v774_v19  ;;  %v695_v20 = vmul.f32 0.0078125, %v677_v54  ;;  %v696_v12 = vmul.f32 0.0078125, %v679_v32  ;;  %v821_v13 = vmul.f32 %v2633_v5, %v2752_v8 }
 0x18b   : > { %v973_v2 = vsel %vm961_vm2, %v948_v46, %v949_v29  ;;  %v974_v45 = vsel %vm961_vm2, %v947_v50, %v948_v46  ;;  %v2826_v62 = vadd.f32 %v2656_v0, %v822_v58  ;;  %v3161_v41 = vsub.f32 %v2520_v24, %v2713_v11 }
 0x18c   : > { %v1827_v14 = vpop.eup %1826  ;;  %v984_v59 = vmul.f32 %v2640_v21, %v974_v45  ;;  %v985_v63 = vmul.f32 %v2640_v21, %v973_v2  ;;  %v727_v4 = vsub.f32 %v695_v20, %v711_v18  ;;  %v728_v15 = vsub.f32 %v696_v12, %v712_v43 }
 0x18d   : > { %v803_v55 = vmul.f32 %v1827_v14, %v3161_v41  ;;  %v843_v42 = vadd.f32 %v2656_v0, %v821_v13  ;;  %v858_v50 = vrot.slane %v2766_v44, 7  ;;  %v917_v8 = vmul.f32 %v2623_v57, %v2766_v44 }
 0x18e   : > { %v1000_v39 = vadd.f32 %v984_v59, %v931_v26  ;;  %v1001_v58 = vadd.f32 %v985_v63, %v932_v60  ;;  %v743_v38 = vmax.f32 %v727_v4, 0.0  ;;  %v951_v19 = vrot.slane %v2826_v62, 1 }
 0x18f   : > { %v744_v11 = vmax.f32 %v728_v15, 0.0  ;;  %v859_v6 = vrot.slane %v843_v42, 7  ;;  %v884_v54 = vsel %vm872_vm1, %v857_v9, %v858_v50  ;;  %v918_v18 = vmul.f32 %v2623_v57, %v843_v42 }
 0x190   : > { %v1829_v24 = vpop.eup %1828  ;;  %v3162_v43 = vsub.f32 %v2523_v25, %v2715_v61  ;;  %v1015_v46 = vpack.c.bf16 %v1001_v58, %v1000_v39  ;;  %v775_v20 = vadd.f32 1e-12, %v743_v38  ;;  %v897_v44 = vmul.f32 %v2636_v7, %v884_v54 }
 0x191   : > { %v776_v26 = vadd.f32 1e-12, %v744_v11  ;;  %v883_v60 = vsel %vm872_vm1, %v858_v50, %v859_v6  ;;  %v950_v12 = vrot.slane %v843_v42, 1  ;;  %v823_v14 = vmul.f32 %v2633_v5, %v801_v3 }
 0x192   : > { %v804_v32 = vmul.f32 %v1829_v24, %v3162_v43  ;;  %1646 = vmatmul.mubr.bf16.vlgmr.msra.gmra.mrb[0].mxu0 %v1015_v46  ;;  %1834 = vrsqrt.f32 %v775_v20  ;;  %v898_v9 = vmul.f32 %v2636_v7, %v883_v60  ;;  %v933_v45 = vadd.f32 %v917_v8, %v897_v44 }
 0x193   : > { %v1831_v25 = vpop.eup %1830  ;;  %1836 = vrsqrt.f32 %v776_v26  ;;  %v971_v61 = vsel %vm961_vm2, %v950_v12, %v951_v19  ;;  %v972_v13 = vsel %vm961_vm2, %v949_v29, %v950_v12  ;;  %v845_v41 = vadd.f32 %v2656_v0, %v823_v14  ;;  %1682 = vmatpush3.bf16.msra.mxu0 %v2496_v17 }
 0x194   : > { %v826_v2 = vmul.f32 %v2633_v5, %v804_v32  ;;  %v1833_v3 = vpop.eup %1832  ;;  %v3163_v59 = vsub.f32 %v2536_v28, %v2730_v1  ;;  %v934_v4 = vadd.f32 %v918_v18, %v898_v9  ;;  %v986_v15 = vmul.f32 %v2640_v21, %v972_v13 }
 0x195   : > { %v987_v42 = vmul.f32 %v2640_v21, %v971_v61  ;;  %v3164_v50 = vmov 0.0   ;;  %v3165_v8 = vsub.f32 %v2548_v31, %v2757_v49  ;;  %v846_v39 = vadd.f32 %v2656_v0, %v2803_v56 }
 0x196   : > { %v805_v63 = vmul.f32 %v1831_v25, %v3163_v59  ;;  %1683 = vmatprep.subr.bf16.mxu0 %v3164_v50  ;;  %v860_v17 = vrot.slane %v2826_v62, 7  ;;  %v861_v58 = vrot.slane %v845_v41, 7  ;;  %v1002_v38 = vadd.f32 %v986_v15, %v933_v45 }
 0x197   : > { %v806_v29 = vmul.f32 %v1833_v3, %v3165_v8  ;;  %v1003_v28 = vadd.f32 %v987_v42, %v934_v4  ;;  %v919_v1 = vmul.f32 %v2623_v57, %v2826_v62  ;;  %v920_v24 = vmul.f32 %v2623_v57, %v845_v41  ;;  %1684 = vmatpush3.bf16.msra.mxu0 %v2511_v22 }
 0x198   : > { %v881_v54 = vsel %vm872_vm1, %v860_v17, %v861_v58  ;;  %v882_v31 = vsel %vm872_vm1, %v859_v6, %v860_v17  ;;  %v952_v49 = vrot.slane %v845_v41, 1  ;;  %v953_v32 = vrot.slane %v846_v39, 1  ;;  %1685 = vmatprep.subr.bf16.mxu0 %v3164_v50 }
 0x199   : > { %v828_v11 = vmul.f32 %v2633_v5, %v806_v29  ;;  %v1016_v56 = vpack.c.bf16 %v1003_v28, %v1002_v38  ;;  %v899_v18 = vmul.f32 %v2636_v7, %v882_v31  ;;  %v900_v43 = vmul.f32 %v2636_v7, %v881_v54 }
 0x19a   : > { %v970_v62 = vsel %vm961_vm2, %v951_v19, %v952_v49  ;;  %v825_v46 = vmul.f32 %v2633_v5, %v803_v55  ;;  %v848_v20 = vadd.f32 %v2656_v0, %v826_v2  ;;  %v862_v44 = vrot.slane %v846_v39, 7 }
 0x19b   : > { %1649 = vmatprep.mubr.bf16.mxu0 %v1016_v56  ;;  %v935_v6 = vadd.f32 %v919_v1, %v899_v18  ;;  %v936_v26 = vadd.f32 %v920_v24, %v900_v43  ;;  %v969_v22 = vsel %vm961_vm2, %v952_v49, %v953_v32  ;;  %v988_v60 = vmul.f32 %v2640_v21, %v970_v62 }
 0x19c   : > { %v989_v12 = vmul.f32 %v2640_v21, %v969_v22  ;;  %1686 = vmatpush3.bf16.msra.mxu0 %v2517_v23  ;;  %v847_v14 = vadd.f32 %v2656_v0, %v825_v46  ;;  %v880_v55 = vsel %vm872_vm1, %v861_v58, %v862_v44  ;;  %v921_v19 = vmul.f32 %v2623_v57, %v846_v39  ;;  %v1835_v2 = vpop.eup %1834 }
 0x19d   : > { %v1004_v9 = vadd.f32 %v988_v60, %v935_v6  ;;  %v901_v45 = vmul.f32 %v2636_v7, %v880_v55  ;;  %v955_v25 = vrot.slane %v848_v20, 1  ;;  %1687 = vmatprep.subr.bf16.mxu0 %v3164_v50  ;;  %v827_v61 = vmul.f32 %v2633_v5, %v805_v63  ;;  %v1837_v13 = vpop.eup %1836 }
 0x19e   : > { %v807_v23 = vmul.f32 %v1835_v2, %v759_v53  ;;  %v1005_v41 = vadd.f32 %v989_v12, %v936_v26  ;;  %v863_v3 = vrot.slane %v847_v14, 7  ;;  %v922_v59 = vmul.f32 %v2623_v57, %v847_v14 }
 0x19f   : > { %v808_v4 = vmul.f32 %v1837_v13, %v760_v51  ;;  %v937_v15 = vadd.f32 %v921_v19, %v901_v45  ;;  %v954_v42 = vrot.slane %v847_v14, 1  ;;  %v849_v8 = vadd.f32 %v2656_v0, %v827_v61 }
 0x1a0   : > { %v829_v29 = vmul.f32 %v2633_v5, %v807_v23  ;;  %v1017_v63 = vpack.c.bf16 %v1005_v41, %v1004_v9  ;;  %v879_v39 = vsel %vm872_vm1, %v862_v44, %v863_v3  ;;  %1688 = vmatpush3.bf16.msra.mxu0 %v2533_v27  ;;  %v850_v36 = vadd.f32 %v2656_v0, %v828_v11 }
 0x1a1   : > { %v830_v16 = vmul.f32 %v2633_v5, %v808_v4  ;;  %v902_v53 = vmul.f32 %v2636_v7, %v879_v39  ;;  %v967_v37 = vsel %vm961_vm2, %v954_v42, %v955_v25  ;;  %v968_v48 = vsel %vm961_vm2, %v953_v32, %v954_v42  ;;  %1689 = vmatprep.subr.bf16.mxu0 %v3164_v50 }
 0x1a2   : > { %1650 = vmatmul.mubr.bf16.gmra.mrb[4].mxu0 %v1017_v63  ;;  %v990_v51 = vmul.f32 %v2640_v21, %v968_v48  ;;  %v991_v17 = vmul.f32 %v2640_v21, %v967_v37  ;;  %v864_v27 = vrot.slane %v848_v20, 7  ;;  %v865_v58 = vrot.slane %v849_v8, 7 }
 0x1a3   : > { %v938_v38 = vadd.f32 %v922_v59, %v902_v53  ;;  %v923_v5 = vmul.f32 %v2623_v57, %v848_v20  ;;  %v924_v28 = vmul.f32 %v2623_v57, %v849_v8  ;;  %v956_v1 = vrot.slane %v849_v8, 1 }
 0x1a4   : > { %v1006_v24 = vadd.f32 %v990_v51, %v937_v15  ;;  %v877_v11 = vsel %vm872_vm1, %v864_v27, %v865_v58  ;;  %v878_v54 = vsel %vm872_vm1, %v863_v3, %v864_v27  ;;  %v957_v31 = vrot.slane %v850_v36, 1  ;;  %1690 = vmatpush3.bf16.msra.mxu0 %v2545_v30 }
 0x1a5   : > { %v1007_v49 = vadd.f32 %v991_v17, %v938_v38  ;;  %v903_v56 = vmul.f32 %v2636_v7, %v878_v54  ;;  %v904_v18 = vmul.f32 %v2636_v7, %v877_v11  ;;  %v966_v43 = vsel %vm961_vm2, %v955_v25, %v956_v1  ;;  %1691 = vmatprep.subr.bf16.mxu0 %v3164_v50 }
 0x1a6   : > { %v965_v32 = vsel %vm961_vm2, %v956_v1, %v957_v31  ;;  %v992_v62 = vmul.f32 %v2640_v21, %v966_v43  ;;  %v851_v46 = vadd.f32 %v2656_v0, %v829_v29  ;;  %v852_v20 = vadd.f32 %v2656_v0, %v830_v16 }
 0x1a7   : > { %v1018_v30 = vpack.c.bf16 %v1007_v49, %v1006_v24  ;;  %v939_v44 = vadd.f32 %v923_v5, %v903_v56  ;;  %v940_v6 = vadd.f32 %v924_v28, %v904_v18  ;;  %v993_v26 = vmul.f32 %v2640_v21, %v965_v32  ;;  %v1307_v24 = vld [vmem:[%s2422_s7] sm:$0xff]  ;;  %v1175_v18 = vld [vmem:[%s2422_s7 + $0x10] sm:$0xff] }
 0x1a8   : > { %1692 = vmatpush3.bf16.msra.mxu0 %v2559_v34  ;;  %v866_v22 = vrot.slane %v850_v36, 7  ;;  %v867_v60 = vrot.slane %v851_v46, 7  ;;  %v925_v12 = vmul.f32 %v2623_v57, %v850_v36  ;;  %v926_v14 = vmul.f32 %v2623_v57, %v851_v46 }
 0x1a9   : > { %1653 = vmatprep.mubr.bf16.mxu0 %v1018_v30  ;;  %v1008_v55 = vadd.f32 %v992_v62, %v939_v44  ;;  %v1009_v19 = vadd.f32 %v993_v26, %v940_v6  ;;  %v958_v2 = vrot.slane %v851_v46, 1  ;;  %v959_v9 = vrot.slane %v852_v20, 1  ;;  %1693 = vmatprep.subr.bf16.mxu0 %v3164_v50  ;;  %v1176_v46 = vld [vmem:[%s2422_s7 + $0x18] sm:$0xff]  ;;  %v1174_v6 = vld [vmem:[%s2422_s7 + $0x8] sm:$0xff] }
 0x1aa   : > { %v875_v0 = vsel %vm872_vm1, %v866_v22, %v867_v60  ;;  %v876_v45 = vsel %vm872_vm1, %v865_v58, %v866_v22  ;;  %v868_v34 = vrot.slane %v852_v20, 7  ;;  %v927_v25 = vmul.f32 %v2623_v57, %v852_v20 }
 0x1ab   : > { %v1019_v61 = vpack.c.bf16 %v1009_v19, %v1008_v55  ;;  %v905_v13 = vmul.f32 %v2636_v7, %v876_v45  ;;  %v906_v23 = vmul.f32 %v2636_v7, %v875_v0  ;;  %v963_v41 = vsel %vm961_vm2, %v958_v2, %v959_v9  ;;  %v1180_v45 = vld [vmem:[%s2422_s7 + $0x38] sm:$0xff] }
 0x1ac   : > { %v964_v3 = vsel %vm961_vm2, %v957_v31, %v958_v2  ;;  %v995_v59 = vmul.f32 %v2640_v21, %v963_v41  ;;  %v3166_v4 = vrot.slane %v2704_v47, 7  ;;  %v874_v42 = vsel %vm872_vm1, %v867_v60, %v868_v34  ;;  %1694 = vmatpush3.bf16.msra.mxu0 %v2565_v35  ;;  %v1177_v2 = vld [vmem:[%s2422_s7 + $0x20] sm:$0xff] }
 0x1ad   : > { %1654 = vmatmul.mubr.bf16.gmra.mrb[8].mxu0 %v1019_v61  ;;  %v941_v8 = vadd.f32 %v925_v12, %v905_v13  ;;  %v942_v29 = vadd.f32 %v926_v14, %v906_v23  ;;  %v994_v63 = vmul.f32 %v2640_v21, %v964_v3  ;;  %v907_v39 = vmul.f32 %v2636_v7, %v874_v42  ;;  %v1179_v14 = vld [vmem:[%s2422_s7 + $0x30] sm:$0xff]  ;;  %v1178_v13 = vld [vmem:[%s2422_s7 + $0x28] sm:$0xff] }
 0x1ae   : > { %v873_v15 = vsel %vm872_vm1, %v868_v34, %v3166_v4  ;;  %v928_v16 = vmul.f32 %v2623_v57, %v2704_v47  ;;  %v960_v53 = vrot.slane %v2704_v47, 1  ;;  %1695 = vmatprep.subr.bf16.mxu0 %v3164_v50  ;;  %v3167_v27 = vrot.slane %v2675_v52, 1 }
 0x1af   : > { %v908_v36 = vmul.f32 %v2636_v7, %v873_v15  ;;  %v1010_v37 = vadd.f32 %v994_v63, %v941_v8  ;;  %v1011_v48 = vadd.f32 %v995_v59, %v942_v29  ;;  %v943_v51 = vadd.f32 %v927_v25, %v907_v39  ;;  %v1183_v15 = vld [vmem:[%s2422_s7 + $0x50] sm:$0xff]  ;;  %v1181_v29 = vld [vmem:[%s2422_s7 + $0x40] sm:$0xff] }
 0x1b0   : > { %v962_v17 = vsel %vm961_vm2, %v959_v9, %v960_v53  ;;  %v977_v58 = vsel %vm961_vm2, %v960_v53, %v3167_v27  ;;  %v1311_v57 = vsel %vm961_vm2, %v960_v53, %v2647_v33  ;;  %1696 = vmatpush3.bf16.msra.mxu0 %v2583_v40  ;;  %v2984_v33 = vld [vmem:[%s3101_s8] ss:$0 sm:$0xff] }
 0x1b1   : > { %v944_v35 = vadd.f32 %v928_v16, %v908_v36  ;;  %v1020_v7 = vpack.c.bf16 %v1011_v48, %v1010_v37  ;;  %v996_v47 = vmul.f32 %v2640_v21, %v962_v17  ;;  %v997_v38 = vmul.f32 %v2640_v21, %v977_v58  ;;  %v1184_v36 = vld [vmem:[%s2422_s7 + $0x58] sm:$0xff]  ;;  %v1182_v48 = vld [vmem:[%s2422_s7 + $0x48] sm:$0xff] }
 0x1b2   : > { %v1312_v5 = vmul.f32 %v1311_v57, %v2640_v21  ;;  %v1187_v57 = vld [vmem:[%s2422_s7 + $0x70] sm:$0xff] }
 0x1b3   : > { %1657 = vmatprep.mubr.bf16.mxu0 %v1020_v7  ;;  %v1012_v28 = vadd.f32 %v996_v47, %v943_v51  ;;  %v1013_v52 = vadd.f32 %v997_v38, %v944_v35  ;;  %v1185_v38 = vld [vmem:[%s2422_s7 + $0x60] sm:$0xff] }
 0x1b4   : > { %v1313_v10 = vadd.f32 %v1312_v5, %v944_v35 }
 0x1b5   : > { %v1021_v1 = vpack.c.bf16 %v1013_v52, %v1012_v28 }
 0x1b6   : > { %v1314_v40 = vpack.c.bf16 %v1313_v10, %v1313_v10  ;;  %v1186_v10 = vld [vmem:[%s2422_s7 + $0x68] sm:$0xff] }
 0x1b7   : > { %1658 = vmatmul.mubr.bf16.gmra.mrb[12].mxu0 %v1021_v1 }
 0x1b8   : > { %1697 = vmatprep.mubr.msk.bf16.mxu0 %vm2096_vm0, %v3164_v50 }
 0x1bf   : > { %1698 = vmatmul.mubr.bf16.vlgmr.msra.gmra.mrb[16].mxu0 %v1314_v40 }
 0x24e   : > { %v1301_v21 = vpop.f32.mrb[0].mxu1 }
 0x24f   : > { %v1302_v11 = vadd.f32 %v2984_v33, %v1301_v21  ;;  %v1679_v54 = vpop.f32.mrb[1].mxu1 }
 0x250   : > { %v1304_v31 = vpop.f32.mrb[2].mxu1 }
 0x251   : > { %v1308_v49 = vmul.f32 %v1307_v24, %v1302_v11  ;;  %v1680_v56 = vpop.f32.mrb[3].mxu1  ;;  %v1188_v11 = vld [vmem:[%s2422_s7 + $0x78] sm:$0xff]  ;;  %s1359_s7 = scalar_lea.sflag [#allocation4], %s2415_s20 }
 0x253   : > { %1309 = vst [vmem:[%s2989_s25] sm:$0xff] %v1308_v49 }
 0x265   : > { %v1647_v50 = vpop.f32.mrb[0].mxu0 }
 0x266   : > { %v1119_v43 = vadd.f32 %v1647_v50, %v2984_v33  ;;  %v1110_v32 = vpop.f32.mrb[1].mxu0 }
 0x267   : > { %v1648_v62 = vpop.f32.mrb[2].mxu0 }
 0x268   : > { %v1191_v20 = vmul.f32 %v1175_v18, %v1119_v43  ;;  %v1122_v30 = vadd.f32 %v1648_v62, %v2984_v33  ;;  %v1113_v44 = vpop.f32.mrb[3].mxu0 }
 0x269   : > { %v1114_v26 = vadd.f32 %v2984_v33, %v1113_v44 }
 0x26a   : > { %1207 = vst [vmem:[%s2989_s25 + $0x10] sm:$0xff] %v1191_v20  ;;  %v1192_v22 = vmul.f32 %v1176_v46, %v1122_v30 }
 0x26b   : > { %v1190_v60 = vmul.f32 %v1174_v6, %v1114_v26 }
 0x26c   : > { %1208 = vst [vmem:[%s2989_s25 + $0x18] sm:$0xff] %v1192_v22 }
 0x26d   : > { %1206 = vst [vmem:[%s2989_s25 + $0x8] sm:$0xff] %v1190_v60 }
 0x275   : > { %v1651_v12 = vpop.f32.mrb[4].mxu0 }
 0x276   : > { %v1135_v55 = vadd.f32 %v1651_v12, %v2984_v33  ;;  %v1126_v19 = vpop.f32.mrb[5].mxu0 }
 0x277   : > { %v1127_v9 = vadd.f32 %v2984_v33, %v1126_v19  ;;  %v1652_v0 = vpop.f32.mrb[6].mxu0 }
 0x278   : > { %v1195_v34 = vmul.f32 %v1179_v14, %v1135_v55  ;;  %v1138_v25 = vadd.f32 %v1652_v0, %v2984_v33  ;;  %v1129_v61 = vpop.f32.mrb[7].mxu0 }
 0x279   : > { %v1193_v23 = vmul.f32 %v1177_v2, %v1127_v9  ;;  %v1130_v41 = vadd.f32 %v2984_v33, %v1129_v61 }
 0x27a   : > { %1211 = vst [vmem:[%s2989_s25 + $0x30] sm:$0xff] %v1195_v34  ;;  %v1196_v3 = vmul.f32 %v1180_v45, %v1138_v25 }
 0x27b   : > { %1209 = vst [vmem:[%s2989_s25 + $0x20] sm:$0xff] %v1193_v23  ;;  %v1194_v59 = vmul.f32 %v1178_v13, %v1130_v41 }
 0x27c   : > { %1212 = vst [vmem:[%s2989_s25 + $0x38] sm:$0xff] %v1196_v3 }
 0x27d   : > { %1210 = vst [vmem:[%s2989_s25 + $0x28] sm:$0xff] %v1194_v59 }
 0x280   : > { %v1655_v4 = vpop.f32.mrb[8].mxu0 }
 0x281   : > { %v1151_v42 = vadd.f32 %v1655_v4, %v2984_v33  ;;  %v1142_v8 = vpop.f32.mrb[9].mxu0 }
 0x282   : > { %v1143_v63 = vadd.f32 %v2984_v33, %v1142_v8  ;;  %v1656_v39 = vpop.f32.mrb[10].mxu0 }
 0x283   : > { %v1199_v16 = vmul.f32 %v1183_v15, %v1151_v42  ;;  %v1154_v53 = vadd.f32 %v1656_v39, %v2984_v33  ;;  %v1145_v37 = vpop.f32.mrb[11].mxu0 }
 0x284   : > { %v1197_v51 = vmul.f32 %v1181_v29, %v1143_v63  ;;  %v1146_v35 = vadd.f32 %v2984_v33, %v1145_v37 }
 0x285   : > { %1215 = vst [vmem:[%s2989_s25 + $0x50] sm:$0xff] %v1199_v16  ;;  %v1200_v17 = vmul.f32 %v1184_v36, %v1154_v53 }
 0x286   : > { %1213 = vst [vmem:[%s2989_s25 + $0x40] sm:$0xff] %v1197_v51  ;;  %v1198_v27 = vmul.f32 %v1182_v48, %v1146_v35 }
 0x287   : > { %1216 = vst [vmem:[%s2989_s25 + $0x58] sm:$0xff] %v1200_v17 }
 0x288   : > { %1214 = vst [vmem:[%s2989_s25 + $0x48] sm:$0xff] %v1198_v27 }
 0x28a   : > { %v1659_v58 = vpop.f32.mrb[12].mxu0 }
 0x28b   : > { %v1167_v7 = vadd.f32 %v1659_v58, %v2984_v33  ;;  %v1158_v47 = vpop.f32.mrb[13].mxu0 }
 0x28c   : > { %v1159_v5 = vadd.f32 %v2984_v33, %v1158_v47  ;;  %v1660_v28 = vpop.f32.mrb[14].mxu0 }
 0x28d   : > { %v1203_v52 = vmul.f32 %v1187_v57, %v1167_v7  ;;  %v1161_v1 = vpop.f32.mrb[15].mxu0 }
 0x28e   : > { %v1201_v40 = vmul.f32 %v1185_v38, %v1159_v5  ;;  %v1162_v21 = vadd.f32 %v2984_v33, %v1161_v1 }
 0x28f   : > { %1219 = vst [vmem:[%s2989_s25 + $0x70] sm:$0xff] %v1203_v52 }
 0x290   : > { %1217 = vst [vmem:[%s2989_s25 + $0x60] sm:$0xff] %v1201_v40  ;;  %v1202_v24 = vmul.f32 %v1186_v10, %v1162_v21 }
 0x292   : > { %1218 = vst [vmem:[%s2989_s25 + $0x68] sm:$0xff] %v1202_v24  ;;  %v1349_v54 = vpop.f32.mrb[16].mxu0 }
 0x293   : > { %v1350_v31 = vadd.f32 %v2984_v33, %v1349_v54  ;;  %v1699_v49 = vpop.f32.mrb[17].mxu0 }
 0x294   : > { %v1352_v56 = vpop.f32.mrb[18].mxu0 }
 0x295   : > { %v1356_v50 = vmul.f32 %v1350_v31, %v1188_v11  ;;  %v1700_v18 = vpop.f32.mrb[19].mxu0 }
 0x297   : > { %1357 = vst [vmem:[%s2989_s25 + $0x78] sm:$0xff] %v1356_v50 }
 0x298   : > { %2002 = shalt.err (!%p1999_p3)
}
 0x299   : > { %s2003_s15 = scalar_lea.hbm %s3041_s27, 2048  ;;  %s2007_s30 = scalar_lea.hbm %s3170_s24, 4096 }
 0x29a   : > { %p2004_p4 = scmp.ne.s32.totalorder %s3041_s27, %s2003_s15  ;;  %p2008_p12 = scmp.lt.u32.totalorder %s3041_s27, %s3170_s24 }
 0x29b   : > { %p2009_p8 = scmp.lt.u32.totalorder %s2007_s30, %s2003_s15  ;;  %p2011_p10 = scmp.lt.u32.totalorder %s2003_s15, %s3041_s27 }
 0x29c   : > { %p2005_p6 = pnand %p2004_p4, %p3171_p13 }
 0x29d   : > { %p2010_p2 = por %p2009_p8, %p2008_p12 }
 0x29e   : > { %p2006_p0 = pneg %p2005_p6 }
 0x29f   : > { %p2012_p5 = por %p2011_p10, %p2010_p2 }
 0x2a1   : > { %p2013_p11 = pnand %p2012_p5, %p2006_p0 }
 0x2a3   : > { %2016 = shalt.err (!%p2013_p11)
}
 0x2a4   : > { %s2098_s23 = smov 128   ;;  %s2099_s18 = smov 8  }
 0x2a5   : > { %1713 = dma.vmem_to_hbm [thread:$0]  (%p3171_p13), %s3043_s29, 2048, %s3041_s27, %s1359_s7, %s2098_s23, %s2098_s23, %s2099_s18  }
 0x2a6 PF: > { %s3172_s25 = sld [smem:[#allocation17_spill]]  ;;  %s3173_s9 = sld [smem:[#allocation22_spill]] }
 0x2a7   : > { %p3175_p7 = scmp.ge.s32.totalorder %s2083_s14, 2 }
 0x2ac   : > { %s1389_s13 = sand.u32 1, %s3172_s25   ;;  %p3174_p1 = scmp.ne.s32.totalorder %s3173_s9, 0 }
 0x2ad   : > { %s1390_s0 = scalar_lea.sflag [#allocation4], %s1389_s13 }
 0x2ae   : > { %p1733_p9 = pnand %p3175_p7, %p3174_p1 }
 0x2b0   : > { %2058 = dma.done.wait (!%p1733_p9), %s1390_s0, 2048  }
 0x2b1   : > { %2060 = vsyncadd (!%p1733_p9), %s1390_s0, 4294965248  ;;  %s31_s14 = sadd.s32 1, %s2083_s14   ;;  %s3176_s28 = sld [smem:[#allocation18_spill]] }
 0x2b2   : > { %p28_p3 = scmp.ge.s32.totalorder %s31_s14, 4   ;;  %s3177_s11 = sld [smem:[#allocation24_spill]] }
 0x2b3   : > { %s3178_s12 = sld [smem:[#allocation20_spill]]  ;;  %s3179_s13 = sld [smem:[#allocation23_spill]] }
 0x2b4   : > { %s3180_s30 = smov %s2067_s10  ;;  %30 = sbr.rel (!%p28_p3) target bundleno = 15 (0xf), region = 142 }
 0x2b7   : > { %s3181_s10 = smov %s3176_s28 }
 0x2bb   :  { %1395 = vsyncpa [#allocation3], 1 }
 0x2bc   :  { %1397 = vsyncpa [#allocation3 + $0x1], 1 }
 0x2bd   :  { %1398 = vsyncpa [#allocation6], 1 }
 0x2be   :  { %1400 = vsyncpa [#allocation6 + $0x1], 1 }
 0x2bf   :  { %1401 = vsyncpa [#allocation9], 1 }
 0x2c0   :  { %1403 = vsyncpa [#allocation9 + $0x1], 1 }
 0x2c1   :  { %1404 = vsyncpa [#allocation4], 1 }
 0x2c2   :  { %1406 = vsyncpa [#allocation4 + $0x1], 1 }

// kernel: tpu_custom_call.1
= control target key start
LH: loop header
LB: loop body
LE: loop exit
PB: predicated region body
PF: predicated region fallthrough
CT: control target
= control target key end

     0   :  { %s3093_s0 = inlined_call_operand.hbm [shape: f32[2,128,256], index: 0, kind: input, shape index: {}]   ;;  %s3094_s1 = inlined_call_operand.hbm [shape: f32[2,128,256], index: 1, kind: input, shape index: {}]   ;;  %s3095_s2 = inlined_call_operand.hbm [shape: f32[2,128,256], index: 2, kind: input, shape index: {}]   ;;  %s3096_s3 = inlined_call_operand.hbm [shape: f32[2,128,256], index: 3, kind: input, shape index: {}]   ;;  %s3097_s4 = inlined_call_operand.vmem [shape: f32[1,128], index: 4, kind: input, shape index: {}]   ;;  %s3098_s5 = inlined_call_operand.vmem [shape: f32[1,128], index: 5, kind: input, shape index: {}]   ;;  %s3099_s6 = inlined_call_operand.vmem [shape: f32[3,128], index: 6, kind: input, shape index: {}]   ;;  %s3100_s7 = inlined_call_operand.hbm [shape: bf16[128,128], index: 7, kind: input, shape index: {}]   ;;  %s3101_s8 = inlined_call_operand.vmem [shape: f32[1,128], index: 8, kind: input, shape index: {}]   ;;  %s3102_s9 = inlined_call_operand.hbm [shape: f32[2,128,128], index: 9, kind: output, shape index: {}]  }
   0x1   :  { %3124 = sst [smem:[#allocation25_spill]] %s3093_s0 }
   0x2   :  { %3125 = sst [smem:[#allocation26_spill]] %s3094_s1 }
   0x3   :  { %3126 = sst [smem:[#allocation27_spill]] %s3100_s7 }
   0x4   :  { %3127 = sst [smem:[#allocation28_spill]] %s3102_s9 }
   0x5   :  { %14 = vsyncpa [#allocation3], 0 }
   0x6   :  { %16 = vsyncpa [#allocation3 + $0x1], 0 }
   0x7   :  { %17 = vsyncpa [#allocation6], 0 }
   0x8   :  { %19 = vsyncpa [#allocation6 + $0x1], 0 }
   0x9   :  { %20 = vsyncpa [#allocation9], 0 }
   0xa   :  { %22 = vsyncpa [#allocation9 + $0x1], 0 }
   0xb   :  { %23 = vsyncpa [#allocation4], 0 }
   0xc   :  { %25 = vsyncpa [#allocation4 + $0x1], 0  ;;  %s2150_s30 = smov 0   ;;  %s2152_s10 = smov 0  }
   0xd   :  { %s2154_s11 = smov 0   ;;  %s2156_s12 = smov 0  }
   0xe   :  { %s2158_s13 = smov 0   ;;  %s2160_s14 = smov 0  }
   0xf LB: > { %3128 = sst [smem:[#allocation17_spill]] %s2063_s30  ;;  %s2181_s15 = sadd.s32 4294967295, %s2083_s14   ;;  %s2083_s14 = sphi %s2160_s14, %s31_s14   ;;  %s2079_s13 = sphi %s2158_s13, %s3179_s13   ;;  %s2075_s12 = sphi %s2156_s12, %s3178_s12   ;;  %s2071_s11 = sphi %s2154_s11, %s3177_s11   ;;  %s2067_s10 = sphi %s2152_s10, %s3181_s10   ;;  %s2063_s30 = sphi %s2150_s30, %s3180_s30  }
  0x10   : > { %3129 = sst [smem:[#allocation18_spill]] %s2071_s11  ;;  %s1549_s16 = sadd.s32 4294967294, %s2083_s14  }
  0x11   : > { %3130 = sst [smem:[#allocation19_spill]] %s2075_s12  ;;  %p59_p0 = scmp.ne.s32.totalorder %s2071_s11, %s2067_s10 }
  0x12   : > { %3131 = sst [smem:[#allocation20_spill]] %s2079_s13  ;;  %p60_p1 = scmp.eq.s32.totalorder %s2083_s14, 0 }
  0x13   : > { %p65_p2 = scmp.ne.s32.totalorder %s2067_s10, %s2063_s30  ;;  %p3106_p3 = scmp.eq.s32.totalorder %s2181_s15, 0 }
  0x14   : > { %p296_p4 = scmp.eq.s32.totalorder %s2181_s15, 1  ;;  %p2192_p5 = por %p60_p1, %p59_p0 }
  0x15   : > { %p302_p6 = scmp.eq.s32.totalorder %s1549_s16, 1  ;;  %p2198_p7 = por %p3106_p3, %p65_p2 }
  0x16   : > { %p2202_p8 = por %p296_p4, %p59_p0  ;;  %p1550_p10 = scmp.ge.s32.totalorder %s2083_s14, 1 }
  0x17   : > { %s3133_s19 = scalar_select %p2198_p7, 1, 0 }
  0x18   : > { %s3134_s20 = scalar_select %p2202_p8, 1, 0 }
  0x19   : > { %p2206_p9 = por %p302_p6, %p65_p2  ;;  %p309_p11 = scmp.lt.s32.totalorder %s2083_s14, 3 }
  0x1a   : > { %3135 = sst [smem:[#allocation21_spill]] %s3134_s20  ;;  %s2085_s23 = smov [#allocation10]  }
  0x1b   : > { %s3136_s21 = scalar_select %p2206_p9, 1, 0 }
  0x1c   : > { %p2212_p12 = pnand %p1550_p10, %p309_p11  ;;  %s330_s24 = sshll.u32 %s2085_s23, 4  ;;  %s2216_s24 = int_to_ptr.vmem [resolvable:$true] %s330_s24 }
  0x1d   : > { %3137 = sst [smem:[#allocation22_spill]] %s3136_s21  ;;  %p1737_p1 = scmp.lt.s32.totalorder %s2083_s14, 2 }
  0x1e   : > { %s3138_s22 = scalar_select %p2212_p12, 1, 0 }
  0x1f   : > { %p1715_p13 = pneg %p2212_p12  ;;  %p2230_p4 = pnand %p1737_p1, %p2192_p5 }
  0x20   : > { %s43_s27 = sadd.s32 1, %s2079_s13  ;;  %s3142_s7 = sld [smem:[#allocation27_spill]] }
  0x21   : > { %p2224_p2 = pnand %p1715_p13, %p3106_p3  ;;  %p2235_p6 = scmp.ge.s32.totalorder %s43_s27, 2 }
  0x22   : > { %s3140_s26 = scalar_select %p2230_p4, 1, 0 }
  0x23   : > { %s3141_s28 = scalar_select %p2235_p6, 1, 0 }
  0x24   : > { %p1840_p11 = pneg %p2224_p2 }
  0x26   : > { %s1838_s23 = scalar_lea.hbm %s3142_s7, 1024 }
  0x27   : > { %p1839_p10 = scmp.ne.s32.totalorder %s3142_s7, %s1838_s23  ;;  %p1845_p1 = scmp.lt.u32.totalorder %s1838_s23, %s3142_s7 }
  0x29   : > { %p1841_p13 = pnand %p1840_p11, %p1839_p10 }
  0x2b   : > { %p1842_p5 = pneg %p1841_p13 }
  0x2d   : > { %p1847_p0 = pnand %p1845_p1, %p1842_p5 }
  0x2f   : > { %1850 = shalt.err (!%p1847_p0)
}
  0x30   : > { %s1851_s9 = scalar_lea.vmem %s2216_s24, 1024  ;;  %p1859_p7 = scmp.lt.s32.totalorder %s2216_s24, %s2216_s24 }
  0x31   : > { %p1852_p3 = scmp.ne.s32.totalorder %s2216_s24, %s1851_s9  ;;  %p1860_p12 = scmp.lt.s32.totalorder %s1851_s9, %s1851_s9 }
  0x33   : > { %p1854_p9 = pnand %p1852_p3, %p1840_p11  ;;  %p1861_p4 = por %p1860_p12, %p1859_p7 }
  0x35   : > { %p1855_p8 = pneg %p1854_p9 }
  0x37   : > { %p1862_p6 = pnand %p1861_p4, %p1855_p8 }
  0x39   : > { %1865 = shalt.err (!%p1862_p6)
}
  0x3a   : > { %s2086_s17 = smov 64   ;;  %s2087_s30 = smov 4  }
  0x3b   : > { %1718 = dma.hbm_to_vmem [thread:$0]  (!%p2224_p2), %s3142_s7, 1024, %s2216_s24, [#allocation9], %s2086_s17, %s2086_s17, %s2087_s30  }
  0x3c   : > { %s2261_s9 = sand.u32 1, %s2071_s11   ;;  %p3143_p3 = scmp.ne.s32.totalorder %s3141_s28, 0 }
  0x3d   : > { %s3113_s16 = sshll.u32 %s2261_s9, 7  ;;  %s2269_s23 = sshll.u32 %s2079_s13, 12 }
  0x3e   : > { %s3183_s27 = smov (%p3143_p3, %s43_s27), 0  ;;  %s3115_s25 = sand.u32 1, %s2083_s14  }
  0x3f   : > { %3144 = sst [smem:[#allocation23_spill]] %s3183_s27  ;;  %s47_s18 = ssub.s32 %s2079_s13, %s3183_s27 }
  0x40   : > { %p50_p7 = scmp.eq.s32.totalorder %s47_s18, 0  ;;  %s3145_s20 = sadd.s32 1, %s2071_s11 }
  0x41   : > { %s3147_s1 = sld [smem:[#allocation26_spill]]  ;;  %s375_s30 = scalar_lea.vmem [#allocation5], %s3113_s16 }
  0x42   : > { %s2277_s12 = scalar_select %p50_p7, %s2071_s11, %s3145_s20  }
  0x43   : > { %s386_s21 = sshll.u32 %s375_s30, 4  ;;  %s2291_s18 = scalar_lea.sflag [#allocation6], %s3115_s25  ;;  %s2287_s21 = int_to_ptr.vmem [resolvable:$true] %s386_s21 }
  0x44   : > { %3146 = sst [smem:[#allocation24_spill]] %s2277_s12  ;;  %p3148_p9 = scmp.ne.s32.totalorder %s3140_s26, 0 }
  0x46   : > { %p2296_p12 = pneg %p3148_p9 }
  0x47   : > { %s1422_s28 = scalar_lea.hbm %s3147_s1, %s2269_s23  ;;  %s1871_s30 = scalar_lea.hbm %s3147_s1, 8192 }
  0x48   : > { %s2285_s29 = scalar_lea.hbm %s1422_s28, 128  ;;  %s1896_s7 = scalar_lea.hbm %s1422_s28, 2176 }
  0x49   : > { %p1867_p8 = scmp.ne.s32.totalorder %s2285_s29, %s1896_s7  ;;  %p1872_p4 = scmp.lt.u32.totalorder %s2285_s29, %s3147_s1 }
  0x4a   : > { %p1873_p6 = scmp.lt.u32.totalorder %s1871_s30, %s1896_s7  ;;  %p1875_p11 = scmp.lt.u32.totalorder %s1896_s7, %s2285_s29 }
  0x4b   : > { %p1869_p0 = pnand %p2296_p12, %p1867_p8 }
  0x4c   : > { %p1874_p10 = por %p1873_p6, %p1872_p4 }
  0x4d   : > { %p1870_p2 = pneg %p1869_p0 }
  0x4e   : > { %p1876_p13 = por %p1875_p11, %p1874_p10 }
  0x50   : > { %p1877_p5 = pnand %p1876_p13, %p1870_p2 }
  0x52   : > { %1880 = shalt.err (!%p1877_p5)
}
  0x53   : > { %s1881_s28 = scalar_lea.vmem %s2287_s21, 2048  ;;  %s2088_s24 = smov [#allocation5]  }
  0x54   : > { %p1882_p1 = scmp.ne.s32.totalorder %s2287_s21, %s1881_s28  ;;  %s1886_s17 = sshll.u32 %s2088_s24, 4  ;;  %s1887_s17 = int_to_ptr.vmem [resolvable:$false] %s1886_s17 }
  0x55   : > { %s1888_s27 = scalar_lea.vmem %s1887_s17, 4096  ;;  %p1889_p8 = scmp.lt.s32.totalorder %s2287_s21, %s1887_s17 }
  0x56   : > { %p1884_p3 = pnand %p1882_p1, %p2296_p12  ;;  %p1890_p0 = scmp.lt.s32.totalorder %s1888_s27, %s1881_s28 }
  0x58   : > { %p1885_p7 = pneg %p1884_p3  ;;  %p1891_p4 = por %p1890_p0, %p1889_p8 }
  0x5a   : > { %p1892_p6 = pnand %p1891_p4, %p1885_p7 }
  0x5c   : > { %1895 = shalt.err (!%p1892_p6)
}
  0x5d   : > { %s3118_s7 = smov 256   ;;  %s2090_s16 = smov 128  }
  0x5e   : > { %s2091_s30 = smov 8   ;;  %s3150_s0 = sld [smem:[#allocation25_spill]] }
  0x5f   : > { %1725 = dma.hbm_to_vmem [thread:$0]  (!%p3148_p9), %s2285_s29, 2048, %s2287_s21, %s2291_s18, %s3118_s7, %s2090_s16, %s2091_s30  }
  0x60   : > { %s3151_s27 = sshll.u32 %s2261_s9, 7  ;;  %s1559_s13 = sshll.u32 %s2261_s9, 3 }
  0x61   : > { %s351_s25 = scalar_lea.vmem [#allocation2], %s3151_s27  ;;  %s348_s12 = scalar_lea.sflag [#allocation3], %s2261_s9 }
  0x62   : > { %s361_s1 = sshll.u32 %s351_s25, 4  ;;  %s2331_s1 = int_to_ptr.vmem [resolvable:$true] %s361_s1 }
  0x64   : > { %s2327_s17 = scalar_lea.hbm %s3150_s0, %s2269_s23  ;;  %s1902_s28 = scalar_lea.hbm %s3150_s0, 8192 }
  0x65   : > { %s1897_s11 = scalar_lea.hbm %s2327_s17, 2048  ;;  %p1903_p13 = scmp.lt.u32.totalorder %s2327_s17, %s3150_s0 }
  0x66   : > { %p1898_p2 = scmp.ne.s32.totalorder %s2327_s17, %s1897_s11  ;;  %p1904_p5 = scmp.lt.u32.totalorder %s1902_s28, %s1897_s11 }
  0x67   : > { %p1906_p3 = scmp.lt.u32.totalorder %s1897_s11, %s2327_s17 }
  0x68   : > { %p1900_p10 = pnand %p1898_p2, %p2296_p12  ;;  %p1905_p1 = por %p1904_p5, %p1903_p13 }
  0x6a   : > { %p1901_p11 = pneg %p1900_p10  ;;  %p1907_p7 = por %p1906_p3, %p1905_p1 }
  0x6c   : > { %p1908_p8 = pnand %p1907_p7, %p1901_p11 }
  0x6e   : > { %1911 = shalt.err (!%p1908_p8)
}
  0x6f   : > { %s1912_s25 = scalar_lea.vmem %s2331_s1, 2048  ;;  %s2092_s27 = smov [#allocation2]  }
  0x70   : > { %p1913_p0 = scmp.ne.s32.totalorder %s2331_s1, %s1912_s25  ;;  %s1917_s21 = sshll.u32 %s2092_s27, 4  ;;  %s1918_s21 = int_to_ptr.vmem [resolvable:$false] %s1917_s21 }
  0x71   : > { %s1919_s7 = scalar_lea.vmem %s1918_s21, 4096  ;;  %p1920_p2 = scmp.lt.s32.totalorder %s2331_s1, %s1918_s21 }
  0x72   : > { %p1915_p4 = pnand %p1913_p0, %p2296_p12  ;;  %p1921_p10 = scmp.lt.s32.totalorder %s1919_s7, %s1912_s25 }
  0x74   : > { %p1916_p6 = pneg %p1915_p4  ;;  %p1922_p13 = por %p1921_p10, %p1920_p2 }
  0x76   : > { %p1923_p5 = pnand %p1922_p13, %p1916_p6 }
  0x78   : > { %1926 = shalt.err (!%p1923_p5)
}
  0x79   : > { %s3152_s11 = smov 256   ;;  %s1431_s24 = scalar_lea.hbm %s3095_s2, %s2269_s23 }
  0x7a   : > { %1722 = dma.hbm_to_vmem [thread:$0]  (!%p3148_p9), %s2327_s17, 2048, %s2331_s1, %s348_s12, %s3152_s11, %s2090_s16, %s2091_s30  }
  0x7b   : > { %s2365_s25 = scalar_lea.hbm %s1431_s24, 128  ;;  %s400_s27 = scalar_lea.vmem [#allocation7], %s1559_s13 }
  0x7c   : > { %s415_s21 = sshll.u32 %s400_s27, 4  ;;  %s1957_s7 = scalar_lea.hbm %s1431_s24, 256  ;;  %s416_s21 = int_to_ptr.vmem [resolvable:$true] %s415_s21 }
  0x7d   : > { %p1928_p11 = scmp.ne.s32.totalorder %s2365_s25, %s1957_s7  ;;  %s1932_s12 = scalar_lea.hbm %s3095_s2, 8192 }
  0x7e   : > { %p1933_p7 = scmp.lt.u32.totalorder %s2365_s25, %s3095_s2  ;;  %p1934_p8 = scmp.lt.u32.totalorder %s1932_s12, %s1957_s7 }
  0x7f   : > { %p1930_p1 = pnand %p1928_p11, %p2296_p12  ;;  %p1936_p4 = scmp.lt.u32.totalorder %s1957_s7, %s2365_s25 }
  0x80   : > { %p1935_p0 = por %p1934_p8, %p1933_p7 }
  0x81   : > { %p1931_p3 = pneg %p1930_p1 }
  0x82   : > { %p1937_p6 = por %p1936_p4, %p1935_p0 }
  0x84   : > { %p1938_p2 = pnand %p1937_p6, %p1931_p3 }
  0x86   : > { %1941 = shalt.err (!%p1938_p2)
}
  0x87   : > { %s1942_s17 = scalar_lea.vmem %s416_s21, 128  ;;  %s2093_s11 = smov [#allocation7]  }
  0x88   : > { %p1943_p10 = scmp.ne.s32.totalorder %s416_s21, %s1942_s17  ;;  %s1947_s29 = sshll.u32 %s2093_s11, 4  ;;  %s1948_s29 = int_to_ptr.vmem [resolvable:$false] %s1947_s29 }
  0x89   : > { %s1949_s0 = scalar_lea.vmem %s1948_s29, 256  ;;  %p1950_p11 = scmp.lt.s32.totalorder %s416_s21, %s1948_s29 }
  0x8a   : > { %p1945_p13 = pnand %p1943_p10, %p2296_p12  ;;  %p1951_p1 = scmp.lt.s32.totalorder %s1949_s0, %s1942_s17 }
  0x8c   : > { %p1946_p5 = pneg %p1945_p13  ;;  %p1952_p9 = por %p1951_p1, %p1950_p11 }
  0x8e   : > { %p1953_p7 = pnand %p1952_p9, %p1946_p5 }
  0x90   : > { %1956 = shalt.err (!%p1953_p7)
}
  0x91   : > { %p3153_p8 = scmp.ne.s32.totalorder %s3140_s26, 0  ;;  %s1592_s28 = sadd.s32 3840, %s2269_s23 }
  0x92   : > { %s1440_s7 = scalar_lea.hbm %s3096_s3, %s1592_s28  ;;  %s426_s1 = scalar_lea.vmem [#allocation8], %s1559_s13 }
  0x93   : > { %1728 = dma.hbm_to_vmem [thread:$0]  (!%p3153_p8), %s2365_s25, 128, %s416_s21, %s2291_s18  }
  0x94   : > { %s441_s12 = sshll.u32 %s426_s1, 4  ;;  %s2392_s16 = scalar_lea.hbm %s1440_s7, 128  ;;  %s442_s12 = int_to_ptr.vmem [resolvable:$true] %s441_s12 }
  0x95   : > { %s3154_s30 = sand.u32 1, %s2083_s14   ;;  %s1988_s11 = scalar_lea.hbm %s1440_s7, 256 }
  0x96   : > { %s423_s17 = scalar_lea.sflag [#allocation9], %s3154_s30  ;;  %p1959_p9 = scmp.ne.s32.totalorder %s2392_s16, %s1988_s11 }
  0x97   : > { %s1963_s25 = scalar_lea.hbm %s3096_s3, 8192  ;;  %p1964_p4 = scmp.lt.u32.totalorder %s2392_s16, %s3096_s3 }
  0x98   : > { %p1961_p3 = pnand %p1959_p9, %p2296_p12  ;;  %p1965_p6 = scmp.lt.u32.totalorder %s1963_s25, %s1988_s11 }
  0x99   : > { %p1967_p10 = scmp.lt.u32.totalorder %s1988_s11, %s2392_s16 }
  0x9a   : > { %p1962_p0 = pneg %p1961_p3  ;;  %p1966_p2 = por %p1965_p6, %p1964_p4 }
  0x9c   : > { %p1968_p13 = por %p1967_p10, %p1966_p2 }
  0x9e   : > { %p1969_p5 = pnand %p1968_p13, %p1962_p0 }
  0xa0   : > { %1972 = shalt.err (!%p1969_p5)
}
  0xa1   : > { %s1973_s21 = scalar_lea.vmem %s442_s12, 128  ;;  %s2094_s29 = smov [#allocation8]  }
  0xa2   : > { %p1974_p11 = scmp.ne.s32.totalorder %s442_s12, %s1973_s21  ;;  %s1978_s0 = sshll.u32 %s2094_s29, 4  ;;  %s1979_s0 = int_to_ptr.vmem [resolvable:$false] %s1978_s0 }
  0xa3   : > { %s1980_s28 = scalar_lea.vmem %s1979_s0, 256  ;;  %p1981_p9 = scmp.lt.s32.totalorder %s442_s12, %s1979_s0 }
  0xa4   : > { %p1976_p1 = pnand %p1974_p11, %p2296_p12  ;;  %p1982_p3 = scmp.lt.s32.totalorder %s1980_s28, %s1973_s21 }
  0xa6   : > { %p1977_p7 = pneg %p1976_p1  ;;  %p1983_p8 = por %p1982_p3, %p1981_p9 }
  0xa8   : > { %p1984_p4 = pnand %p1983_p8, %p1977_p7 }
  0xaa   : > { %1987 = shalt.err (!%p1984_p4)
}
  0xab   : > { %p3155_p6 = scmp.ne.s32.totalorder %s3140_s26, 0  ;;  %p3156_p0 = scmp.ne.s32.totalorder %s3138_s22, 0 }
  0xac   : > { %s2415_s20 = sand.u32 (!%p3156_p0), 1, %s2067_s10   ;;  %p3157_p12 = scmp.ne.s32.totalorder (!%p3156_p0), %s3133_s19, 0 }
  0xad   : > { %1731 = dma.hbm_to_vmem [thread:$0]  (!%p3155_p6), %s2392_s16, 128, %s442_s12, %s423_s17  }
  0xae   : > { %450 = sbr.rel (%p3156_p0) target bundleno = 678 (0x2a6), region = 56  ;;  %s2418_s24 = sshll.u32 (!%p3156_p0), %s2415_s20, 7 }
  0xaf   : > { %s453_s27 = scalar_lea.sflag (!%p3156_p0), [#allocation3], %s2415_s20  ;;  %s2422_s7 = scalar_lea.vmem (!%p3156_p0), [#allocation2], %s2418_s24 }
  0xb5   : > { %2042 = dma.done.wait (%p3157_p12), %s453_s27, 2048  }
  0xb6   : > { %2044 = vsyncadd (%p3157_p12), %s453_s27, 4294965248  ;;  %s461_s22 = sand.u32 1, %s2181_s15   ;;  %s2430_s1 = scalar_lea.vmem [#allocation5], %s2418_s24 }
  0xb7   : > { %s462_s26 = scalar_lea.sflag [#allocation6], %s461_s22 }
  0xb8   : > { %2046 = dma.done.wait (%p3157_p12), %s462_s26, 2176  }
  0xb9   : > { %2048 = vsyncadd (%p3157_p12), %s462_s26, 4294965120  ;;  %s480_s12 = scalar_lea.sflag [#allocation9], %s461_s22 }
  0xba   : > { %2050 = dma.done.wait (%p3157_p12), %s480_s12, 128  }
  0xbb   : > { %2052 = vsyncadd (%p3157_p12), %s480_s12, 4294967168  ;;  %p3158_p8 = scmp.eq.s32.totalorder %s2181_s15, 0 }
  0xbd   : > { %2054 = dma.done.wait (%p3158_p8), [#allocation9], 1024   ;;  %p3159_p2 = pmov %p3158_p8 }
  0xbe   : > { %v2445_v0 = vld [vmem:[%s2430_s1 + $0x78] sm:$0xff]  ;;  %v2448_v1 = vld [vmem:[%s2430_s1] sm:$0xff]  ;;  %v2453_v2 = vld [vmem:[%s2430_s1 + $0x10] sm:$0xff]  ;;  %v3121_v19 = vmov 0.0   ;;  %vm2096_vm0 = vmmov 0   ;;  %v870_v56 = vlaneseq  ;;  %s2989_s25 = scalar_lea.vmem [#allocation11], %s2418_s24 }
  0xbf   : > { %2056 = vsyncadd (%p3159_p2), [#allocation9], 4294966272  ;;  %615 = vadd.xlane.f32.xlu1 %v2445_v0  ;;  %585 = vadd.xlane.f32.xlu0 %v2448_v1  ;;  %v2456_v3 = vld [vmem:[%s2430_s1 + $0x8] sm:$0xff]  ;;  %v2461_v4 = vld [vmem:[%s2430_s1 + $0x18] sm:$0xff]  ;;  %v634_v5 = vmul.f32 %v2448_v1, %v2448_v1  ;;  %v649_v7 = vmul.f32 %v2445_v0, %v2445_v0  ;;  %v636_v8 = vmul.f32 %v2453_v2, %v2453_v2  ;;  %s3168_s9 = sld [smem:[#allocation19_spill]]  ;;  %s3169_s21 = sld [smem:[#allocation21_spill]] }
  0xc0   : > { %v635_v6 = vmul.f32 %v2456_v3, %v2456_v3  ;;  %v2473_v9 = vld [vmem:[%s2430_s1 + $0x20] sm:$0xff]  ;;  %v637_v10 = vmul.f32 %v2461_v4, %v2461_v4  ;;  %v2481_v12 = vld [vmem:[%s2430_s1 + $0x28] sm:$0xff]  ;;  %v2484_v13 = vld [vmem:[%s2430_s1 + $0x30] sm:$0xff]  ;;  %1661 = vmatprep.subr.bf16.mxu1 %v3121_v19  ;;  %1677 = vmatprep.mubr.msk.bf16.mxu1 %vm2096_vm0, %v3121_v19  ;;  %s1374_s29 = sshll.u32 %s2989_s25, 4  ;;  %s3170_s24 = sld [smem:[#allocation28_spill]]  ;;  %s3043_s29 = int_to_ptr.vmem [resolvable:$true] %s1374_s29 }
  0xc1   : > { %v638_v11 = vmul.f32 %v2473_v9, %v2473_v9  ;;  %v639_v14 = vmul.f32 %v2481_v12, %v2481_v12  ;;  %v2491_v15 = vld [vmem:[%s2430_s1 + $0x38] sm:$0xff]  ;;  %v640_v16 = vmul.f32 %v2484_v13, %v2484_v13  ;;  %v2496_v17 = vld [vmem:[#allocation10] sm:$0xff]   ;;  %v2511_v22 = vld [vmem:[#allocation10 + $0x8] sm:$0xff]   ;;  %s1989_s22 = scalar_lea.vmem %s3043_s29, 2048  ;;  %s2097_s26 = smov [#allocation11]  }
  0xc2   : > { %v2499_v18 = vld [vmem:[%s2430_s1 + $0x40] sm:$0xff]  ;;  %1662 = vmatpush3.bf16.msra.mxu1 %v2496_v17  ;;  %1629 = vmatprep.subr.bf16.mxu0 %v2496_v17  ;;  %v641_v20 = vmul.f32 %v2491_v15, %v2491_v15  ;;  %v2517_v23 = vld [vmem:[#allocation10 + $0x10] sm:$0xff]   ;;  %v2520_v24 = vld [vmem:[%s2430_s1 + $0x48] sm:$0xff]  ;;  %p1990_p10 = scmp.ne.s32.totalorder %s3043_s29, %s1989_s22 }
  0xc3   : > { %589 = vadd.xlane.f32.xlu1 %v2453_v2  ;;  %587 = vadd.xlane.f32.xlu0 %v2456_v3  ;;  %v642_v21 = vmul.f32 %v2499_v18, %v2499_v18  ;;  %v2523_v25 = vld [vmem:[%s2430_s1 + $0x50] sm:$0xff]  ;;  %v643_v26 = vmul.f32 %v2520_v24, %v2520_v24  ;;  %v2533_v27 = vld [vmem:[#allocation10 + $0x18] sm:$0xff]   ;;  %v2545_v30 = vld [vmem:[#allocation10 + $0x20] sm:$0xff]  }
  0xc4   : > { %1663 = vmatprep.subr.bf16.mxu1 %v3121_v19  ;;  %1630 = vmatpush3.bf16.msra.mxu0 %v2496_v17  ;;  %v2536_v28 = vld [vmem:[%s2430_s1 + $0x58] sm:$0xff]  ;;  %v644_v29 = vmul.f32 %v2523_v25, %v2523_v25  ;;  %v2548_v31 = vld [vmem:[%s2430_s1 + $0x60] sm:$0xff]  ;;  %v2559_v34 = vld [vmem:[#allocation10 + $0x28] sm:$0xff]  }
  0xc5   : > { %1631 = vmatprep.subr.bf16.mxu0 %v2511_v22  ;;  %v645_v32 = vmul.f32 %v2536_v28, %v2536_v28  ;;  %v646_v33 = vmul.f32 %v2548_v31, %v2548_v31  ;;  %v2565_v35 = vld [vmem:[#allocation10 + $0x30] sm:$0xff]   ;;  %v2568_v36 = vld [vmem:[%s2430_s1 + $0x68] sm:$0xff]  ;;  %v2583_v40 = vld [vmem:[#allocation10 + $0x38] sm:$0xff]   ;;  %s1593_s13 = sshll.u32 %s3168_s9, 11  ;;  %p3171_p13 = scmp.ne.s32.totalorder %s3169_s21, 0 }
  0xc6   : > { %1664 = vmatpush3.bf16.msra.mxu1 %v2511_v22  ;;  %v2571_v37 = vld [vmem:[%s2430_s1 + $0x70] sm:$0xff]  ;;  %v647_v38 = vmul.f32 %v2568_v36, %v2568_v36  ;;  %s3041_s27 = scalar_lea.hbm %s3170_s24, %s1593_s13  ;;  %s1993_s1 = sshll.u32 %s2097_s26, 4  ;;  %s1994_s1 = int_to_ptr.vmem [resolvable:$false] %s1993_s1 }
  0xc7   : > { %591 = vadd.xlane.f32.xlu0 %v2461_v4  ;;  %650 = vadd.xlane.f32.xlu1 %v634_v5  ;;  %v648_v39 = vmul.f32 %v2571_v37, %v2571_v37  ;;  %p1991_p5 = pnand %p1990_p10, %p3171_p13  ;;  %s1995_s12 = scalar_lea.vmem %s1994_s1, 4096 }
  0xc8   : > { %1665 = vmatprep.subr.bf16.mxu1 %v3121_v19  ;;  %1632 = vmatpush3.bf16.msra.mxu0 %v2511_v22  ;;  %p1996_p1 = scmp.lt.s32.totalorder %s3043_s29, %s1994_s1  ;;  %p1997_p7 = scmp.lt.s32.totalorder %s1995_s12, %s1989_s22 }
  0xc9   : > { %1633 = vmatprep.subr.bf16.mxu0 %v2517_v23  ;;  %p1992_p11 = pneg %p1991_p5 }
  0xca   : > { %1666 = vmatpush3.bf16.msra.mxu1 %v2517_v23  ;;  %p1998_p9 = por %p1997_p7, %p1996_p1 }
  0xcb   : > { %652 = vadd.xlane.f32.xlu0 %v635_v6  ;;  %680 = vadd.xlane.f32.xlu1 %v649_v7 }
  0xcc   : > { %1667 = vmatprep.subr.bf16.mxu1 %v3121_v19  ;;  %1634 = vmatpush3.bf16.msra.mxu0 %v2517_v23  ;;  %p1999_p3 = pnand %p1998_p9, %p1992_p11 }
  0xcd   : > { %1635 = vmatprep.subr.bf16.mxu0 %v2533_v27 }
  0xce   : > { %1668 = vmatpush3.bf16.msra.mxu1 %v2533_v27 }
  0xcf   : > { %593 = vadd.xlane.f32.xlu0 %v2473_v9  ;;  %654 = vadd.xlane.f32.xlu1 %v636_v8 }
  0xd0   : > { %1669 = vmatprep.subr.bf16.mxu1 %v3121_v19  ;;  %1636 = vmatpush3.bf16.msra.mxu0 %v2533_v27 }
  0xd1   : > { %1637 = vmatprep.subr.bf16.mxu0 %v2545_v30 }
  0xd2   : > { %1670 = vmatpush3.bf16.msra.mxu1 %v2545_v30 }
  0xd3   : > { %656 = vadd.xlane.f32.xlu0 %v637_v10  ;;  %658 = vadd.xlane.f32.xlu1 %v638_v11  ;;  %v2607_v10 = vshrl.u32 %v870_v56, 7 }
  0xd4   : > { %1671 = vmatprep.subr.bf16.mxu1 %v3121_v19  ;;  %1638 = vmatpush3.bf16.msra.mxu0 %v2545_v30 }
  0xd5   : > { %1639 = vmatprep.subr.bf16.mxu0 %v2559_v34  ;;  %vm872_vm1 = vcmp.lt.s32.totalorder %v2607_v10, 1  ;;  %vm961_vm2 = vcmp.lt.s32.totalorder %v2607_v10, 7 }
  0xd6   : > { %1672 = vmatpush3.bf16.msra.mxu1 %v2559_v34 }
  0xd7   : > { %595 = vadd.xlane.f32.xlu0 %v2481_v12  ;;  %597 = vadd.xlane.f32.xlu1 %v2484_v13 }
  0xd8   : > { %1673 = vmatprep.subr.bf16.mxu1 %v3121_v19  ;;  %1640 = vmatpush3.bf16.msra.mxu0 %v2559_v34 }
  0xd9   : > { %1641 = vmatprep.subr.bf16.mxu0 %v2565_v35 }
  0xda   : > { %1674 = vmatpush3.bf16.msra.mxu1 %v2565_v35 }
  0xdb   : > { %599 = vadd.xlane.f32.xlu0 %v2491_v15  ;;  %660 = vadd.xlane.f32.xlu1 %v639_v14 }
  0xdc   : > { %1675 = vmatprep.subr.bf16.mxu1 %v3121_v19  ;;  %1642 = vmatpush3.bf16.msra.mxu0 %v2565_v35 }
  0xdd   : > { %1643 = vmatprep.subr.bf16.mxu0 %v2583_v40 }
  0xde   : > { %1676 = vmatpush3.bf16.msra.mxu1 %v2583_v40 }
  0xdf   : > { %601 = vadd.xlane.f32.xlu0 %v2499_v18  ;;  %662 = vadd.xlane.f32.xlu1 %v640_v16 }
  0xe0   : > { %1644 = vmatpush3.bf16.msra.mxu0 %v2583_v40 }
  0xe1   : > { %1681 = vmatprep.subr.bf16.mxu0 %v3121_v19 }
  0xe3   : > { %664 = vadd.xlane.f32.xlu0 %v641_v20  ;;  %666 = vadd.xlane.f32.xlu1 %v642_v21 }
  0xe7   : > { %603 = vadd.xlane.f32.xlu0 %v2520_v24  ;;  %605 = vadd.xlane.f32.xlu1 %v2523_v25 }
  0xeb   : > { %607 = vadd.xlane.f32.xlu0 %v2536_v28  ;;  %668 = vadd.xlane.f32.xlu1 %v643_v26 }
  0xef   : > { %609 = vadd.xlane.f32.xlu0 %v2548_v31  ;;  %670 = vadd.xlane.f32.xlu1 %v644_v29 }
  0xf3   : > { %672 = vadd.xlane.f32.xlu0 %v645_v32  ;;  %674 = vadd.xlane.f32.xlu1 %v646_v33 }
  0xf7   : > { %611 = vadd.xlane.f32.xlu0 %v2568_v36  ;;  %613 = vadd.xlane.f32.xlu1 %v2571_v37 }
  0xfb   : > { %676 = vadd.xlane.f32.xlu0 %v647_v38  ;;  %678 = vadd.xlane.f32.xlu1 %v648_v39 }
 0x14c   : > { %v616_v41 = vpop.xlane.xlu1 %615  ;;  %v586_v42 = vpop.xlane.xlu0 %585 }
 0x14d   : > { %v2591_v45 = vmul.f32 0.0078125, %v586_v42  ;;  %v2593_v46 = vmul.f32 0.0078125, %v616_v41  ;;  %v911_v41 = vsub.s32 1, %v2607_v10 }
 0x14f   : > { %v698_v49 = vmul.f32 %v2591_v45, %v2591_v45  ;;  %v713_v53 = vmul.f32 %v2593_v46, %v2593_v46 }
 0x150   : > { %v590_v43 = vpop.xlane.xlu1 %589  ;;  %v588_v44 = vpop.xlane.xlu0 %587 }
 0x151   : > { %v2597_v50 = vmul.f32 0.0078125, %v588_v44  ;;  %v2603_v61 = vmul.f32 0.0078125, %v590_v43 }
 0x153   : > { %v699_v57 = vmul.f32 %v2597_v50, %v2597_v50  ;;  %v700_v20 = vmul.f32 %v2603_v61, %v2603_v61 }
 0x154   : > { %v592_v47 = vpop.xlane.xlu0 %591  ;;  %v651_v48 = vpop.xlane.xlu1 %650 }
 0x155   : > { %v682_v51 = vmul.f32 0.0078125, %v651_v48  ;;  %v2605_v6 = vmul.f32 0.0078125, %v592_v47  ;;  %v551_v47 = vld [vmem:[%s3099_s6] sm:$0x7] }
 0x157   : > { %v714_v52 = vsub.f32 %v682_v51, %v698_v49  ;;  %v701_v32 = vmul.f32 %v2605_v6, %v2605_v6  ;;  %v891_v49 = vsub.s32 0, %v2607_v10 }
 0x158   : > { %v653_v54 = vpop.xlane.xlu0 %652  ;;  %v681_v55 = vpop.xlane.xlu1 %680 }
 0x159   : > { %v730_v58 = vmax.f32 %v714_v52, 0.0  ;;  %v683_v59 = vmul.f32 0.0078125, %v653_v54  ;;  %v697_v60 = vmul.f32 0.0078125, %v681_v55 }
 0x15b   : > { %v762_v62 = vadd.f32 1e-12, %v730_v58  ;;  %v715_v63 = vsub.f32 %v683_v59, %v699_v57  ;;  %v729_v5 = vsub.f32 %v697_v60, %v713_v53  ;;  %v980_v53 = vsub.s32 2, %v2607_v10 }
 0x15c   : > { %v594_v7 = vpop.xlane.xlu0 %593  ;;  %v655_v8 = vpop.xlane.xlu1 %654  ;;  %v2623_v57 = vrot.slane %v551_v47, %v911_v41 }
 0x15d   : > { %1806 = vrsqrt.f32 %v762_v62  ;;  %v731_v11 = vmax.f32 %v715_v63, 0.0  ;;  %v745_v14 = vmax.f32 %v729_v5, 0.0  ;;  %v2609_v16 = vmul.f32 0.0078125, %v594_v7  ;;  %v2633_v5 = vld [vmem:[%s3097_s4] ss:$0 sm:$0xff] }
 0x15e   : > { %v684_v21 = vmul.f32 0.0078125, %v655_v8  ;;  %v1261_v62 = vrot.slane %v3121_v19, 7  ;;  %v746_v63 = vsub.f32 %v2448_v1, %v2591_v45  ;;  %v2636_v7 = vrot.slane %v551_v47, %v891_v49 }
 0x15f   : > { %v763_v26 = vadd.f32 1e-12, %v731_v11  ;;  %v777_v29 = vadd.f32 1e-12, %v745_v14  ;;  %v702_v42 = vmul.f32 %v2609_v16, %v2609_v16  ;;  %v761_v1 = vsub.f32 %v2445_v0, %v2593_v46  ;;  %v2656_v0 = vld [vmem:[%s3098_s5] ss:$0 sm:$0xff] }
 0x160   : > { %v716_v33 = vsub.f32 %v684_v21, %v700_v20  ;;  %v657_v38 = vpop.xlane.xlu0 %656  ;;  %v659_v39 = vpop.xlane.xlu1 %658  ;;  %v2640_v21 = vrot.slane %v551_v47, %v980_v53  ;;  %v748_v45 = vsub.f32 %v2453_v2, %v2603_v61  ;;  %v747_v2 = vsub.f32 %v2456_v3, %v2597_v50 }
 0x161   : > { %1808 = vrsqrt.f32 %v763_v26  ;;  %v685_v43 = vmul.f32 0.0078125, %v657_v38  ;;  %v686_v44 = vmul.f32 0.0078125, %v659_v39  ;;  %v749_v46 = vsub.f32 %v2461_v4, %v2605_v6 }
 0x162   : > { %1810 = vrsqrt.f32 %v777_v29  ;;  %v732_v48 = vmax.f32 %v716_v33, 0.0  ;;  %v2647_v33 = vrot.slane %v3121_v19, 1 }
 0x163   : > { %v717_v51 = vsub.f32 %v685_v43, %v701_v32  ;;  %v718_v52 = vsub.f32 %v686_v44, %v702_v42  ;;  %v750_v43 = vsub.f32 %v2473_v9, %v2609_v16 }
 0x164   : > { %v764_v54 = vadd.f32 1e-12, %v732_v48  ;;  %v596_v55 = vpop.xlane.xlu0 %595  ;;  %v598_v56 = vpop.xlane.xlu1 %597 }
 0x165   : > { %v733_v58 = vmax.f32 %v717_v51, 0.0  ;;  %v734_v59 = vmax.f32 %v718_v52, 0.0  ;;  %v2625_v60 = vmul.f32 0.0078125, %v596_v55  ;;  %v2638_v20 = vmul.f32 0.0078125, %v598_v56 }
 0x166   : > { %1812 = vrsqrt.f32 %v764_v54 }
 0x167   : > { %v1807_v8 = vpop.eup %1806  ;;  %v765_v11 = vadd.f32 1e-12, %v733_v58  ;;  %v766_v14 = vadd.f32 1e-12, %v734_v59  ;;  %v703_v38 = vmul.f32 %v2625_v60, %v2625_v60  ;;  %v751_v44 = vsub.f32 %v2481_v12, %v2625_v60 }
 0x168   : > { %v794_v26 = vmul.f32 %v1807_v8, %v746_v63  ;;  %v600_v29 = vpop.xlane.xlu0 %599  ;;  %v661_v32 = vpop.xlane.xlu1 %660  ;;  %v704_v47 = vmul.f32 %v2638_v20, %v2638_v20  ;;  %v752_v3 = vsub.f32 %v2484_v13, %v2638_v20 }
 0x169   : > { %1814 = vrsqrt.f32 %v765_v11  ;;  %v2651_v39 = vmul.f32 0.0078125, %v600_v29  ;;  %v687_v41 = vmul.f32 0.0078125, %v661_v32 }
 0x16a   : > { %1816 = vrsqrt.f32 %v766_v14  ;;  %v816_v61 = vmul.f32 %v2633_v5, %v794_v26 }
 0x16b   : > { %v1809_v42 = vpop.eup %1808  ;;  %v719_v48 = vsub.f32 %v687_v41, %v703_v38  ;;  %v705_v4 = vmul.f32 %v2651_v39, %v2651_v39  ;;  %v753_v56 = vsub.f32 %v2491_v15, %v2651_v39 }
 0x16c   : > { %v1811_v49 = vpop.eup %1810  ;;  %v795_v51 = vmul.f32 %v1809_v42, %v747_v2  ;;  %v602_v50 = vpop.xlane.xlu0 %601  ;;  %v2675_v52 = vadd.f32 %v2656_v0, %v816_v61 }
 0x16d   : > { %v663_v6 = vpop.xlane.xlu1 %662  ;;  %v809_v9 = vmul.f32 %v1811_v49, %v761_v1  ;;  %v735_v16 = vmax.f32 %v719_v48, 0.0  ;;  %v2677_v53 = vmul.f32 0.0078125, %v602_v50 }
 0x16e   : > { %v688_v54 = vmul.f32 0.0078125, %v663_v6  ;;  %v817_v55 = vmul.f32 %v2633_v5, %v795_v51  ;;  %v2683_v58 = vrot.slane %v2675_v52, 7  ;;  %v2687_v59 = vmul.f32 %v2623_v57, %v2675_v52 }
 0x16f   : > { %v831_v63 = vmul.f32 %v2633_v5, %v809_v9  ;;  %v767_v8 = vadd.f32 1e-12, %v735_v16  ;;  %v706_v11 = vmul.f32 %v2677_v53, %v2677_v53  ;;  %v3120_v14 = vrot.slane %v2675_v52, 1 }
 0x170   : > { %v1813_v1 = vpop.eup %1812  ;;  %v720_v29 = vsub.f32 %v688_v54, %v704_v47  ;;  %v665_v32 = vpop.xlane.xlu0 %664  ;;  %v2696_v41 = vadd.f32 %v2656_v0, %v817_v55  ;;  %v1262_v2 = vsel %vm872_vm1, %v1261_v62, %v2683_v58 }
 0x171   : > { %v667_v38 = vpop.xlane.xlu1 %666  ;;  %v796_v61 = vmul.f32 %v1813_v1, %v748_v45  ;;  %1818 = vrsqrt.f32 %v767_v8  ;;  %v689_v42 = vmul.f32 0.0078125, %v665_v32  ;;  %v1263_v50 = vmul.f32 %v1262_v2, %v2636_v7 }
 0x172   : > { %v690_v48 = vmul.f32 0.0078125, %v667_v38  ;;  %v736_v49 = vmax.f32 %v720_v29, 0.0  ;;  %v946_v51 = vrot.slane %v2696_v41, 1  ;;  %v2704_v47 = vadd.f32 %v2656_v0, %v831_v63 }
 0x173   : > { %v1815_v6 = vpop.eup %1814  ;;  %v721_v9 = vsub.f32 %v689_v42, %v705_v4  ;;  %v818_v54 = vmul.f32 %v2633_v5, %v796_v61  ;;  %v855_v55 = vrot.slane %v2696_v41, 7  ;;  %v1264_v63 = vadd.f32 %v1263_v50, %v2687_v59 }
 0x174   : > { %v722_v16 = vsub.f32 %v690_v48, %v706_v11  ;;  %v1817_v62 = vpop.eup %1816  ;;  %v797_v45 = vmul.f32 %v1815_v6, %v749_v46  ;;  %v768_v8 = vadd.f32 1e-12, %v736_v49  ;;  %v604_v1 = vpop.xlane.xlu0 %603  ;;  %v976_v29 = vsel %vm961_vm2, %v3120_v14, %v946_v51 }
 0x175   : > { %v606_v32 = vpop.xlane.xlu1 %605  ;;  %v798_v38 = vmul.f32 %v1817_v62, %v750_v43  ;;  %v737_v2 = vmax.f32 %v721_v9, 0.0  ;;  %v2713_v11 = vmul.f32 0.0078125, %v604_v1  ;;  %v982_v46 = vmul.f32 %v2640_v21, %v976_v29 }
 0x176   : > { %v738_v4 = vmax.f32 %v722_v16, 0.0  ;;  %1820 = vrsqrt.f32 %v768_v8  ;;  %v2715_v61 = vmul.f32 0.0078125, %v606_v32  ;;  %v2719_v42 = vadd.f32 %v2656_v0, %v818_v54 }
 0x177   : > { %v820_v48 = vmul.f32 %v2633_v5, %v798_v38  ;;  %v769_v49 = vadd.f32 1e-12, %v737_v2  ;;  %v707_v50 = vmul.f32 %v2713_v11, %v2713_v11  ;;  %v1265_v54 = vadd.f32 %v1264_v63, %v982_v46 }
 0x178   : > { %v770_v6 = vadd.f32 1e-12, %v738_v4  ;;  %v708_v9 = vmul.f32 %v2715_v61, %v2715_v61  ;;  %v608_v62 = vpop.xlane.xlu0 %607  ;;  %v3123_v29 = vrot.slane %v2704_v47, 7  ;;  %v887_v2 = vsel %vm872_vm1, %v2683_v58, %v855_v55 }
 0x179   : > { %v669_v8 = vpop.xlane.xlu1 %668  ;;  %1822 = vrsqrt.f32 %v769_v49  ;;  %v2730_v1 = vmul.f32 0.0078125, %v608_v62  ;;  %v1266_v38 = vpack.c.bf16 %v1265_v54, %v1265_v54  ;;  %v914_v4 = vmul.f32 %v2623_v57, %v2696_v41 }
 0x17a   : > { %v691_v32 = vmul.f32 0.0078125, %v669_v8  ;;  %1824 = vrsqrt.f32 %v770_v6  ;;  %v888_v6 = vsel %vm872_vm1, %v3123_v29, %v2683_v58  ;;  %v894_v43 = vmul.f32 %v2636_v7, %v887_v2 }
 0x17b   : > { %v1819_v14 = vpop.eup %1818  ;;  %v709_v63 = vmul.f32 %v2730_v1, %v2730_v1  ;;  %1678 = vmatmul.mubr.bf16.vlgmr.msra.gmra.mrb[0].mxu1 %v1266_v38  ;;  %v893_v16 = vmul.f32 %v2636_v7, %v888_v6  ;;  %v819_v58 = vmul.f32 %v2633_v5, %v797_v45  ;;  %v915_v39 = vmul.f32 %v2623_v57, %v2719_v42 }
 0x17c   : > { %v723_v62 = vsub.f32 %v691_v32, %v707_v50  ;;  %v2752_v8 = vmul.f32 %v1819_v14, %v751_v44  ;;  %v610_v54 = vpop.xlane.xlu0 %609  ;;  %v947_v50 = vrot.slane %v2719_v42, 1  ;;  %v930_v12 = vadd.f32 %v914_v4, %v894_v43 }
 0x17d   : > { %v671_v19 = vpop.xlane.xlu1 %670  ;;  %v2757_v49 = vmul.f32 0.0078125, %v610_v54  ;;  %v929_v29 = vadd.f32 %v2687_v59, %v893_v16  ;;  %v2766_v44 = vadd.f32 %v2656_v0, %v820_v48 }
 0x17e   : > { %v739_v32 = vmax.f32 %v723_v62, 0.0  ;;  %v692_v26 = vmul.f32 0.0078125, %v671_v19  ;;  %v975_v60 = vsel %vm961_vm2, %v946_v51, %v947_v50  ;;  %v2774_v62 = vadd.f32 %v2656_v0, %v819_v58 }
 0x17f   : > { %v710_v38 = vmul.f32 %v2757_v49, %v2757_v49  ;;  %v983_v59 = vmul.f32 %v2640_v21, %v975_v60  ;;  %v998_v43 = vadd.f32 %v982_v46, %v929_v29  ;;  %v856_v51 = vrot.slane %v2719_v42, 7 }
 0x180   : > { %v771_v14 = vadd.f32 1e-12, %v739_v32  ;;  %v724_v2 = vsub.f32 %v692_v26, %v708_v9  ;;  %v1821_v45 = vpop.eup %1820  ;;  %v673_v16 = vpop.xlane.xlu0 %672  ;;  %v857_v9 = vrot.slane %v2774_v62, 7 }
 0x181   : > { %v675_v4 = vpop.xlane.xlu1 %674  ;;  %v800_v48 = vmul.f32 %v1821_v45, %v752_v3  ;;  %v693_v54 = vmul.f32 0.0078125, %v673_v16  ;;  %v999_v32 = vadd.f32 %v983_v59, %v930_v12  ;;  %v886_v46 = vsel %vm872_vm1, %v855_v55, %v856_v51 }
 0x182   : > { %1826 = vrsqrt.f32 %v771_v14  ;;  %v740_v6 = vmax.f32 %v724_v2, 0.0  ;;  %v694_v26 = vmul.f32 0.0078125, %v675_v4  ;;  %v895_v13 = vmul.f32 %v2636_v7, %v886_v46 }
 0x183   : > { %v1823_v29 = vpop.eup %1822  ;;  %v822_v58 = vmul.f32 %v2633_v5, %v800_v48  ;;  %v725_v19 = vsub.f32 %v693_v54, %v709_v63  ;;  %v1014_v12 = vpack.c.bf16 %v999_v32, %v998_v43  ;;  %v885_v41 = vsel %vm872_vm1, %v856_v51, %v857_v9 }
 0x184   : > { %v772_v60 = vadd.f32 1e-12, %v740_v6  ;;  %v1825_v20 = vpop.eup %1824  ;;  %v801_v3 = vmul.f32 %v1823_v29, %v753_v56  ;;  %v726_v14 = vsub.f32 %v694_v26, %v710_v38  ;;  %v612_v2 = vpop.xlane.xlu0 %611  ;;  %v3160_v55 = vsub.f32 %v2499_v18, %v2677_v53 }
 0x185   : > { %v614_v45 = vpop.xlane.xlu1 %613  ;;  %v741_v63 = vmax.f32 %v725_v19, 0.0  ;;  %v2795_v16 = vmul.f32 0.0078125, %v612_v2  ;;  %1645 = vmatprep.mubr.bf16.mxu0 %v1014_v12  ;;  %v896_v15 = vmul.f32 %v2636_v7, %v885_v41  ;;  %v916_v6 = vmul.f32 %v2623_v57, %v2774_v62 }
 0x186   : > { %v802_v59 = vmul.f32 %v1825_v20, %v3160_v55  ;;  %1828 = vrsqrt.f32 %v772_v60  ;;  %v742_v4 = vmax.f32 %v726_v14, 0.0  ;;  %v2797_v48 = vmul.f32 0.0078125, %v614_v45 }
 0x187   : > { %v773_v38 = vadd.f32 1e-12, %v741_v63  ;;  %v711_v18 = vmul.f32 %v2795_v16, %v2795_v16  ;;  %v759_v53 = vsub.f32 %v2568_v36, %v2795_v16  ;;  %v931_v26 = vadd.f32 %v915_v39, %v895_v13 }
 0x188   : > { %v2803_v56 = vmul.f32 %v2633_v5, %v802_v59  ;;  %v774_v19 = vadd.f32 1e-12, %v742_v4  ;;  %v712_v43 = vmul.f32 %v2797_v48, %v2797_v48  ;;  %v760_v51 = vsub.f32 %v2571_v37, %v2797_v48  ;;  %v677_v54 = vpop.xlane.xlu0 %676 }
 0x189   : > { %v679_v32 = vpop.xlane.xlu1 %678  ;;  %1830 = vrsqrt.f32 %v773_v38  ;;  %v948_v46 = vrot.slane %v2774_v62, 1  ;;  %v949_v29 = vrot.slane %v2766_v44, 1  ;;  %v932_v60 = vadd.f32 %v916_v6, %v896_v15 }
 0x18a   : > { %1832 = vrsqrt.f32 %v774_v19  ;;  %v695_v20 = vmul.f32 0.0078125, %v677_v54  ;;  %v696_v12 = vmul.f32 0.0078125, %v679_v32  ;;  %v821_v13 = vmul.f32 %v2633_v5, %v2752_v8 }
 0x18b   : > { %v973_v2 = vsel %vm961_vm2, %v948_v46, %v949_v29  ;;  %v974_v45 = vsel %vm961_vm2, %v947_v50, %v948_v46  ;;  %v2826_v62 = vadd.f32 %v2656_v0, %v822_v58  ;;  %v3161_v41 = vsub.f32 %v2520_v24, %v2713_v11 }
 0x18c   : > { %v1827_v14 = vpop.eup %1826  ;;  %v984_v59 = vmul.f32 %v2640_v21, %v974_v45  ;;  %v985_v63 = vmul.f32 %v2640_v21, %v973_v2  ;;  %v727_v4 = vsub.f32 %v695_v20, %v711_v18  ;;  %v728_v15 = vsub.f32 %v696_v12, %v712_v43 }
 0x18d   : > { %v803_v55 = vmul.f32 %v1827_v14, %v3161_v41  ;;  %v843_v42 = vadd.f32 %v2656_v0, %v821_v13  ;;  %v858_v50 = vrot.slane %v2766_v44, 7  ;;  %v917_v8 = vmul.f32 %v2623_v57, %v2766_v44 }
 0x18e   : > { %v1000_v39 = vadd.f32 %v984_v59, %v931_v26  ;;  %v1001_v58 = vadd.f32 %v985_v63, %v932_v60  ;;  %v743_v38 = vmax.f32 %v727_v4, 0.0  ;;  %v951_v19 = vrot.slane %v2826_v62, 1 }
 0x18f   : > { %v744_v11 = vmax.f32 %v728_v15, 0.0  ;;  %v859_v6 = vrot.slane %v843_v42, 7  ;;  %v884_v54 = vsel %vm872_vm1, %v857_v9, %v858_v50  ;;  %v918_v18 = vmul.f32 %v2623_v57, %v843_v42 }
 0x190   : > { %v1829_v24 = vpop.eup %1828  ;;  %v3162_v43 = vsub.f32 %v2523_v25, %v2715_v61  ;;  %v1015_v46 = vpack.c.bf16 %v1001_v58, %v1000_v39  ;;  %v775_v20 = vadd.f32 1e-12, %v743_v38  ;;  %v897_v44 = vmul.f32 %v2636_v7, %v884_v54 }
 0x191   : > { %v776_v26 = vadd.f32 1e-12, %v744_v11  ;;  %v883_v60 = vsel %vm872_vm1, %v858_v50, %v859_v6  ;;  %v950_v12 = vrot.slane %v843_v42, 1  ;;  %v823_v14 = vmul.f32 %v2633_v5, %v801_v3 }
 0x192   : > { %v804_v32 = vmul.f32 %v1829_v24, %v3162_v43  ;;  %1646 = vmatmul.mubr.bf16.vlgmr.msra.gmra.mrb[0].mxu0 %v1015_v46  ;;  %1834 = vrsqrt.f32 %v775_v20  ;;  %v898_v9 = vmul.f32 %v2636_v7, %v883_v60  ;;  %v933_v45 = vadd.f32 %v917_v8, %v897_v44 }
 0x193   : > { %v1831_v25 = vpop.eup %1830  ;;  %1836 = vrsqrt.f32 %v776_v26  ;;  %v971_v61 = vsel %vm961_vm2, %v950_v12, %v951_v19  ;;  %v972_v13 = vsel %vm961_vm2, %v949_v29, %v950_v12  ;;  %v845_v41 = vadd.f32 %v2656_v0, %v823_v14  ;;  %1682 = vmatpush3.bf16.msra.mxu0 %v2496_v17 }
 0x194   : > { %v826_v2 = vmul.f32 %v2633_v5, %v804_v32  ;;  %v1833_v3 = vpop.eup %1832  ;;  %v3163_v59 = vsub.f32 %v2536_v28, %v2730_v1  ;;  %v934_v4 = vadd.f32 %v918_v18, %v898_v9  ;;  %v986_v15 = vmul.f32 %v2640_v21, %v972_v13 }
 0x195   : > { %v987_v42 = vmul.f32 %v2640_v21, %v971_v61  ;;  %v3164_v50 = vmov 0.0   ;;  %v3165_v8 = vsub.f32 %v2548_v31, %v2757_v49  ;;  %v846_v39 = vadd.f32 %v2656_v0, %v2803_v56 }
 0x196   : > { %v805_v63 = vmul.f32 %v1831_v25, %v3163_v59  ;;  %1683 = vmatprep.subr.bf16.mxu0 %v3164_v50  ;;  %v860_v17 = vrot.slane %v2826_v62, 7  ;;  %v861_v58 = vrot.slane %v845_v41, 7  ;;  %v1002_v38 = vadd.f32 %v986_v15, %v933_v45 }
 0x197   : > { %v806_v29 = vmul.f32 %v1833_v3, %v3165_v8  ;;  %v1003_v28 = vadd.f32 %v987_v42, %v934_v4  ;;  %v919_v1 = vmul.f32 %v2623_v57, %v2826_v62  ;;  %v920_v24 = vmul.f32 %v2623_v57, %v845_v41  ;;  %1684 = vmatpush3.bf16.msra.mxu0 %v2511_v22 }
 0x198   : > { %v881_v54 = vsel %vm872_vm1, %v860_v17, %v861_v58  ;;  %v882_v31 = vsel %vm872_vm1, %v859_v6, %v860_v17  ;;  %v952_v49 = vrot.slane %v845_v41, 1  ;;  %v953_v32 = vrot.slane %v846_v39, 1  ;;  %1685 = vmatprep.subr.bf16.mxu0 %v3164_v50 }
 0x199   : > { %v828_v11 = vmul.f32 %v2633_v5, %v806_v29  ;;  %v1016_v56 = vpack.c.bf16 %v1003_v28, %v1002_v38  ;;  %v899_v18 = vmul.f32 %v2636_v7, %v882_v31  ;;  %v900_v43 = vmul.f32 %v2636_v7, %v881_v54 }
 0x19a   : > { %v970_v62 = vsel %vm961_vm2, %v951_v19, %v952_v49  ;;  %v825_v46 = vmul.f32 %v2633_v5, %v803_v55  ;;  %v848_v20 = vadd.f32 %v2656_v0, %v826_v2  ;;  %v862_v44 = vrot.slane %v846_v39, 7 }
 0x19b   : > { %1649 = vmatprep.mubr.bf16.mxu0 %v1016_v56  ;;  %v935_v6 = vadd.f32 %v919_v1, %v899_v18  ;;  %v936_v26 = vadd.f32 %v920_v24, %v900_v43  ;;  %v969_v22 = vsel %vm961_vm2, %v952_v49, %v953_v32  ;;  %v988_v60 = vmul.f32 %v2640_v21, %v970_v62 }
 0x19c   : > { %v989_v12 = vmul.f32 %v2640_v21, %v969_v22  ;;  %1686 = vmatpush3.bf16.msra.mxu0 %v2517_v23  ;;  %v847_v14 = vadd.f32 %v2656_v0, %v825_v46  ;;  %v880_v55 = vsel %vm872_vm1, %v861_v58, %v862_v44  ;;  %v921_v19 = vmul.f32 %v2623_v57, %v846_v39  ;;  %v1835_v2 = vpop.eup %1834 }
 0x19d   : > { %v1004_v9 = vadd.f32 %v988_v60, %v935_v6  ;;  %v901_v45 = vmul.f32 %v2636_v7, %v880_v55  ;;  %v955_v25 = vrot.slane %v848_v20, 1  ;;  %1687 = vmatprep.subr.bf16.mxu0 %v3164_v50  ;;  %v827_v61 = vmul.f32 %v2633_v5, %v805_v63  ;;  %v1837_v13 = vpop.eup %1836 }
 0x19e   : > { %v807_v23 = vmul.f32 %v1835_v2, %v759_v53  ;;  %v1005_v41 = vadd.f32 %v989_v12, %v936_v26  ;;  %v863_v3 = vrot.slane %v847_v14, 7  ;;  %v922_v59 = vmul.f32 %v2623_v57, %v847_v14 }
 0x19f   : > { %v808_v4 = vmul.f32 %v1837_v13, %v760_v51  ;;  %v937_v15 = vadd.f32 %v921_v19, %v901_v45  ;;  %v954_v42 = vrot.slane %v847_v14, 1  ;;  %v849_v8 = vadd.f32 %v2656_v0, %v827_v61 }
 0x1a0   : > { %v829_v29 = vmul.f32 %v2633_v5, %v807_v23  ;;  %v1017_v63 = vpack.c.bf16 %v1005_v41, %v1004_v9  ;;  %v879_v39 = vsel %vm872_vm1, %v862_v44, %v863_v3  ;;  %1688 = vmatpush3.bf16.msra.mxu0 %v2533_v27  ;;  %v850_v36 = vadd.f32 %v2656_v0, %v828_v11 }
 0x1a1   : > { %v830_v16 = vmul.f32 %v2633_v5, %v808_v4  ;;  %v902_v53 = vmul.f32 %v2636_v7, %v879_v39  ;;  %v967_v37 = vsel %vm961_vm2, %v954_v42, %v955_v25  ;;  %v968_v48 = vsel %vm961_vm2, %v953_v32, %v954_v42  ;;  %1689 = vmatprep.subr.bf16.mxu0 %v3164_v50 }
 0x1a2   : > { %1650 = vmatmul.mubr.bf16.gmra.mrb[4].mxu0 %v1017_v63  ;;  %v990_v51 = vmul.f32 %v2640_v21, %v968_v48  ;;  %v991_v17 = vmul.f32 %v2640_v21, %v967_v37  ;;  %v864_v27 = vrot.slane %v848_v20, 7  ;;  %v865_v58 = vrot.slane %v849_v8, 7 }
 0x1a3   : > { %v938_v38 = vadd.f32 %v922_v59, %v902_v53  ;;  %v923_v5 = vmul.f32 %v2623_v57, %v848_v20  ;;  %v924_v28 = vmul.f32 %v2623_v57, %v849_v8  ;;  %v956_v1 = vrot.slane %v849_v8, 1 }
 0x1a4   : > { %v1006_v24 = vadd.f32 %v990_v51, %v937_v15  ;;  %v877_v11 = vsel %vm872_vm1, %v864_v27, %v865_v58  ;;  %v878_v54 = vsel %vm872_vm1, %v863_v3, %v864_v27  ;;  %v957_v31 = vrot.slane %v850_v36, 1  ;;  %1690 = vmatpush3.bf16.msra.mxu0 %v2545_v30 }
 0x1a5   : > { %v1007_v49 = vadd.f32 %v991_v17, %v938_v38  ;;  %v903_v56 = vmul.f32 %v2636_v7, %v878_v54  ;;  %v904_v18 = vmul.f32 %v2636_v7, %v877_v11  ;;  %v966_v43 = vsel %vm961_vm2, %v955_v25, %v956_v1  ;;  %1691 = vmatprep.subr.bf16.mxu0 %v3164_v50 }
 0x1a6   : > { %v965_v32 = vsel %vm961_vm2, %v956_v1, %v957_v31  ;;  %v992_v62 = vmul.f32 %v2640_v21, %v966_v43  ;;  %v851_v46 = vadd.f32 %v2656_v0, %v829_v29  ;;  %v852_v20 = vadd.f32 %v2656_v0, %v830_v16 }
 0x1a7   : > { %v1018_v30 = vpack.c.bf16 %v1007_v49, %v1006_v24  ;;  %v939_v44 = vadd.f32 %v923_v5, %v903_v56  ;;  %v940_v6 = vadd.f32 %v924_v28, %v904_v18  ;;  %v993_v26 = vmul.f32 %v2640_v21, %v965_v32  ;;  %v1307_v24 = vld [vmem:[%s2422_s7] sm:$0xff]  ;;  %v1175_v18 = vld [vmem:[%s2422_s7 + $0x10] sm:$0xff] }
 0x1a8   : > { %1692 = vmatpush3.bf16.msra.mxu0 %v2559_v34  ;;  %v866_v22 = vrot.slane %v850_v36, 7  ;;  %v867_v60 = vrot.slane %v851_v46, 7  ;;  %v925_v12 = vmul.f32 %v2623_v57, %v850_v36  ;;  %v926_v14 = vmul.f32 %v2623_v57, %v851_v46 }
 0x1a9   : > { %1653 = vmatprep.mubr.bf16.mxu0 %v1018_v30  ;;  %v1008_v55 = vadd.f32 %v992_v62, %v939_v44  ;;  %v1009_v19 = vadd.f32 %v993_v26, %v940_v6  ;;  %v958_v2 = vrot.slane %v851_v46, 1  ;;  %v959_v9 = vrot.slane %v852_v20, 1  ;;  %1693 = vmatprep.subr.bf16.mxu0 %v3164_v50  ;;  %v1176_v46 = vld [vmem:[%s2422_s7 + $0x18] sm:$0xff]  ;;  %v1174_v6 = vld [vmem:[%s2422_s7 + $0x8] sm:$0xff] }
 0x1aa   : > { %v875_v0 = vsel %vm872_vm1, %v866_v22, %v867_v60  ;;  %v876_v45 = vsel %vm872_vm1, %v865_v58, %v866_v22  ;;  %v868_v34 = vrot.slane %v852_v20, 7  ;;  %v927_v25 = vmul.f32 %v2623_v57, %v852_v20 }
 0x1ab   : > { %v1019_v61 = vpack.c.bf16 %v1009_v19, %v1008_v55  ;;  %v905_v13 = vmul.f32 %v2636_v7, %v876_v45  ;;  %v906_v23 = vmul.f32 %v2636_v7, %v875_v0  ;;  %v963_v41 = vsel %vm961_vm2, %v958_v2, %v959_v9  ;;  %v1180_v45 = vld [vmem:[%s2422_s7 + $0x38] sm:$0xff] }
 0x1ac   : > { %v964_v3 = vsel %vm961_vm2, %v957_v31, %v958_v2  ;;  %v995_v59 = vmul.f32 %v2640_v21, %v963_v41  ;;  %v3166_v4 = vrot.slane %v2704_v47, 7  ;;  %v874_v42 = vsel %vm872_vm1, %v867_v60, %v868_v34  ;;  %1694 = vmatpush3.bf16.msra.mxu0 %v2565_v35  ;;  %v1177_v2 = vld [vmem:[%s2422_s7 + $0x20] sm:$0xff] }
 0x1ad   : > { %1654 = vmatmul.mubr.bf16.gmra.mrb[8].mxu0 %v1019_v61  ;;  %v941_v8 = vadd.f32 %v925_v12, %v905_v13  ;;  %v942_v29 = vadd.f32 %v926_v14, %v906_v23  ;;  %v994_v63 = vmul.f32 %v2640_v21, %v964_v3  ;;  %v907_v39 = vmul.f32 %v2636_v7, %v874_v42  ;;  %v1179_v14 = vld [vmem:[%s2422_s7 + $0x30] sm:$0xff]  ;;  %v1178_v13 = vld [vmem:[%s2422_s7 + $0x28] sm:$0xff] }
 0x1ae   : > { %v873_v15 = vsel %vm872_vm1, %v868_v34, %v3166_v4  ;;  %v928_v16 = vmul.f32 %v2623_v57, %v2704_v47  ;;  %v960_v53 = vrot.slane %v2704_v47, 1  ;;  %1695 = vmatprep.subr.bf16.mxu0 %v3164_v50  ;;  %v3167_v27 = vrot.slane %v2675_v52, 1 }
 0x1af   : > { %v908_v36 = vmul.f32 %v2636_v7, %v873_v15  ;;  %v1010_v37 = vadd.f32 %v994_v63, %v941_v8  ;;  %v1011_v48 = vadd.f32 %v995_v59, %v942_v29  ;;  %v943_v51 = vadd.f32 %v927_v25, %v907_v39  ;;  %v1183_v15 = vld [vmem:[%s2422_s7 + $0x50] sm:$0xff]  ;;  %v1181_v29 = vld [vmem:[%s2422_s7 + $0x40] sm:$0xff] }
 0x1b0   : > { %v962_v17 = vsel %vm961_vm2, %v959_v9, %v960_v53  ;;  %v977_v58 = vsel %vm961_vm2, %v960_v53, %v3167_v27  ;;  %v1311_v57 = vsel %vm961_vm2, %v960_v53, %v2647_v33  ;;  %1696 = vmatpush3.bf16.msra.mxu0 %v2583_v40  ;;  %v2984_v33 = vld [vmem:[%s3101_s8] ss:$0 sm:$0xff] }
 0x1b1   : > { %v944_v35 = vadd.f32 %v928_v16, %v908_v36  ;;  %v1020_v7 = vpack.c.bf16 %v1011_v48, %v1010_v37  ;;  %v996_v47 = vmul.f32 %v2640_v21, %v962_v17  ;;  %v997_v38 = vmul.f32 %v2640_v21, %v977_v58  ;;  %v1184_v36 = vld [vmem:[%s2422_s7 + $0x58] sm:$0xff]  ;;  %v1182_v48 = vld [vmem:[%s2422_s7 + $0x48] sm:$0xff] }
 0x1b2   : > { %v1312_v5 = vmul.f32 %v1311_v57, %v2640_v21  ;;  %v1187_v57 = vld [vmem:[%s2422_s7 + $0x70] sm:$0xff] }
 0x1b3   : > { %1657 = vmatprep.mubr.bf16.mxu0 %v1020_v7  ;;  %v1012_v28 = vadd.f32 %v996_v47, %v943_v51  ;;  %v1013_v52 = vadd.f32 %v997_v38, %v944_v35  ;;  %v1185_v38 = vld [vmem:[%s2422_s7 + $0x60] sm:$0xff] }
 0x1b4   : > { %v1313_v10 = vadd.f32 %v1312_v5, %v944_v35 }
 0x1b5   : > { %v1021_v1 = vpack.c.bf16 %v1013_v52, %v1012_v28 }
 0x1b6   : > { %v1314_v40 = vpack.c.bf16 %v1313_v10, %v1313_v10  ;;  %v1186_v10 = vld [vmem:[%s2422_s7 + $0x68] sm:$0xff] }
 0x1b7   : > { %1658 = vmatmul.mubr.bf16.gmra.mrb[12].mxu0 %v1021_v1 }
 0x1b8   : > { %1697 = vmatprep.mubr.msk.bf16.mxu0 %vm2096_vm0, %v3164_v50 }
 0x1bf   : > { %1698 = vmatmul.mubr.bf16.vlgmr.msra.gmra.mrb[16].mxu0 %v1314_v40 }
 0x24e   : > { %v1301_v21 = vpop.f32.mrb[0].mxu1 }
 0x24f   : > { %v1302_v11 = vadd.f32 %v2984_v33, %v1301_v21  ;;  %v1679_v54 = vpop.f32.mrb[1].mxu1 }
 0x250   : > { %v1304_v31 = vpop.f32.mrb[2].mxu1 }
 0x251   : > { %v1308_v49 = vmul.f32 %v1307_v24, %v1302_v11  ;;  %v1680_v56 = vpop.f32.mrb[3].mxu1  ;;  %v1188_v11 = vld [vmem:[%s2422_s7 + $0x78] sm:$0xff]  ;;  %s1359_s7 = scalar_lea.sflag [#allocation4], %s2415_s20 }
 0x253   : > { %1309 = vst [vmem:[%s2989_s25] sm:$0xff] %v1308_v49 }
 0x265   : > { %v1647_v50 = vpop.f32.mrb[0].mxu0 }
 0x266   : > { %v1119_v43 = vadd.f32 %v1647_v50, %v2984_v33  ;;  %v1110_v32 = vpop.f32.mrb[1].mxu0 }
 0x267   : > { %v1648_v62 = vpop.f32.mrb[2].mxu0 }
 0x268   : > { %v1191_v20 = vmul.f32 %v1175_v18, %v1119_v43  ;;  %v1122_v30 = vadd.f32 %v1648_v62, %v2984_v33  ;;  %v1113_v44 = vpop.f32.mrb[3].mxu0 }
 0x269   : > { %v1114_v26 = vadd.f32 %v2984_v33, %v1113_v44 }
 0x26a   : > { %1207 = vst [vmem:[%s2989_s25 + $0x10] sm:$0xff] %v1191_v20  ;;  %v1192_v22 = vmul.f32 %v1176_v46, %v1122_v30 }
 0x26b   : > { %v1190_v60 = vmul.f32 %v1174_v6, %v1114_v26 }
 0x26c   : > { %1208 = vst [vmem:[%s2989_s25 + $0x18] sm:$0xff] %v1192_v22 }
 0x26d   : > { %1206 = vst [vmem:[%s2989_s25 + $0x8] sm:$0xff] %v1190_v60 }
 0x275   : > { %v1651_v12 = vpop.f32.mrb[4].mxu0 }
 0x276   : > { %v1135_v55 = vadd.f32 %v1651_v12, %v2984_v33  ;;  %v1126_v19 = vpop.f32.mrb[5].mxu0 }
 0x277   : > { %v1127_v9 = vadd.f32 %v2984_v33, %v1126_v19  ;;  %v1652_v0 = vpop.f32.mrb[6].mxu0 }
 0x278   : > { %v1195_v34 = vmul.f32 %v1179_v14, %v1135_v55  ;;  %v1138_v25 = vadd.f32 %v1652_v0, %v2984_v33  ;;  %v1129_v61 = vpop.f32.mrb[7].mxu0 }
 0x279   : > { %v1193_v23 = vmul.f32 %v1177_v2, %v1127_v9  ;;  %v1130_v41 = vadd.f32 %v2984_v33, %v1129_v61 }
 0x27a   : > { %1211 = vst [vmem:[%s2989_s25 + $0x30] sm:$0xff] %v1195_v34  ;;  %v1196_v3 = vmul.f32 %v1180_v45, %v1138_v25 }
 0x27b   : > { %1209 = vst [vmem:[%s2989_s25 + $0x20] sm:$0xff] %v1193_v23  ;;  %v1194_v59 = vmul.f32 %v1178_v13, %v1130_v41 }
 0x27c   : > { %1212 = vst [vmem:[%s2989_s25 + $0x38] sm:$0xff] %v1196_v3 }
 0x27d   : > { %1210 = vst [vmem:[%s2989_s25 + $0x28] sm:$0xff] %v1194_v59 }
 0x280   : > { %v1655_v4 = vpop.f32.mrb[8].mxu0 }
 0x281   : > { %v1151_v42 = vadd.f32 %v1655_v4, %v2984_v33  ;;  %v1142_v8 = vpop.f32.mrb[9].mxu0 }
 0x282   : > { %v1143_v63 = vadd.f32 %v2984_v33, %v1142_v8  ;;  %v1656_v39 = vpop.f32.mrb[10].mxu0 }
 0x283   : > { %v1199_v16 = vmul.f32 %v1183_v15, %v1151_v42  ;;  %v1154_v53 = vadd.f32 %v1656_v39, %v2984_v33  ;;  %v1145_v37 = vpop.f32.mrb[11].mxu0 }
 0x284   : > { %v1197_v51 = vmul.f32 %v1181_v29, %v1143_v63  ;;  %v1146_v35 = vadd.f32 %v2984_v33, %v1145_v37 }
 0x285   : > { %1215 = vst [vmem:[%s2989_s25 + $0x50] sm:$0xff] %v1199_v16  ;;  %v1200_v17 = vmul.f32 %v1184_v36, %v1154_v53 }
 0x286   : > { %1213 = vst [vmem:[%s2989_s25 + $0x40] sm:$0xff] %v1197_v51  ;;  %v1198_v27 = vmul.f32 %v1182_v48, %v1146_v35 }
 0x287   : > { %1216 = vst [vmem:[%s2989_s25 + $0x58] sm:$0xff] %v1200_v17 }
 0x288   : > { %1214 = vst [vmem:[%s2989_s25 + $0x48] sm:$0xff] %v1198_v27 }
 0x28a   : > { %v1659_v58 = vpop.f32.mrb[12].mxu0 }
 0x28b   : > { %v1167_v7 = vadd.f32 %v1659_v58, %v2984_v33  ;;  %v1158_v47 = vpop.f32.mrb[13].mxu0 }
 0x28c   : > { %v1159_v5 = vadd.f32 %v2984_v33, %v1158_v47  ;;  %v1660_v28 = vpop.f32.mrb[14].mxu0 }
 0x28d   : > { %v1203_v52 = vmul.f32 %v1187_v57, %v1167_v7  ;;  %v1161_v1 = vpop.f32.mrb[15].mxu0 }
 0x28e   : > { %v1201_v40 = vmul.f32 %v1185_v38, %v1159_v5  ;;  %v1162_v21 = vadd.f32 %v2984_v33, %v1161_v1 }
 0x28f   : > { %1219 = vst [vmem:[%s2989_s25 + $0x70] sm:$0xff] %v1203_v52 }
 0x290   : > { %1217 = vst [vmem:[%s2989_s25 + $0x60] sm:$0xff] %v1201_v40  ;;  %v1202_v24 = vmul.f32 %v1186_v10, %v1162_v21 }
 0x292   : > { %1218 = vst [vmem:[%s2989_s25 + $0x68] sm:$0xff] %v1202_v24  ;;  %v1349_v54 = vpop.f32.mrb[16].mxu0 }
 0x293   : > { %v1350_v31 = vadd.f32 %v2984_v33, %v1349_v54  ;;  %v1699_v49 = vpop.f32.mrb[17].mxu0 }
 0x294   : > { %v1352_v56 = vpop.f32.mrb[18].mxu0 }
 0x295   : > { %v1356_v50 = vmul.f32 %v1350_v31, %v1188_v11  ;;  %v1700_v18 = vpop.f32.mrb[19].mxu0 }
 0x297   : > { %1357 = vst [vmem:[%s2989_s25 + $0x78] sm:$0xff] %v1356_v50 }
 0x298   : > { %2002 = shalt.err (!%p1999_p3)
}
 0x299   : > { %s2003_s15 = scalar_lea.hbm %s3041_s27, 2048  ;;  %s2007_s30 = scalar_lea.hbm %s3170_s24, 4096 }
 0x29a   : > { %p2004_p4 = scmp.ne.s32.totalorder %s3041_s27, %s2003_s15  ;;  %p2008_p12 = scmp.lt.u32.totalorder %s3041_s27, %s3170_s24 }
 0x29b   : > { %p2009_p8 = scmp.lt.u32.totalorder %s2007_s30, %s2003_s15  ;;  %p2011_p10 = scmp.lt.u32.totalorder %s2003_s15, %s3041_s27 }
 0x29c   : > { %p2005_p6 = pnand %p2004_p4, %p3171_p13 }
 0x29d   : > { %p2010_p2 = por %p2009_p8, %p2008_p12 }
 0x29e   : > { %p2006_p0 = pneg %p2005_p6 }
 0x29f   : > { %p2012_p5 = por %p2011_p10, %p2010_p2 }
 0x2a1   : > { %p2013_p11 = pnand %p2012_p5, %p2006_p0 }
 0x2a3   : > { %2016 = shalt.err (!%p2013_p11)
}
 0x2a4   : > { %s2098_s23 = smov 128   ;;  %s2099_s18 = smov 8  }
 0x2a5   : > { %1713 = dma.vmem_to_hbm [thread:$0]  (%p3171_p13), %s3043_s29, 2048, %s3041_s27, %s1359_s7, %s2098_s23, %s2098_s23, %s2099_s18  }
 0x2a6 PF: > { %s3172_s25 = sld [smem:[#allocation17_spill]]  ;;  %s3173_s9 = sld [smem:[#allocation22_spill]] }
 0x2a7   : > { %p3175_p7 = scmp.ge.s32.totalorder %s2083_s14, 2 }
 0x2ac   : > { %s1389_s13 = sand.u32 1, %s3172_s25   ;;  %p3174_p1 = scmp.ne.s32.totalorder %s3173_s9, 0 }
 0x2ad   : > { %s1390_s0 = scalar_lea.sflag [#allocation4], %s1389_s13 }
 0x2ae   : > { %p1733_p9 = pnand %p3175_p7, %p3174_p1 }
 0x2b0   : > { %2058 = dma.done.wait (!%p1733_p9), %s1390_s0, 2048  }
 0x2b1   : > { %2060 = vsyncadd (!%p1733_p9), %s1390_s0, 4294965248  ;;  %s31_s14 = sadd.s32 1, %s2083_s14   ;;  %s3176_s28 = sld [smem:[#allocation18_spill]] }
 0x2b2   : > { %p28_p3 = scmp.ge.s32.totalorder %s31_s14, 4   ;;  %s3177_s11 = sld [smem:[#allocation24_spill]] }
 0x2b3   : > { %s3178_s12 = sld [smem:[#allocation20_spill]]  ;;  %s3179_s13 = sld [smem:[#allocation23_spill]] }
 0x2b4   : > { %s3180_s30 = smov %s2067_s10  ;;  %30 = sbr.rel (!%p28_p3) target bundleno = 15 (0xf), region = 142 }
 0x2b7   : > { %s3181_s10 = smov %s3176_s28 }
 0x2bb   :  { %1395 = vsyncpa [#allocation3], 1 }
 0x2bc   :  { %1397 = vsyncpa [#allocation3 + $0x1], 1 }
 0x2bd   :  { %1398 = vsyncpa [#allocation6], 1 }
 0x2be   :  { %1400 = vsyncpa [#allocation6 + $0x1], 1 }
 0x2bf   :  { %1401 = vsyncpa [#allocation9], 1 }
 0x2c0   :  { %1403 = vsyncpa [#allocation9 + $0x1], 1 }
 0x2c1   :  { %1404 = vsyncpa [#allocation4], 1 }
 0x2c2   :  { %1406 = vsyncpa [#allocation4 + $0x1], 1 }

</bundles_post_ra>
